<compile_context>
chip_gen: v7x
topology: tpu7x:2x2x1
jax: 0.10.0
libtpu: 0.0.40
codegen_flags: <defaults>
</compile_context>

<pallas_src>
import functools

import jax
import jax.numpy as jnp
from jax.experimental import pallas as pl
from jax.experimental.pallas import tpu as pltpu


def sleep_gru_kernel(x_ref, wi0_ref, b0_ref, wbig_ref, bh0n_ref, b1c_ref,
                     fcw_ref, fcb_ref, out_ref, gi0_scr,
                     *, seq_len, batch_pad, h_pad):
    """Full 2-layer GRU recurrence + final Linear.

    Per step: one fused MXU gemm over [h1_t | h2_{t-1}] producing layer-1 gates
    for step t and gh0 (layer-0 hidden projection) for step t+1.
    """
    T, Bp, Hp = seq_len, batch_pad, h_pad

    # Hoisted layer-0 input projection for ALL timesteps: one MXU gemm, landed in
    # VMEM scratch so the unrolled loop doesn't keep it live in vregs.
    # b0 already folds b_ih (all gates) + b_hh (r, z gates).
    gi0_scr[...] = (jnp.dot(x_ref[...], wi0_ref[...],
                            preferred_element_type=jnp.float32) + b0_ref[...])

    # Small biases pre-broadcast once (a handful of vregs, hoisted out of the loop).
    bh0n = jnp.broadcast_to(bh0n_ref[...], (Bp, Hp))
    b1c = jnp.broadcast_to(b1c_ref[...], (Bp, 4 * Hp))

    h1 = jnp.zeros((Bp, Hp), jnp.float32)        # h0 = zeros, as in the module
    h2 = jnp.zeros((Bp, Hp), jnp.float32)
    gh0 = jnp.zeros((Bp, 3 * Hp), jnp.float32)   # h1_0 == 0  ->  gh0_0 == 0

    # Fully unrolled recurrence (T is small and static).
    for t in range(T):
        # ---- layer 0: gates from the prefetched input projection + carried gh0 ----
        gi0 = gi0_scr[pl.ds(t * Bp, Bp), :]                    # (Bp, 3Hp)
        rz0 = jax.nn.sigmoid(gi0[:, 0:2 * Hp] + gh0[:, 0:2 * Hp])
        r0 = rz0[:, 0:Hp]
        z0 = rz0[:, Hp:2 * Hp]
        n0 = jnp.tanh(gi0[:, 2 * Hp:3 * Hp]
                      + r0 * (gh0[:, 2 * Hp:3 * Hp] + bh0n))
        h1 = n0 + z0 * (h1 - n0)

        # ---- single fused gemm: layer-1 gates (t) + gh0 (t+1) ----
        cat = jnp.concatenate([h1, h2], axis=1)                # (Bp, 2Hp)
        g = jnp.dot(cat, wbig_ref[...],
                    preferred_element_type=jnp.float32)        # (Bp, 7Hp)

        g1 = g[:, 0:4 * Hp] + b1c                              # [r | z | n_i | n_h]
        rz1 = jax.nn.sigmoid(g1[:, 0:2 * Hp])
        r1 = rz1[:, 0:Hp]
        z1 = rz1[:, Hp:2 * Hp]
        n1 = jnp.tanh(g1[:, 2 * Hp:3 * Hp] + r1 * g1[:, 3 * Hp:4 * Hp])
        h2 = n1 + z1 * (h2 - n1)

        gh0 = g[:, 4 * Hp:7 * Hp]                              # for step t+1

    # fc(out[:, -1, :]) == Linear on the last hidden state of the top layer.
    out_ref[...] = (jnp.dot(h2, fcw_ref[...],
                            preferred_element_type=jnp.float32) + fcb_ref[...])


def prepack_sleep_gru(params, *, hidden_size, output_size):
    """One-time weight packing / padding (hoisted out of the per-call wrapper)."""
    f32 = jnp.float32
    H, O = hidden_size, output_size
    Hp = max(128, ((H + 127) // 128) * 128)   # pad each gate to a full 128-lane block
    Op = 128                                  # lane-dense output store

    def pad_gate_cols(w_t):                   # (K, 3H) -> (K, 3Hp)
        K = w_t.shape[0]
        out = jnp.zeros((K, 3 * Hp), f32)
        for g in range(3):
            out = out.at[:, g * Hp:g * Hp + H].set(w_t[:, g * H:(g + 1) * H])
        return out

    def pad_gate_vec(b):                      # (3H,) -> (1, 3Hp)
        out = jnp.zeros((3 * Hp,), f32)
        for g in range(3):
            out = out.at[g * Hp:g * Hp + H].set(b[g * H:(g + 1) * H])
        return out[None, :]

    # ---- layer 0 ----
    wi0 = pad_gate_cols(params["w_ih_l0"].T.astype(f32))            # (I, 3Hp)
    wh0 = pad_gate_cols(params["w_hh_l0"].T.astype(f32))            # (H, 3Hp)
    bi0 = params["b_ih_l0"].astype(f32)
    bh0 = params["b_hh_l0"].astype(f32)
    # fold bi0 (all gates) + bh0 (r, z gates) into the hoisted input projection
    b0 = pad_gate_vec(bi0 + jnp.concatenate([bh0[:2 * H], jnp.zeros((H,), f32)]))
    bh0n = jnp.zeros((1, Hp), f32).at[0, :H].set(bh0[2 * H:])       # (1, Hp)

    # ---- fused big weight: columns [r1 | z1 | n1_i | n1_h | gh0_r | gh0_z | gh0_n]
    # rows 0:Hp multiply h1_t, rows Hp:2Hp multiply h2_{t-1}.
    wi1 = params["w_ih_l1"].T.astype(f32)                           # (H, 3H)
    wh1 = params["w_hh_l1"].T.astype(f32)                           # (H, 3H)
    wbig = jnp.zeros((2 * Hp, 7 * Hp), f32)
    for g in range(2):  # r, z: input part (h1) in top rows, hidden part (h2) below
        wbig = wbig.at[:H, g * Hp:g * Hp + H].set(wi1[:, g * H:(g + 1) * H])
        wbig = wbig.at[Hp:Hp + H, g * Hp:g * Hp + H].set(wh1[:, g * H:(g + 1) * H])
    wbig = wbig.at[:H, 2 * Hp:2 * Hp + H].set(wi1[:, 2 * H:])       # n_i (from h1)
    wbig = wbig.at[Hp:Hp + H, 3 * Hp:3 * Hp + H].set(wh1[:, 2 * H:])  # n_h (from h2)
    wbig = wbig.at[:H, 4 * Hp:7 * Hp].set(wh0)                      # gh0 for next step

    bi1 = params["b_ih_l1"].astype(f32)
    bh1 = params["b_hh_l1"].astype(f32)
    b1c = jnp.zeros((1, 4 * Hp), f32)
    b1c = b1c.at[0, 0:H].set(bi1[:H] + bh1[:H])
    b1c = b1c.at[0, Hp:Hp + H].set(bi1[H:2 * H] + bh1[H:2 * H])
    b1c = b1c.at[0, 2 * Hp:2 * Hp + H].set(bi1[2 * H:])
    b1c = b1c.at[0, 3 * Hp:3 * Hp + H].set(bh1[2 * H:])

    # ---- fc, lane-dense padded output ----
    fcw = jnp.zeros((Hp, Op), f32).at[:H, :O].set(params["fc_w"].T.astype(f32))
    fcb = jnp.zeros((1, Op), f32).at[0, :O].set(params["fc_b"].astype(f32))

    return {"wi0": wi0, "b0": b0, "wbig": wbig, "bh0n": bh0n, "b1c": b1c,
            "fcw": fcw, "fcb": fcb, "H": H, "O": O, "Hp": Hp, "Op": Op}


def sleep_gru_forward(x, packed):
    """x: (B, T, I) batch_first, float32 -> (B, output_size)."""
    B, T, I = x.shape
    H, O, Hp, Op = packed["H"], packed["O"], packed["Hp"], packed["Op"]
    f32 = jnp.float32
    Bp = max(8, ((B + 7) // 8) * 8)           # f32 sublane minimum

    # x: time-major, batch padded, flattened to one gemm-friendly 2-D slab.
    x_tm = jnp.transpose(x.astype(f32), (1, 0, 2))                  # (T, B, I)
    x_p = jnp.zeros((T, Bp, I), f32).at[:, :B, :].set(x_tm)
    x2d = x_p.reshape(T * Bp, I)

    kernel = functools.partial(sleep_gru_kernel,
                               seq_len=T, batch_pad=Bp, h_pad=Hp)
    vmem = pl.BlockSpec(memory_space=pltpu.MemorySpace.VMEM)
    args = (x2d, packed["wi0"], packed["b0"], packed["wbig"], packed["bh0n"],
            packed["b1c"], packed["fcw"], packed["fcb"])

    out_p = pl.pallas_call(
        kernel,
        out_shape=jax.ShapeDtypeStruct((Bp, Op), jnp.float32),
        in_specs=[vmem] * len(args),
        out_specs=vmem,
        scratch_shapes=[pltpu.VMEM((T * Bp, 3 * Hp), jnp.float32)],
    )(*args)
    return out_p[:B, :O]


def init_params(key, input_size, hidden_size, output_size):
    """Deterministic PyTorch-style init: U(-1/sqrt(H), 1/sqrt(H))."""
    k = 1.0 / jnp.sqrt(hidden_size)
    keys = jax.random.split(key, 10)
    u = lambda kk, shape: jax.random.uniform(kk, shape, jnp.float32,
                                             minval=-k, maxval=k)
    H, I, O = hidden_size, input_size, output_size
    return {
        "w_ih_l0": u(keys[0], (3 * H, I)),
        "w_hh_l0": u(keys[1], (3 * H, H)),
        "b_ih_l0": u(keys[2], (3 * H,)),
        "b_hh_l0": u(keys[3], (3 * H,)),
        "w_ih_l1": u(keys[4], (3 * H, H)),
        "w_hh_l1": u(keys[5], (3 * H, H)),
        "b_ih_l1": u(keys[6], (3 * H,)),
        "b_hh_l1": u(keys[7], (3 * H,)),
        "fc_w": u(keys[8], (O, H)),
        "fc_b": u(keys[9], (O,)),
    }


def sleep_gru_reference(x, params, *, hidden_size, output_size):
    """Pure-JAX reference replicating nn.GRU(batch_first, 2 layers) + nn.Linear."""
    H = hidden_size
    B, T, _ = x.shape

    def cell(x_t, h_prev, wi, wh, bi, bh):
        gi = x_t @ wi.T + bi
        gh = h_prev @ wh.T + bh
        r = jax.nn.sigmoid(gi[:, :H] + gh[:, :H])
        z = jax.nn.sigmoid(gi[:, H:2 * H] + gh[:, H:2 * H])
        n = jnp.tanh(gi[:, 2 * H:] + r * gh[:, 2 * H:])
        return (1.0 - z) * n + z * h_prev

    h1 = jnp.zeros((B, H), jnp.float32)
    h2 = jnp.zeros((B, H), jnp.float32)
    for t in range(T):
        h1 = cell(x[:, t, :], h1, params["w_ih_l0"], params["w_hh_l0"],
                  params["b_ih_l0"], params["b_hh_l0"])
        h2 = cell(h1, h2, params["w_ih_l1"], params["w_hh_l1"],
                  params["b_ih_l1"], params["b_hh_l1"])
    return h2 @ params["fc_w"].T + params["fc_b"]


if __name__ == "__main__":
    # Small shapes consistent with the module: batch=2, seq=8, features=16,
    # hidden=64, num_layers=2, output=1.
    B, T, I = 2, 8, 16
    H, O = 64, 1

    key = jax.random.PRNGKey(0)
    k_params, k_x = jax.random.split(key)
    params = init_params(k_params, I, H, O)
    x = jax.random.normal(k_x, (B, T, I), jnp.float32)

    packed = prepack_sleep_gru(params, hidden_size=H, output_size=O)  # once per params
    out = sleep_gru_forward(x, packed)
    out = jax.block_until_ready(out)

    ref = sleep_gru_reference(x, params, hidden_size=H, output_size=O)
    assert out.shape == (B, O)
    assert jnp.allclose(out, ref, atol=1e-5, rtol=1e-5), (
        f"max abs err {jnp.max(jnp.abs(out - ref))}")

    print("KERNEL_OK")
</pallas_src>

<mosaic_0001>
module attributes {stable_mosaic.version = 11 : i64} {
  func.func @sleep_gru_kernel(%arg0: memref<64x16xf32, #tpu.memory_space<vmem>>, %arg1: memref<16x384xf32, #tpu.memory_space<vmem>>, %arg2: memref<1x384xf32, #tpu.memory_space<vmem>>, %arg3: memref<256x896xf32, #tpu.memory_space<vmem>>, %arg4: memref<1x128xf32, #tpu.memory_space<vmem>>, %arg5: memref<1x512xf32, #tpu.memory_space<vmem>>, %arg6: memref<128x128xf32, #tpu.memory_space<vmem>>, %arg7: memref<1x128xf32, #tpu.memory_space<vmem>>, %arg8: memref<8x128xf32, #tpu.memory_space<vmem>>, %arg9: memref<64x384xf32, #tpu.memory_space<vmem>>) attributes {dimension_semantics = [], scalar_prefetch = 0 : i64, scratch_operands = 1 : i64, tpu.core_type = #tpu.core_type<tc>} {
    %c0 = arith.constant 0 : index
    %c0_0 = arith.constant 0 : index
    %0 = vector.load %arg0[%c0, %c0_0] : memref<64x16xf32, #tpu.memory_space<vmem>>, vector<64x16xf32>
    %c0_1 = arith.constant 0 : index
    %c0_2 = arith.constant 0 : index
    %1 = vector.load %arg1[%c0_1, %c0_2] : memref<16x384xf32, #tpu.memory_space<vmem>>, vector<16x384xf32>
    %cst = arith.constant dense<0.000000e+00> : vector<64x384xf32>
    %2 = tpu.matmul %0, %1, %cst {dimension_numbers = #tpu.dot_dimension_numbers<[1], [0], [0], [1], [0, 0, 1, 1], [], []>} : vector<64x16xf32>, vector<16x384xf32>, vector<64x384xf32> -> vector<64x384xf32>
    %c0_3 = arith.constant 0 : index
    %c0_4 = arith.constant 0 : index
    %3 = vector.load %arg2[%c0_3, %c0_4] : memref<1x384xf32, #tpu.memory_space<vmem>>, vector<1x384xf32>
    %4 = vector.broadcast %3 : vector<1x384xf32> to vector<64x384xf32>
    %5 = arith.addf %2, %4 : vector<64x384xf32>
    %c0_5 = arith.constant 0 : index
    %c0_6 = arith.constant 0 : index
    %6 = vector.load %arg9[%c0_5, %c0_6] : memref<64x384xf32, #tpu.memory_space<vmem>>, vector<64x384xf32>
    tpu.vector_store %arg9[%c0_5, %c0_6], %5 {strides = array<i32>} : memref<64x384xf32, #tpu.memory_space<vmem>>, vector<64x384xf32>,
    %c0_7 = arith.constant 0 : index
    %c0_8 = arith.constant 0 : index
    %7 = vector.load %arg4[%c0_7, %c0_8] : memref<1x128xf32, #tpu.memory_space<vmem>>, vector<1x128xf32>
    %8 = vector.shape_cast %7 : vector<1x128xf32> to vector<1x128xf32>
    %9 = vector.broadcast %8 : vector<1x128xf32> to vector<8x128xf32>
    %c0_9 = arith.constant 0 : index
    %c0_10 = arith.constant 0 : index
    %10 = vector.load %arg5[%c0_9, %c0_10] : memref<1x512xf32, #tpu.memory_space<vmem>>, vector<1x512xf32>
    %11 = vector.shape_cast %10 : vector<1x512xf32> to vector<1x512xf32>
    %12 = vector.broadcast %11 : vector<1x512xf32> to vector<8x512xf32>
    %cst_11 = arith.constant 0.000000e+00 : f32
    %13 = vector.broadcast %cst_11 : f32 to vector<8x128xf32>
    %cst_12 = arith.constant 0.000000e+00 : f32
    %14 = vector.broadcast %cst_12 : f32 to vector<8x128xf32>
    %cst_13 = arith.constant 0.000000e+00 : f32
    %15 = vector.broadcast %cst_13 : f32 to vector<8x384xf32>
    %c0_14 = arith.constant 0 : index
    %c0_15 = arith.constant 0 : index
    %16 = vector.load %arg9[%c0_14, %c0_15] : memref<64x384xf32, #tpu.memory_space<vmem>>, vector<8x384xf32>
    %17 = vector.extract_strided_slice %16 {offsets = [0, 0], sizes = [8, 256], strides = [1, 1]} : vector<8x384xf32> to vector<8x256xf32>
    %18 = vector.extract_strided_slice %15 {offsets = [0, 0], sizes = [8, 256], strides = [1, 1]} : vector<8x384xf32> to vector<8x256xf32>
    %19 = arith.addf %17, %18 : vector<8x256xf32>
    %20 = arith.negf %19 : vector<8x256xf32>
    %21 = math.exp %20 : vector<8x256xf32>
    %cst_16 = arith.constant 1.000000e+00 : f32
    %22 = vector.broadcast %cst_16 : f32 to vector<8x256xf32>
    %23 = arith.addf %22, %21 : vector<8x256xf32>
    %24 = arith.divf %22, %23 : vector<8x256xf32>
    %25 = vector.extract_strided_slice %24 {offsets = [0, 0], sizes = [8, 128], strides = [1, 1]} : vector<8x256xf32> to vector<8x128xf32>
    %26 = vector.extract_strided_slice %24 {offsets = [0, 128], sizes = [8, 128], strides = [1, 1]} : vector<8x256xf32> to vector<8x128xf32>
    %27 = vector.extract_strided_slice %16 {offsets = [0, 256], sizes = [8, 128], strides = [1, 1]} : vector<8x384xf32> to vector<8x128xf32>
    %28 = vector.extract_strided_slice %15 {offsets = [0, 256], sizes = [8, 128], strides = [1, 1]} : vector<8x384xf32> to vector<8x128xf32>
    %29 = arith.addf %28, %9 : vector<8x128xf32>
    %30 = arith.mulf %25, %29 : vector<8x128xf32>
    %31 = arith.addf %27, %30 : vector<8x128xf32>
    %32 = math.tanh %31 : vector<8x128xf32>
    %33 = arith.subf %13, %32 : vector<8x128xf32>
    %34 = arith.mulf %26, %33 : vector<8x128xf32>
    %35 = arith.addf %32, %34 : vector<8x128xf32>
    %36 = tpu.concatenate %35, %14 in 1 : vector<8x128xf32>, vector<8x128xf32> -> vector<8x256xf32>
    %c0_17 = arith.constant 0 : index
    %c0_18 = arith.constant 0 : index
    %37 = vector.load %arg3[%c0_17, %c0_18] : memref<256x896xf32, #tpu.memory_space<vmem>>, vector<256x896xf32>
    %cst_19 = arith.constant dense<0.000000e+00> : vector<8x896xf32>
    %38 = tpu.matmul %36, %37, %cst_19 {dimension_numbers = #tpu.dot_dimension_numbers<[1], [0], [0], [1], [0, 0, 1, 1], [], []>} : vector<8x256xf32>, vector<256x896xf32>, vector<8x896xf32> -> vector<8x896xf32>
    %39 = vector.extract_strided_slice %38 {offsets = [0, 0], sizes = [8, 512], strides = [1, 1]} : vector<8x896xf32> to vector<8x512xf32>
    %40 = arith.addf %39, %12 : vector<8x512xf32>
    %41 = vector.extract_strided_slice %40 {offsets = [0, 0], sizes = [8, 256], strides = [1, 1]} : vector<8x512xf32> to vector<8x256xf32>
    %42 = arith.negf %41 : vector<8x256xf32>
    %43 = math.exp %42 : vector<8x256xf32>
    %cst_20 = arith.constant 1.000000e+00 : f32
    %44 = vector.broadcast %cst_20 : f32 to vector<8x256xf32>
    %45 = arith.addf %44, %43 : vector<8x256xf32>
    %46 = arith.divf %44, %45 : vector<8x256xf32>
    %47 = vector.extract_strided_slice %46 {offsets = [0, 0], sizes = [8, 128], strides = [1, 1]} : vector<8x256xf32> to vector<8x128xf32>
    %48 = vector.extract_strided_slice %46 {offsets = [0, 128], sizes = [8, 128], strides = [1, 1]} : vector<8x256xf32> to vector<8x128xf32>
    %49 = vector.extract_strided_slice %40 {offsets = [0, 256], sizes = [8, 128], strides = [1, 1]} : vector<8x512xf32> to vector<8x128xf32>
    %50 = vector.extract_strided_slice %40 {offsets = [0, 384], sizes = [8, 128], strides = [1, 1]} : vector<8x512xf32> to vector<8x128xf32>
    %51 = arith.mulf %47, %50 : vector<8x128xf32>
    %52 = arith.addf %49, %51 : vector<8x128xf32>
    %53 = math.tanh %52 : vector<8x128xf32>
    %54 = arith.subf %14, %53 : vector<8x128xf32>
    %55 = arith.mulf %48, %54 : vector<8x128xf32>
    %56 = arith.addf %53, %55 : vector<8x128xf32>
    %57 = vector.extract_strided_slice %38 {offsets = [0, 512], sizes = [8, 384], strides = [1, 1]} : vector<8x896xf32> to vector<8x384xf32>
    %c8 = arith.constant 8 : index
    %c0_21 = arith.constant 0 : index
    %58 = vector.load %arg9[%c8, %c0_21] : memref<64x384xf32, #tpu.memory_space<vmem>>, vector<8x384xf32>
    %59 = vector.extract_strided_slice %58 {offsets = [0, 0], sizes = [8, 256], strides = [1, 1]} : vector<8x384xf32> to vector<8x256xf32>
    %60 = vector.extract_strided_slice %57 {offsets = [0, 0], sizes = [8, 256], strides = [1, 1]} : vector<8x384xf32> to vector<8x256xf32>
    %61 = arith.addf %59, %60 : vector<8x256xf32>
    %62 = arith.negf %61 : vector<8x256xf32>
    %63 = math.exp %62 : vector<8x256xf32>
    %cst_22 = arith.constant 1.000000e+00 : f32
    %64 = vector.broadcast %cst_22 : f32 to vector<8x256xf32>
    %65 = arith.addf %64, %63 : vector<8x256xf32>
    %66 = arith.divf %64, %65 : vector<8x256xf32>
    %67 = vector.extract_strided_slice %66 {offsets = [0, 0], sizes = [8, 128], strides = [1, 1]} : vector<8x256xf32> to vector<8x128xf32>
    %68 = vector.extract_strided_slice %66 {offsets = [0, 128], sizes = [8, 128], strides = [1, 1]} : vector<8x256xf32> to vector<8x128xf32>
    %69 = vector.extract_strided_slice %58 {offsets = [0, 256], sizes = [8, 128], strides = [1, 1]} : vector<8x384xf32> to vector<8x128xf32>
    %70 = vector.extract_strided_slice %57 {offsets = [0, 256], sizes = [8, 128], strides = [1, 1]} : vector<8x384xf32> to vector<8x128xf32>
    %71 = arith.addf %70, %9 : vector<8x128xf32>
    %72 = arith.mulf %67, %71 : vector<8x128xf32>
    %73 = arith.addf %69, %72 : vector<8x128xf32>
    %74 = math.tanh %73 : vector<8x128xf32>
    %75 = arith.subf %35, %74 : vector<8x128xf32>
    %76 = arith.mulf %68, %75 : vector<8x128xf32>
    %77 = arith.addf %74, %76 : vector<8x128xf32>
    %78 = tpu.concatenate %77, %56 in 1 : vector<8x128xf32>, vector<8x128xf32> -> vector<8x256xf32>
    %c0_23 = arith.constant 0 : index
    %c0_24 = arith.constant 0 : index
    %79 = vector.load %arg3[%c0_23, %c0_24] : memref<256x896xf32, #tpu.memory_space<vmem>>, vector<256x896xf32>
    %cst_25 = arith.constant dense<0.000000e+00> : vector<8x896xf32>
    %80 = tpu.matmul %78, %79, %cst_25 {dimension_numbers = #tpu.dot_dimension_numbers<[1], [0], [0], [1], [0, 0, 1, 1], [], []>} : vector<8x256xf32>, vector<256x896xf32>, vector<8x896xf32> -> vector<8x896xf32>
    %81 = vector.extract_strided_slice %80 {offsets = [0, 0], sizes = [8, 512], strides = [1, 1]} : vector<8x896xf32> to vector<8x512xf32>
    %82 = arith.addf %81, %12 : vector<8x512xf32>
    %83 = vector.extract_strided_slice %82 {offsets = [0, 0], sizes = [8, 256], strides = [1, 1]} : vector<8x512xf32> to vector<8x256xf32>
    %84 = arith.negf %83 : vector<8x256xf32>
    %85 = math.exp %84 : vector<8x256xf32>
    %cst_26 = arith.constant 1.000000e+00 : f32
    %86 = vector.broadcast %cst_26 : f32 to vector<8x256xf32>
    %87 = arith.addf %86, %85 : vector<8x256xf32>
    %88 = arith.divf %86, %87 : vector<8x256xf32>
    %89 = vector.extract_strided_slice %88 {offsets = [0, 0], sizes = [8, 128], strides = [1, 1]} : vector<8x256xf32> to vector<8x128xf32>
    %90 = vector.extract_strided_slice %88 {offsets = [0, 128], sizes = [8, 128], strides = [1, 1]} : vector<8x256xf32> to vector<8x128xf32>
    %91 = vector.extract_strided_slice %82 {offsets = [0, 256], sizes = [8, 128], strides = [1, 1]} : vector<8x512xf32> to vector<8x128xf32>
    %92 = vector.extract_strided_slice %82 {offsets = [0, 384], sizes = [8, 128], strides = [1, 1]} : vector<8x512xf32> to vector<8x128xf32>
    %93 = arith.mulf %89, %92 : vector<8x128xf32>
    %94 = arith.addf %91, %93 : vector<8x128xf32>
    %95 = math.tanh %94 : vector<8x128xf32>
    %96 = arith.subf %56, %95 : vector<8x128xf32>
    %97 = arith.mulf %90, %96 : vector<8x128xf32>
    %98 = arith.addf %95, %97 : vector<8x128xf32>
    %99 = vector.extract_strided_slice %80 {offsets = [0, 512], sizes = [8, 384], strides = [1, 1]} : vector<8x896xf32> to vector<8x384xf32>
    %c16 = arith.constant 16 : index
    %c0_27 = arith.constant 0 : index
    %100 = vector.load %arg9[%c16, %c0_27] : memref<64x384xf32, #tpu.memory_space<vmem>>, vector<8x384xf32>
    %101 = vector.extract_strided_slice %100 {offsets = [0, 0], sizes = [8, 256], strides = [1, 1]} : vector<8x384xf32> to vector<8x256xf32>
    %102 = vector.extract_strided_slice %99 {offsets = [0, 0], sizes = [8, 256], strides = [1, 1]} : vector<8x384xf32> to vector<8x256xf32>
    %103 = arith.addf %101, %102 : vector<8x256xf32>
    %104 = arith.negf %103 : vector<8x256xf32>
    %105 = math.exp %104 : vector<8x256xf32>
    %cst_28 = arith.constant 1.000000e+00 : f32
    %106 = vector.broadcast %cst_28 : f32 to vector<8x256xf32>
    %107 = arith.addf %106, %105 : vector<8x256xf32>
    %108 = arith.divf %106, %107 : vector<8x256xf32>
    %109 = vector.extract_strided_slice %108 {offsets = [0, 0], sizes = [8, 128], strides = [1, 1]} : vector<8x256xf32> to vector<8x128xf32>
    %110 = vector.extract_strided_slice %108 {offsets = [0, 128], sizes = [8, 128], strides = [1, 1]} : vector<8x256xf32> to vector<8x128xf32>
    %111 = vector.extract_strided_slice %100 {offsets = [0, 256], sizes = [8, 128], strides = [1, 1]} : vector<8x384xf32> to vector<8x128xf32>
    %112 = vector.extract_strided_slice %99 {offsets = [0, 256], sizes = [8, 128], strides = [1, 1]} : vector<8x384xf32> to vector<8x128xf32>
    %113 = arith.addf %112, %9 : vector<8x128xf32>
    %114 = arith.mulf %109, %113 : vector<8x128xf32>
    %115 = arith.addf %111, %114 : vector<8x128xf32>
    %116 = math.tanh %115 : vector<8x128xf32>
    %117 = arith.subf %77, %116 : vector<8x128xf32>
    %118 = arith.mulf %110, %117 : vector<8x128xf32>
    %119 = arith.addf %116, %118 : vector<8x128xf32>
    %120 = tpu.concatenate %119, %98 in 1 : vector<8x128xf32>, vector<8x128xf32> -> vector<8x256xf32>
    %c0_29 = arith.constant 0 : index
    %c0_30 = arith.constant 0 : index
    %121 = vector.load %arg3[%c0_29, %c0_30] : memref<256x896xf32, #tpu.memory_space<vmem>>, vector<256x896xf32>
    %cst_31 = arith.constant dense<0.000000e+00> : vector<8x896xf32>
    %122 = tpu.matmul %120, %121, %cst_31 {dimension_numbers = #tpu.dot_dimension_numbers<[1], [0], [0], [1], [0, 0, 1, 1], [], []>} : vector<8x256xf32>, vector<256x896xf32>, vector<8x896xf32> -> vector<8x896xf32>
    %123 = vector.extract_strided_slice %122 {offsets = [0, 0], sizes = [8, 512], strides = [1, 1]} : vector<8x896xf32> to vector<8x512xf32>
    %124 = arith.addf %123, %12 : vector<8x512xf32>
    %125 = vector.extract_strided_slice %124 {offsets = [0, 0], sizes = [8, 256], strides = [1, 1]} : vector<8x512xf32> to vector<8x256xf32>
    %126 = arith.negf %125 : vector<8x256xf32>
    %127 = math.exp %126 : vector<8x256xf32>
    %cst_32 = arith.constant 1.000000e+00 : f32
    %128 = vector.broadcast %cst_32 : f32 to vector<8x256xf32>
    %129 = arith.addf %128, %127 : vector<8x256xf32>
    %130 = arith.divf %128, %129 : vector<8x256xf32>
    %131 = vector.extract_strided_slice %130 {offsets = [0, 0], sizes = [8, 128], strides = [1, 1]} : vector<8x256xf32> to vector<8x128xf32>
    %132 = vector.extract_strided_slice %130 {offsets = [0, 128], sizes = [8, 128], strides = [1, 1]} : vector<8x256xf32> to vector<8x128xf32>
    %133 = vector.extract_strided_slice %124 {offsets = [0, 256], sizes = [8, 128], strides = [1, 1]} : vector<8x512xf32> to vector<8x128xf32>
    %134 = vector.extract_strided_slice %124 {offsets = [0, 384], sizes = [8, 128], strides = [1, 1]} : vector<8x512xf32> to vector<8x128xf32>
    %135 = arith.mulf %131, %134 : vector<8x128xf32>
    %136 = arith.addf %133, %135 : vector<8x128xf32>
    %137 = math.tanh %136 : vector<8x128xf32>
    %138 = arith.subf %98, %137 : vector<8x128xf32>
    %139 = arith.mulf %132, %138 : vector<8x128xf32>
    %140 = arith.addf %137, %139 : vector<8x128xf32>
    %141 = vector.extract_strided_slice %122 {offsets = [0, 512], sizes = [8, 384], strides = [1, 1]} : vector<8x896xf32> to vector<8x384xf32>
    %c24 = arith.constant 24 : index
    %c0_33 = arith.constant 0 : index
    %142 = vector.load %arg9[%c24, %c0_33] : memref<64x384xf32, #tpu.memory_space<vmem>>, vector<8x384xf32>
    %143 = vector.extract_strided_slice %142 {offsets = [0, 0], sizes = [8, 256], strides = [1, 1]} : vector<8x384xf32> to vector<8x256xf32>
    %144 = vector.extract_strided_slice %141 {offsets = [0, 0], sizes = [8, 256], strides = [1, 1]} : vector<8x384xf32> to vector<8x256xf32>
    %145 = arith.addf %143, %144 : vector<8x256xf32>
    %146 = arith.negf %145 : vector<8x256xf32>
    %147 = math.exp %146 : vector<8x256xf32>
    %cst_34 = arith.constant 1.000000e+00 : f32
    %148 = vector.broadcast %cst_34 : f32 to vector<8x256xf32>
    %149 = arith.addf %148, %147 : vector<8x256xf32>
    %150 = arith.divf %148, %149 : vector<8x256xf32>
    %151 = vector.extract_strided_slice %150 {offsets = [0, 0], sizes = [8, 128], strides = [1, 1]} : vector<8x256xf32> to vector<8x128xf32>
    %152 = vector.extract_strided_slice %150 {offsets = [0, 128], sizes = [8, 128], strides = [1, 1]} : vector<8x256xf32> to vector<8x128xf32>
    %153 = vector.extract_strided_slice %142 {offsets = [0, 256], sizes = [8, 128], strides = [1, 1]} : vector<8x384xf32> to vector<8x128xf32>
    %154 = vector.extract_strided_slice %141 {offsets = [0, 256], sizes = [8, 128], strides = [1, 1]} : vector<8x384xf32> to vector<8x128xf32>
    %155 = arith.addf %154, %9 : vector<8x128xf32>
    %156 = arith.mulf %151, %155 : vector<8x128xf32>
    %157 = arith.addf %153, %156 : vector<8x128xf32>
    %158 = math.tanh %157 : vector<8x128xf32>
    %159 = arith.subf %119, %158 : vector<8x128xf32>
    %160 = arith.mulf %152, %159 : vector<8x128xf32>
    %161 = arith.addf %158, %160 : vector<8x128xf32>
    %162 = tpu.concatenate %161, %140 in 1 : vector<8x128xf32>, vector<8x128xf32> -> vector<8x256xf32>
    %c0_35 = arith.constant 0 : index
    %c0_36 = arith.constant 0 : index
    %163 = vector.load %arg3[%c0_35, %c0_36] : memref<256x896xf32, #tpu.memory_space<vmem>>, vector<256x896xf32>
    %cst_37 = arith.constant dense<0.000000e+00> : vector<8x896xf32>
    %164 = tpu.matmul %162, %163, %cst_37 {dimension_numbers = #tpu.dot_dimension_numbers<[1], [0], [0], [1], [0, 0, 1, 1], [], []>} : vector<8x256xf32>, vector<256x896xf32>, vector<8x896xf32> -> vector<8x896xf32>
    %165 = vector.extract_strided_slice %164 {offsets = [0, 0], sizes = [8, 512], strides = [1, 1]} : vector<8x896xf32> to vector<8x512xf32>
    %166 = arith.addf %165, %12 : vector<8x512xf32>
    %167 = vector.extract_strided_slice %166 {offsets = [0, 0], sizes = [8, 256], strides = [1, 1]} : vector<8x512xf32> to vector<8x256xf32>
    %168 = arith.negf %167 : vector<8x256xf32>
    %169 = math.exp %168 : vector<8x256xf32>
    %cst_38 = arith.constant 1.000000e+00 : f32
    %170 = vector.broadcast %cst_38 : f32 to vector<8x256xf32>
    %171 = arith.addf %170, %169 : vector<8x256xf32>
    %172 = arith.divf %170, %171 : vector<8x256xf32>
    %173 = vector.extract_strided_slice %172 {offsets = [0, 0], sizes = [8, 128], strides = [1, 1]} : vector<8x256xf32> to vector<8x128xf32>
    %174 = vector.extract_strided_slice %172 {offsets = [0, 128], sizes = [8, 128], strides = [1, 1]} : vector<8x256xf32> to vector<8x128xf32>
    %175 = vector.extract_strided_slice %166 {offsets = [0, 256], sizes = [8, 128], strides = [1, 1]} : vector<8x512xf32> to vector<8x128xf32>
    %176 = vector.extract_strided_slice %166 {offsets = [0, 384], sizes = [8, 128], strides = [1, 1]} : vector<8x512xf32> to vector<8x128xf32>
    %177 = arith.mulf %173, %176 : vector<8x128xf32>
    %178 = arith.addf %175, %177 : vector<8x128xf32>
    %179 = math.tanh %178 : vector<8x128xf32>
    %180 = arith.subf %140, %179 : vector<8x128xf32>
    %181 = arith.mulf %174, %180 : vector<8x128xf32>
    %182 = arith.addf %179, %181 : vector<8x128xf32>
    %183 = vector.extract_strided_slice %164 {offsets = [0, 512], sizes = [8, 384], strides = [1, 1]} : vector<8x896xf32> to vector<8x384xf32>
    %c32 = arith.constant 32 : index
    %c0_39 = arith.constant 0 : index
    %184 = vector.load %arg9[%c32, %c0_39] : memref<64x384xf32, #tpu.memory_space<vmem>>, vector<8x384xf32>
    %185 = vector.extract_strided_slice %184 {offsets = [0, 0], sizes = [8, 256], strides = [1, 1]} : vector<8x384xf32> to vector<8x256xf32>
    %186 = vector.extract_strided_slice %183 {offsets = [0, 0], sizes = [8, 256], strides = [1, 1]} : vector<8x384xf32> to vector<8x256xf32>
    %187 = arith.addf %185, %186 : vector<8x256xf32>
    %188 = arith.negf %187 : vector<8x256xf32>
    %189 = math.exp %188 : vector<8x256xf32>
    %cst_40 = arith.constant 1.000000e+00 : f32
    %190 = vector.broadcast %cst_40 : f32 to vector<8x256xf32>
    %191 = arith.addf %190, %189 : vector<8x256xf32>
    %192 = arith.divf %190, %191 : vector<8x256xf32>
    %193 = vector.extract_strided_slice %192 {offsets = [0, 0], sizes = [8, 128], strides = [1, 1]} : vector<8x256xf32> to vector<8x128xf32>
    %194 = vector.extract_strided_slice %192 {offsets = [0, 128], sizes = [8, 128], strides = [1, 1]} : vector<8x256xf32> to vector<8x128xf32>
    %195 = vector.extract_strided_slice %184 {offsets = [0, 256], sizes = [8, 128], strides = [1, 1]} : vector<8x384xf32> to vector<8x128xf32>
    %196 = vector.extract_strided_slice %183 {offsets = [0, 256], sizes = [8, 128], strides = [1, 1]} : vector<8x384xf32> to vector<8x128xf32>
    %197 = arith.addf %196, %9 : vector<8x128xf32>
    %198 = arith.mulf %193, %197 : vector<8x128xf32>
    %199 = arith.addf %195, %198 : vector<8x128xf32>
    %200 = math.tanh %199 : vector<8x128xf32>
    %201 = arith.subf %161, %200 : vector<8x128xf32>
    %202 = arith.mulf %194, %201 : vector<8x128xf32>
    %203 = arith.addf %200, %202 : vector<8x128xf32>
    %204 = tpu.concatenate %203, %182 in 1 : vector<8x128xf32>, vector<8x128xf32> -> vector<8x256xf32>
    %c0_41 = arith.constant 0 : index
    %c0_42 = arith.constant 0 : index
    %205 = vector.load %arg3[%c0_41, %c0_42] : memref<256x896xf32, #tpu.memory_space<vmem>>, vector<256x896xf32>
    %cst_43 = arith.constant dense<0.000000e+00> : vector<8x896xf32>
    %206 = tpu.matmul %204, %205, %cst_43 {dimension_numbers = #tpu.dot_dimension_numbers<[1], [0], [0], [1], [0, 0, 1, 1], [], []>} : vector<8x256xf32>, vector<256x896xf32>, vector<8x896xf32> -> vector<8x896xf32>
    %207 = vector.extract_strided_slice %206 {offsets = [0, 0], sizes = [8, 512], strides = [1, 1]} : vector<8x896xf32> to vector<8x512xf32>
    %208 = arith.addf %207, %12 : vector<8x512xf32>
    %209 = vector.extract_strided_slice %208 {offsets = [0, 0], sizes = [8, 256], strides = [1, 1]} : vector<8x512xf32> to vector<8x256xf32>
    %210 = arith.negf %209 : vector<8x256xf32>
    %211 = math.exp %210 : vector<8x256xf32>
    %cst_44 = arith.constant 1.000000e+00 : f32
    %212 = vector.broadcast %cst_44 : f32 to vector<8x256xf32>
    %213 = arith.addf %212, %211 : vector<8x256xf32>
    %214 = arith.divf %212, %213 : vector<8x256xf32>
    %215 = vector.extract_strided_slice %214 {offsets = [0, 0], sizes = [8, 128], strides = [1, 1]} : vector<8x256xf32> to vector<8x128xf32>
    %216 = vector.extract_strided_slice %214 {offsets = [0, 128], sizes = [8, 128], strides = [1, 1]} : vector<8x256xf32> to vector<8x128xf32>
    %217 = vector.extract_strided_slice %208 {offsets = [0, 256], sizes = [8, 128], strides = [1, 1]} : vector<8x512xf32> to vector<8x128xf32>
    %218 = vector.extract_strided_slice %208 {offsets = [0, 384], sizes = [8, 128], strides = [1, 1]} : vector<8x512xf32> to vector<8x128xf32>
    %219 = arith.mulf %215, %218 : vector<8x128xf32>
    %220 = arith.addf %217, %219 : vector<8x128xf32>
    %221 = math.tanh %220 : vector<8x128xf32>
    %222 = arith.subf %182, %221 : vector<8x128xf32>
    %223 = arith.mulf %216, %222 : vector<8x128xf32>
    %224 = arith.addf %221, %223 : vector<8x128xf32>
    %225 = vector.extract_strided_slice %206 {offsets = [0, 512], sizes = [8, 384], strides = [1, 1]} : vector<8x896xf32> to vector<8x384xf32>
    %c40 = arith.constant 40 : index
    %c0_45 = arith.constant 0 : index
    %226 = vector.load %arg9[%c40, %c0_45] : memref<64x384xf32, #tpu.memory_space<vmem>>, vector<8x384xf32>
    %227 = vector.extract_strided_slice %226 {offsets = [0, 0], sizes = [8, 256], strides = [1, 1]} : vector<8x384xf32> to vector<8x256xf32>
    %228 = vector.extract_strided_slice %225 {offsets = [0, 0], sizes = [8, 256], strides = [1, 1]} : vector<8x384xf32> to vector<8x256xf32>
    %229 = arith.addf %227, %228 : vector<8x256xf32>
    %230 = arith.negf %229 : vector<8x256xf32>
    %231 = math.exp %230 : vector<8x256xf32>
    %cst_46 = arith.constant 1.000000e+00 : f32
    %232 = vector.broadcast %cst_46 : f32 to vector<8x256xf32>
    %233 = arith.addf %232, %231 : vector<8x256xf32>
    %234 = arith.divf %232, %233 : vector<8x256xf32>
    %235 = vector.extract_strided_slice %234 {offsets = [0, 0], sizes = [8, 128], strides = [1, 1]} : vector<8x256xf32> to vector<8x128xf32>
    %236 = vector.extract_strided_slice %234 {offsets = [0, 128], sizes = [8, 128], strides = [1, 1]} : vector<8x256xf32> to vector<8x128xf32>
    %237 = vector.extract_strided_slice %226 {offsets = [0, 256], sizes = [8, 128], strides = [1, 1]} : vector<8x384xf32> to vector<8x128xf32>
    %238 = vector.extract_strided_slice %225 {offsets = [0, 256], sizes = [8, 128], strides = [1, 1]} : vector<8x384xf32> to vector<8x128xf32>
    %239 = arith.addf %238, %9 : vector<8x128xf32>
    %240 = arith.mulf %235, %239 : vector<8x128xf32>
    %241 = arith.addf %237, %240 : vector<8x128xf32>
    %242 = math.tanh %241 : vector<8x128xf32>
    %243 = arith.subf %203, %242 : vector<8x128xf32>
    %244 = arith.mulf %236, %243 : vector<8x128xf32>
    %245 = arith.addf %242, %244 : vector<8x128xf32>
    %246 = tpu.concatenate %245, %224 in 1 : vector<8x128xf32>, vector<8x128xf32> -> vector<8x256xf32>
    %c0_47 = arith.constant 0 : index
    %c0_48 = arith.constant 0 : index
    %247 = vector.load %arg3[%c0_47, %c0_48] : memref<256x896xf32, #tpu.memory_space<vmem>>, vector<256x896xf32>
    %cst_49 = arith.constant dense<0.000000e+00> : vector<8x896xf32>
    %248 = tpu.matmul %246, %247, %cst_49 {dimension_numbers = #tpu.dot_dimension_numbers<[1], [0], [0], [1], [0, 0, 1, 1], [], []>} : vector<8x256xf32>, vector<256x896xf32>, vector<8x896xf32> -> vector<8x896xf32>
    %249 = vector.extract_strided_slice %248 {offsets = [0, 0], sizes = [8, 512], strides = [1, 1]} : vector<8x896xf32> to vector<8x512xf32>
    %250 = arith.addf %249, %12 : vector<8x512xf32>
    %251 = vector.extract_strided_slice %250 {offsets = [0, 0], sizes = [8, 256], strides = [1, 1]} : vector<8x512xf32> to vector<8x256xf32>
    %252 = arith.negf %251 : vector<8x256xf32>
    %253 = math.exp %252 : vector<8x256xf32>
    %cst_50 = arith.constant 1.000000e+00 : f32
    %254 = vector.broadcast %cst_50 : f32 to vector<8x256xf32>
    %255 = arith.addf %254, %253 : vector<8x256xf32>
    %256 = arith.divf %254, %255 : vector<8x256xf32>
    %257 = vector.extract_strided_slice %256 {offsets = [0, 0], sizes = [8, 128], strides = [1, 1]} : vector<8x256xf32> to vector<8x128xf32>
    %258 = vector.extract_strided_slice %256 {offsets = [0, 128], sizes = [8, 128], strides = [1, 1]} : vector<8x256xf32> to vector<8x128xf32>
    %259 = vector.extract_strided_slice %250 {offsets = [0, 256], sizes = [8, 128], strides = [1, 1]} : vector<8x512xf32> to vector<8x128xf32>
    %260 = vector.extract_strided_slice %250 {offsets = [0, 384], sizes = [8, 128], strides = [1, 1]} : vector<8x512xf32> to vector<8x128xf32>
    %261 = arith.mulf %257, %260 : vector<8x128xf32>
    %262 = arith.addf %259, %261 : vector<8x128xf32>
    %263 = math.tanh %262 : vector<8x128xf32>
    %264 = arith.subf %224, %263 : vector<8x128xf32>
    %265 = arith.mulf %258, %264 : vector<8x128xf32>
    %266 = arith.addf %263, %265 : vector<8x128xf32>
    %267 = vector.extract_strided_slice %248 {offsets = [0, 512], sizes = [8, 384], strides = [1, 1]} : vector<8x896xf32> to vector<8x384xf32>
    %c48 = arith.constant 48 : index
    %c0_51 = arith.constant 0 : index
    %268 = vector.load %arg9[%c48, %c0_51] : memref<64x384xf32, #tpu.memory_space<vmem>>, vector<8x384xf32>
    %269 = vector.extract_strided_slice %268 {offsets = [0, 0], sizes = [8, 256], strides = [1, 1]} : vector<8x384xf32> to vector<8x256xf32>
    %270 = vector.extract_strided_slice %267 {offsets = [0, 0], sizes = [8, 256], strides = [1, 1]} : vector<8x384xf32> to vector<8x256xf32>
    %271 = arith.addf %269, %270 : vector<8x256xf32>
    %272 = arith.negf %271 : vector<8x256xf32>
    %273 = math.exp %272 : vector<8x256xf32>
    %cst_52 = arith.constant 1.000000e+00 : f32
    %274 = vector.broadcast %cst_52 : f32 to vector<8x256xf32>
    %275 = arith.addf %274, %273 : vector<8x256xf32>
    %276 = arith.divf %274, %275 : vector<8x256xf32>
    %277 = vector.extract_strided_slice %276 {offsets = [0, 0], sizes = [8, 128], strides = [1, 1]} : vector<8x256xf32> to vector<8x128xf32>
    %278 = vector.extract_strided_slice %276 {offsets = [0, 128], sizes = [8, 128], strides = [1, 1]} : vector<8x256xf32> to vector<8x128xf32>
    %279 = vector.extract_strided_slice %268 {offsets = [0, 256], sizes = [8, 128], strides = [1, 1]} : vector<8x384xf32> to vector<8x128xf32>
    %280 = vector.extract_strided_slice %267 {offsets = [0, 256], sizes = [8, 128], strides = [1, 1]} : vector<8x384xf32> to vector<8x128xf32>
    %281 = arith.addf %280, %9 : vector<8x128xf32>
    %282 = arith.mulf %277, %281 : vector<8x128xf32>
    %283 = arith.addf %279, %282 : vector<8x128xf32>
    %284 = math.tanh %283 : vector<8x128xf32>
    %285 = arith.subf %245, %284 : vector<8x128xf32>
    %286 = arith.mulf %278, %285 : vector<8x128xf32>
    %287 = arith.addf %284, %286 : vector<8x128xf32>
    %288 = tpu.concatenate %287, %266 in 1 : vector<8x128xf32>, vector<8x128xf32> -> vector<8x256xf32>
    %c0_53 = arith.constant 0 : index
    %c0_54 = arith.constant 0 : index
    %289 = vector.load %arg3[%c0_53, %c0_54] : memref<256x896xf32, #tpu.memory_space<vmem>>, vector<256x896xf32>
    %cst_55 = arith.constant dense<0.000000e+00> : vector<8x896xf32>
    %290 = tpu.matmul %288, %289, %cst_55 {dimension_numbers = #tpu.dot_dimension_numbers<[1], [0], [0], [1], [0, 0, 1, 1], [], []>} : vector<8x256xf32>, vector<256x896xf32>, vector<8x896xf32> -> vector<8x896xf32>
    %291 = vector.extract_strided_slice %290 {offsets = [0, 0], sizes = [8, 512], strides = [1, 1]} : vector<8x896xf32> to vector<8x512xf32>
    %292 = arith.addf %291, %12 : vector<8x512xf32>
    %293 = vector.extract_strided_slice %292 {offsets = [0, 0], sizes = [8, 256], strides = [1, 1]} : vector<8x512xf32> to vector<8x256xf32>
    %294 = arith.negf %293 : vector<8x256xf32>
    %295 = math.exp %294 : vector<8x256xf32>
    %cst_56 = arith.constant 1.000000e+00 : f32
    %296 = vector.broadcast %cst_56 : f32 to vector<8x256xf32>
    %297 = arith.addf %296, %295 : vector<8x256xf32>
    %298 = arith.divf %296, %297 : vector<8x256xf32>
    %299 = vector.extract_strided_slice %298 {offsets = [0, 0], sizes = [8, 128], strides = [1, 1]} : vector<8x256xf32> to vector<8x128xf32>
    %300 = vector.extract_strided_slice %298 {offsets = [0, 128], sizes = [8, 128], strides = [1, 1]} : vector<8x256xf32> to vector<8x128xf32>
    %301 = vector.extract_strided_slice %292 {offsets = [0, 256], sizes = [8, 128], strides = [1, 1]} : vector<8x512xf32> to vector<8x128xf32>
    %302 = vector.extract_strided_slice %292 {offsets = [0, 384], sizes = [8, 128], strides = [1, 1]} : vector<8x512xf32> to vector<8x128xf32>
    %303 = arith.mulf %299, %302 : vector<8x128xf32>
    %304 = arith.addf %301, %303 : vector<8x128xf32>
    %305 = math.tanh %304 : vector<8x128xf32>
    %306 = arith.subf %266, %305 : vector<8x128xf32>
    %307 = arith.mulf %300, %306 : vector<8x128xf32>
    %308 = arith.addf %305, %307 : vector<8x128xf32>
    %309 = vector.extract_strided_slice %290 {offsets = [0, 512], sizes = [8, 384], strides = [1, 1]} : vector<8x896xf32> to vector<8x384xf32>
    %c56 = arith.constant 56 : index
    %c0_57 = arith.constant 0 : index
    %310 = vector.load %arg9[%c56, %c0_57] : memref<64x384xf32, #tpu.memory_space<vmem>>, vector<8x384xf32>
    %311 = vector.extract_strided_slice %310 {offsets = [0, 0], sizes = [8, 256], strides = [1, 1]} : vector<8x384xf32> to vector<8x256xf32>
    %312 = vector.extract_strided_slice %309 {offsets = [0, 0], sizes = [8, 256], strides = [1, 1]} : vector<8x384xf32> to vector<8x256xf32>
    %313 = arith.addf %311, %312 : vector<8x256xf32>
    %314 = arith.negf %313 : vector<8x256xf32>
    %315 = math.exp %314 : vector<8x256xf32>
    %cst_58 = arith.constant 1.000000e+00 : f32
    %316 = vector.broadcast %cst_58 : f32 to vector<8x256xf32>
    %317 = arith.addf %316, %315 : vector<8x256xf32>
    %318 = arith.divf %316, %317 : vector<8x256xf32>
    %319 = vector.extract_strided_slice %318 {offsets = [0, 0], sizes = [8, 128], strides = [1, 1]} : vector<8x256xf32> to vector<8x128xf32>
    %320 = vector.extract_strided_slice %318 {offsets = [0, 128], sizes = [8, 128], strides = [1, 1]} : vector<8x256xf32> to vector<8x128xf32>
    %321 = vector.extract_strided_slice %310 {offsets = [0, 256], sizes = [8, 128], strides = [1, 1]} : vector<8x384xf32> to vector<8x128xf32>
    %322 = vector.extract_strided_slice %309 {offsets = [0, 256], sizes = [8, 128], strides = [1, 1]} : vector<8x384xf32> to vector<8x128xf32>
    %323 = arith.addf %322, %9 : vector<8x128xf32>
    %324 = arith.mulf %319, %323 : vector<8x128xf32>
    %325 = arith.addf %321, %324 : vector<8x128xf32>
    %326 = math.tanh %325 : vector<8x128xf32>
    %327 = arith.subf %287, %326 : vector<8x128xf32>
    %328 = arith.mulf %320, %327 : vector<8x128xf32>
    %329 = arith.addf %326, %328 : vector<8x128xf32>
    %330 = tpu.concatenate %329, %308 in 1 : vector<8x128xf32>, vector<8x128xf32> -> vector<8x256xf32>
    %c0_59 = arith.constant 0 : index
    %c0_60 = arith.constant 0 : index
    %331 = vector.load %arg3[%c0_59, %c0_60] : memref<256x896xf32, #tpu.memory_space<vmem>>, vector<256x896xf32>
    %cst_61 = arith.constant dense<0.000000e+00> : vector<8x896xf32>
    %332 = tpu.matmul %330, %331, %cst_61 {dimension_numbers = #tpu.dot_dimension_numbers<[1], [0], [0], [1], [0, 0, 1, 1], [], []>} : vector<8x256xf32>, vector<256x896xf32>, vector<8x896xf32> -> vector<8x896xf32>
    %333 = vector.extract_strided_slice %332 {offsets = [0, 0], sizes = [8, 512], strides = [1, 1]} : vector<8x896xf32> to vector<8x512xf32>
    %334 = arith.addf %333, %12 : vector<8x512xf32>
    %335 = vector.extract_strided_slice %334 {offsets = [0, 0], sizes = [8, 256], strides = [1, 1]} : vector<8x512xf32> to vector<8x256xf32>
    %336 = arith.negf %335 : vector<8x256xf32>
    %337 = math.exp %336 : vector<8x256xf32>
    %cst_62 = arith.constant 1.000000e+00 : f32
    %338 = vector.broadcast %cst_62 : f32 to vector<8x256xf32>
    %339 = arith.addf %338, %337 : vector<8x256xf32>
    %340 = arith.divf %338, %339 : vector<8x256xf32>
    %341 = vector.extract_strided_slice %340 {offsets = [0, 0], sizes = [8, 128], strides = [1, 1]} : vector<8x256xf32> to vector<8x128xf32>
    %342 = vector.extract_strided_slice %340 {offsets = [0, 128], sizes = [8, 128], strides = [1, 1]} : vector<8x256xf32> to vector<8x128xf32>
    %343 = vector.extract_strided_slice %334 {offsets = [0, 256], sizes = [8, 128], strides = [1, 1]} : vector<8x512xf32> to vector<8x128xf32>
    %344 = vector.extract_strided_slice %334 {offsets = [0, 384], sizes = [8, 128], strides = [1, 1]} : vector<8x512xf32> to vector<8x128xf32>
    %345 = arith.mulf %341, %344 : vector<8x128xf32>
    %346 = arith.addf %343, %345 : vector<8x128xf32>
    %347 = math.tanh %346 : vector<8x128xf32>
    %348 = arith.subf %308, %347 : vector<8x128xf32>
    %349 = arith.mulf %342, %348 : vector<8x128xf32>
    %350 = arith.addf %347, %349 : vector<8x128xf32>
    %c0_63 = arith.constant 0 : index
    %c0_64 = arith.constant 0 : index
    %351 = vector.load %arg6[%c0_63, %c0_64] : memref<128x128xf32, #tpu.memory_space<vmem>>, vector<128x128xf32>
    %cst_65 = arith.constant dense<0.000000e+00> : vector<8x128xf32>
    %352 = tpu.matmul %350, %351, %cst_65 {dimension_numbers = #tpu.dot_dimension_numbers<[1], [0], [0], [1], [0, 0, 1, 1], [], []>} : vector<8x128xf32>, vector<128x128xf32>, vector<8x128xf32> -> vector<8x128xf32>
    %c0_66 = arith.constant 0 : index
    %c0_67 = arith.constant 0 : index
    %353 = vector.load %arg7[%c0_66, %c0_67] : memref<1x128xf32, #tpu.memory_space<vmem>>, vector<1x128xf32>
    %354 = vector.broadcast %353 : vector<1x128xf32> to vector<8x128xf32>
    %355 = arith.addf %352, %354 : vector<8x128xf32>
    %c0_68 = arith.constant 0 : index
    %c0_69 = arith.constant 0 : index
    %356 = vector.load %arg8[%c0_68, %c0_69] : memref<8x128xf32, #tpu.memory_space<vmem>>, vector<8x128xf32>
    tpu.vector_store %arg8[%c0_68, %c0_69], %355 {strides = array<i32>} : memref<8x128xf32, #tpu.memory_space<vmem>>, vector<8x128xf32>,
    return
  }
}

</mosaic_0001>

<bundles_post_ra>
// kernel: tpu_custom_call.1
= control target key start
LH: loop header
LB: loop body
LE: loop exit
PB: predicated region body
PF: predicated region fallthrough
CT: control target
= control target key end

     0   :  { %13 = vsyncpa [#allocation4], 0  ;;  %s7054_s0 = inlined_call_operand.vmem [shape: f32[64,16], index: 0, kind: input, shape index: {}]   ;;  %s7055_s1 = inlined_call_operand.vmem [shape: f32[16,384], index: 1, kind: input, shape index: {}]   ;;  %s7056_s2 = inlined_call_operand.vmem [shape: f32[1,384], index: 2, kind: input, shape index: {}]   ;;  %s7057_s3 = inlined_call_operand.hbm [shape: f32[256,896], index: 3, kind: input, shape index: {}]   ;;  %s7058_s4 = inlined_call_operand.vmem [shape: f32[1,128], index: 4, kind: input, shape index: {}]   ;;  %s7059_s5 = inlined_call_operand.vmem [shape: f32[1,512], index: 5, kind: input, shape index: {}]   ;;  %s7060_s6 = inlined_call_operand.hbm [shape: f32[128,128], index: 6, kind: input, shape index: {}]   ;;  %s7061_s7 = inlined_call_operand.vmem [shape: f32[1,128], index: 7, kind: input, shape index: {}]   ;;  %s7062_s8 = inlined_call_operand.hbm [shape: f32[8,128], index: 8, kind: output, shape index: {}]  }
   0x1   :  { %14 = vsyncpa [#allocation7], 0 }
   0x2   :  { %15 = vsyncpa [#allocation5], 0  ;;  %s5583_s27 = smov [#allocation3]   ;;  %s5511_s9 = scalar_lea.hbm %s7057_s3, 28672 }
   0x3   :  { %s27_s28 = sshll.u32 %s5583_s27, 4  ;;  %p5512_p0 = scmp.ne.s32.totalorder %s7057_s3, %s5511_s9  ;;  %s28_s28 = int_to_ptr.vmem [resolvable:$true] %s27_s28 }
   0x4   :  { %p5515_p1 = scmp.lt.u32.totalorder %s5511_s9, %s7057_s3 }
   0x6   :  { %p5517_p2 = pnand %p5515_p1, %p5512_p0 }
   0x8   :  { %5520 = shalt.err (!%p5517_p2)
}
   0x9   :  { %s5521_s14 = scalar_lea.vmem %s28_s28, 28672  ;;  %p5526_p4 = scmp.lt.s32.totalorder %s28_s28, %s28_s28 }
   0xa   :  { %p5522_p3 = scmp.ne.s32.totalorder %s28_s28, %s5521_s14  ;;  %p5527_p5 = scmp.lt.s32.totalorder %s5521_s14, %s5521_s14 }
   0xc   :  { %p5528_p6 = por %p5527_p5, %p5526_p4 }
   0xe   :  { %p5529_p7 = pnand %p5528_p6, %p5522_p3 }
  0x10   :  { %5532 = shalt.err (!%p5529_p7)
}
  0x11   :  { %s5584_s15 = smov 896   ;;  %s5585_s16 = smov 56  }
  0x12   :  { %33 = dma.hbm_to_vmem [thread:$0]  %s7057_s3, 28672, %s28_s28, [#allocation4], %s5584_s15, %s5584_s15, %s5585_s16  }
  0x13   :  { %s5586_s19 = smov [#allocation6]   ;;  %s5533_s23 = scalar_lea.hbm %s7060_s6, 2048 }
  0x14   :  { %s43_s20 = sshll.u32 %s5586_s19, 4  ;;  %p5534_p8 = scmp.ne.s32.totalorder %s7060_s6, %s5533_s23  ;;  %s44_s20 = int_to_ptr.vmem [resolvable:$true] %s43_s20 }
  0x15   :  { %p5537_p9 = scmp.lt.u32.totalorder %s5533_s23, %s7060_s6 }
  0x17   :  { %p5539_p10 = pnand %p5537_p9, %p5534_p8 }
  0x19   :  { %5542 = shalt.err (!%p5539_p10)
}
  0x1a   :  { %s5543_s29 = scalar_lea.vmem %s44_s20, 2048  ;;  %p5548_p12 = scmp.lt.s32.totalorder %s44_s20, %s44_s20 }
  0x1b   :  { %p5544_p11 = scmp.ne.s32.totalorder %s44_s20, %s5543_s29  ;;  %p5549_p13 = scmp.lt.s32.totalorder %s5543_s29, %s5543_s29 }
  0x1d   :  { %p5550_p0 = por %p5549_p13, %p5548_p12 }
  0x1f   :  { %p5551_p1 = pnand %p5550_p0, %p5544_p11 }
  0x21   :  { %5554 = shalt.err (!%p5551_p1)
}
  0x22   :  { %s5587_s3 = smov 128   ;;  %s5588_s28 = smov 8  }
  0x23   :  { %49 = dma.hbm_to_vmem [thread:$0]  %s7060_s6, 2048, %s44_s20, [#allocation7], %s5587_s3, %s5587_s3, %s5588_s28  }
  0x24   :  { %5577 = dma.done.wait [#allocation4], 28672  }
  0x25   :  { %5578 = vsyncadd [#allocation4], 4294938624 }
  0x26   :  { %5579 = dma.done.wait [#allocation7], 2048  }
  0x27   :  { %5580 = vsyncadd [#allocation7], 4294965248  ;;  %v7065_v0 = vmov 0.0   ;;  %v67_v1 = vld [vmem:[%s7055_s1 + $0x8] sm:$0xff]  ;;  %v70_v2 = vld [vmem:[%s7055_s1 + $0x20] sm:$0xff]  ;;  %vm89_vm0 = vcmask 130048  }
  0x28   :  { %178 = vmatprep.mubr.f32.mxu0 %v7065_v0  ;;  %v66_v3 = vld [vmem:[%s7055_s1] sm:$0xff]  ;;  %v3583_v4 = vpack.c.bf16 %v70_v2, %v67_v1  ;;  %v69_v5 = vld [vmem:[%s7055_s1 + $0x18] sm:$0xff]  ;;  %v68_v7 = vld [vmem:[%s7055_s1 + $0x10] sm:$0xff]  ;;  %vm5591_vm1 = vmmov 0   ;;  %s5592_s20 = smov [#allocation8]  }
  0x29   :  { %v58_v6 = vld [vmem:[%s7054_s0] sm:$0xff]  ;;  %v3585_v8 = vpack.c.bf16 %v69_v5, %v66_v3  ;;  %v71_v9 = vld [vmem:[%s7055_s1 + $0x28] sm:$0xff]  ;;  %v410_v10 = vld [vmem:[#allocation3 + $0x8] sm:$0xff]  ;;  %s3200_s21 = sshll.u32 %s5592_s20, 4  ;;  %s3201_s21 = int_to_ptr.vmem [resolvable:$true] %s3200_s21 }
  0x2a   :  { %3536 = vmatprep.mubr.msk.f32.mxu1 %vm89_vm0, %v58_v6  ;;  %3584 = vmatprep.subr.bf16.mxu0 %v3583_v4  ;;  %v3587_v11 = vpack.c.bf16 %v71_v9, %v68_v7  ;;  %v417_v12 = vld [vmem:[#allocation3 + $0x40] sm:$0xff]  ;;  %v412_v13 = vld [vmem:[#allocation3 + $0x18] sm:$0xff]  ;;  %v419_v14 = vld [vmem:[#allocation3 + $0x50] sm:$0xff]  ;;  %s5555_s22 = scalar_lea.vmem %s3201_s21, 128  ;;  %p5560_p3 = scmp.lt.s32.totalorder %s3201_s21, %s3201_s21 }
  0x2b   :  { %3586 = vmatpush1.bf16.msra.mxu0 %v3585_v8  ;;  %v59_v15 = vld [vmem:[%s7054_s0 + $0x8] sm:$0xff]  ;;  %v5688_v16 = vpack.c.bf16 %v417_v12, %v410_v10  ;;  %v5690_v17 = vpack.c.bf16 %v419_v14, %v412_v13  ;;  %v409_v18 = vld [vmem:[#allocation3] sm:$0xff]  ;;  %v411_v20 = vld [vmem:[#allocation3 + $0x10] sm:$0xff]  ;;  %p5556_p2 = scmp.ne.s32.totalorder %s3201_s21, %s5555_s22  ;;  %p5561_p4 = scmp.lt.s32.totalorder %s5555_s22, %s5555_s22 }
  0x2c   :  { %v416_v19 = vld [vmem:[#allocation3 + $0x38] sm:$0xff]  ;;  %3588 = vmatprep.subr.bf16.mxu1 %v3587_v11  ;;  %v418_v22 = vld [vmem:[#allocation3 + $0x48] sm:$0xff]  ;;  %v431_v24 = vld [vmem:[#allocation3 + $0xb0] sm:$0xff] }
  0x2d   :  { %7405 = vst [vmem:[#allocation12_spill] sm:$0xff] %v5688_v16  ;;  %7406 = vst [vmem:[#allocation13_spill] sm:$0xff] %v5690_v17  ;;  %v5692_v21 = vpack.c.bf16 %v416_v19, %v409_v18  ;;  %v424_v23 = vld [vmem:[#allocation3 + $0x78] sm:$0xff]  ;;  %3590 = vmatpush3.bf16.msra.mxu1 %v3587_v11  ;;  %3592 = vmatprep.subr.bf16.mxu0 %v5688_v16  ;;  %v5695_v25 = vpack.c.bf16 %v418_v22, %v411_v20  ;;  %v426_v27 = vld [vmem:[#allocation3 + $0x88] sm:$0xff]  ;;  %p5562_p5 = por %p5561_p4, %p5560_p3 }
  0x2e   :  { %v5697_v26 = vpack.c.bf16 %v431_v24, %v424_v23  ;;  %v433_v28 = vld [vmem:[#allocation3 + $0xc0] sm:$0xff]  ;;  %v423_v29 = vld [vmem:[#allocation3 + $0x70] sm:$0xff]  ;;  %3210 = vmatmul.mubr.msk.f32.vlgmr.msra.gmra.mrb[0].mxu0 %vm89_vm0, %v58_v6  ;;  %3656 = vmatprep.subr.bf16.mxu1 %v5690_v17  ;;  %v430_v31 = vld [vmem:[#allocation3 + $0xa8] sm:$0xff] }
  0x2f   :  { %7407 = vst [vmem:[#allocation14_spill] sm:$0xff] %v5692_v21  ;;  %7408 = vst [vmem:[#allocation15_spill] sm:$0xff] %v5695_v25  ;;  %v5701_v30 = vpack.c.bf16 %v433_v28, %v426_v27  ;;  %v425_v32 = vld [vmem:[#allocation3 + $0x80] sm:$0xff]  ;;  %v432_v33 = vld [vmem:[#allocation3 + $0xb8] sm:$0xff]  ;;  %3594 = vmatpush1.bf16.msra.mxu0 %v5692_v21  ;;  %v5704_v34 = vpack.c.bf16 %v430_v31, %v423_v29  ;;  %184 = vmatprep.mubr.f32.mxu0 %v7065_v0  ;;  %p5563_p6 = pnand %p5562_p5, %p5556_p2 }
  0x30   :  { %7409 = vst [vmem:[#allocation16_spill] sm:$0xff] %v5697_v26  ;;  %v438_v35 = vld [vmem:[#allocation3 + $0xe8] sm:$0xff]  ;;  %v445_v36 = vld [vmem:[#allocation3 + $0x120] sm:$0xff]  ;;  %v440_v37 = vld [vmem:[#allocation3 + $0xf8] sm:$0xff]  ;;  %3537 = vmatmul.mubr.msk.f32.vlgmr.msra.gmra.mrb[0].mxu1 %vm89_vm0, %v59_v15  ;;  %3596 = vmatprep.subr.bf16.mxu0 %v5697_v26  ;;  %v5712_v42 = vpack.c.bf16 %v432_v33, %v425_v32 }
  0x31   :  { %7410 = vst [vmem:[#allocation17_spill] sm:$0xff] %v5701_v30  ;;  %7411 = vst [vmem:[#allocation18_spill] sm:$0xff] %v5704_v34  ;;  %v5709_v38 = vpack.c.bf16 %v445_v36, %v438_v35  ;;  %v447_v39 = vld [vmem:[#allocation3 + $0x130] sm:$0xff]  ;;  %v437_v40 = vld [vmem:[#allocation3 + $0xe0] sm:$0xff]  ;;  %3658 = vmatpush1.bf16.msra.mxu1 %v5695_v25 }
  0x32   :  { %v444_v41 = vld [vmem:[#allocation3 + $0x118] sm:$0xff]  ;;  %7413 = vst [vmem:[#allocation20_spill] sm:$0xff] %v5712_v42  ;;  %3660 = vmatprep.subr.bf16.mxu1 %v5701_v30  ;;  %v5715_v44 = vpack.c.bf16 %v447_v39, %v440_v37  ;;  %v439_v45 = vld [vmem:[#allocation3 + $0xf0] sm:$0xff]  ;;  %v446_v46 = vld [vmem:[#allocation3 + $0x128] sm:$0xff]  ;;  %3211 = vmatmul.mubr.msk.f32.gmra.mrb[2].mxu0 %vm89_vm0, %v59_v15 }
  0x33   :  { %7412 = vst [vmem:[#allocation19_spill] sm:$0xff] %v5709_v38  ;;  %v452_v43 = vld [vmem:[#allocation3 + $0x158] sm:$0xff]  ;;  %v459_v47 = vld [vmem:[#allocation3 + $0x190] sm:$0xff]  ;;  %3598 = vmatpush1.bf16.msra.mxu0 %v5704_v34  ;;  %v5719_v48 = vpack.c.bf16 %v444_v41, %v437_v40  ;;  %v454_v49 = vld [vmem:[#allocation3 + $0x168] sm:$0xff]  ;;  %190 = vmatprep.mubr.f32.mxu0 %v7065_v0  ;;  %v5726_v54 = vpack.c.bf16 %v446_v46, %v439_v45 }
  0x34   :  { %7414 = vst [vmem:[#allocation21_spill] sm:$0xff] %v5715_v44  ;;  %v461_v50 = vld [vmem:[#allocation3 + $0x1a0] sm:$0xff]  ;;  %3600 = vmatprep.subr.bf16.mxu0 %v5709_v38  ;;  %v5723_v51 = vpack.c.bf16 %v459_v47, %v452_v43  ;;  %v451_v52 = vld [vmem:[#allocation3 + $0x150] sm:$0xff]  ;;  %v458_v53 = vld [vmem:[#allocation3 + $0x188] sm:$0xff] }
  0x35   :  { %7415 = vst [vmem:[#allocation22_spill] sm:$0xff] %v5719_v48  ;;  %3662 = vmatpush1.bf16.msra.mxu1 %v5712_v42  ;;  %7417 = vst [vmem:[#allocation24_spill] sm:$0xff] %v5726_v54  ;;  %v5729_v55 = vpack.c.bf16 %v461_v50, %v454_v49  ;;  %v453_v56 = vld [vmem:[#allocation3 + $0x160] sm:$0xff]  ;;  %v460_v57 = vld [vmem:[#allocation3 + $0x198] sm:$0xff]  ;;  %v5732_v58 = vpack.c.bf16 %v458_v53, %v451_v52 }
  0x36   :  { %7416 = vst [vmem:[#allocation23_spill] sm:$0xff] %v5723_v51  ;;  %3664 = vmatprep.subr.bf16.mxu1 %v5715_v44  ;;  %v5736_v59 = vpack.c.bf16 %v460_v57, %v453_v56  ;;  %v466_v60 = vld [vmem:[#allocation3 + $0x1c8] sm:$0xff]  ;;  %v473_v61 = vld [vmem:[#allocation3 + $0x200] sm:$0xff]  ;;  %v468_v62 = vld [vmem:[#allocation3 + $0x1d8] sm:$0xff] }
  0x37   :  { %7418 = vst [vmem:[#allocation25_spill] sm:$0xff] %v5729_v55  ;;  %3602 = vmatpush1.bf16.msra.mxu0 %v5719_v48  ;;  %7419 = vst [vmem:[#allocation26_spill] sm:$0xff] %v5732_v58  ;;  %v5741_v63 = vpack.c.bf16 %v473_v61, %v466_v60  ;;  %v475_v1 = vld [vmem:[#allocation3 + $0x210] sm:$0xff]  ;;  %v465_v2 = vld [vmem:[#allocation3 + $0x1c0] sm:$0xff] }
  0x38   :  { %3604 = vmatprep.subr.bf16.mxu0 %v5723_v51  ;;  %7420 = vst [vmem:[#allocation27_spill] sm:$0xff] %v5736_v59  ;;  %v472_v3 = vld [vmem:[#allocation3 + $0x1f8] sm:$0xff]  ;;  %v5743_v4 = vpack.c.bf16 %v475_v1, %v468_v62  ;;  %v467_v6 = vld [vmem:[#allocation3 + $0x1d0] sm:$0xff]  ;;  %v474_v7 = vld [vmem:[#allocation3 + $0x208] sm:$0xff] }
  0x39   :  { %3666 = vmatpush1.bf16.msra.mxu1 %v5726_v54  ;;  %7421 = vst [vmem:[#allocation28_spill] sm:$0xff] %v5741_v63  ;;  %v5745_v5 = vpack.c.bf16 %v472_v3, %v465_v2  ;;  %v5748_v8 = vpack.c.bf16 %v474_v7, %v467_v6  ;;  %v480_v9 = vld [vmem:[#allocation3 + $0x238] sm:$0xff]  ;;  %v487_v10 = vld [vmem:[#allocation3 + $0x270] sm:$0xff]  ;;  %v482_v11 = vld [vmem:[#allocation3 + $0x248] sm:$0xff] }
  0x3a   :  { %3668 = vmatprep.subr.bf16.mxu1 %v5729_v55  ;;  %7422 = vst [vmem:[#allocation29_spill] sm:$0xff] %v5743_v4  ;;  %v5753_v12 = vpack.c.bf16 %v487_v10, %v480_v9  ;;  %v489_v13 = vld [vmem:[#allocation3 + $0x280] sm:$0xff]  ;;  %v479_v14 = vld [vmem:[#allocation3 + $0x230] sm:$0xff]  ;;  %v486_v15 = vld [vmem:[#allocation3 + $0x268] sm:$0xff] }
  0x3b   :  { %3606 = vmatpush1.bf16.msra.mxu0 %v5732_v58  ;;  %7423 = vst [vmem:[#allocation30_spill] sm:$0xff] %v5745_v5  ;;  %7424 = vst [vmem:[#allocation31_spill] sm:$0xff] %v5748_v8  ;;  %v5755_v18 = vpack.c.bf16 %v489_v13, %v482_v11  ;;  %v5757_v19 = vpack.c.bf16 %v486_v15, %v479_v14  ;;  %v481_v20 = vld [vmem:[#allocation3 + $0x240] sm:$0xff]  ;;  %v488_v22 = vld [vmem:[#allocation3 + $0x278] sm:$0xff] }
  0x3c   :  { %3608 = vmatprep.subr.bf16.mxu0 %v5741_v63  ;;  %7425 = vst [vmem:[#allocation32_spill] sm:$0xff] %v5753_v12  ;;  %v5760_v23 = vpack.c.bf16 %v488_v22, %v481_v20  ;;  %v494_v24 = vld [vmem:[#allocation3 + $0x2a8] sm:$0xff]  ;;  %v501_v27 = vld [vmem:[#allocation3 + $0x2e0] sm:$0xff]  ;;  %v496_v28 = vld [vmem:[#allocation3 + $0x2b8] sm:$0xff] }
  0x3d   :  { %3670 = vmatpush1.bf16.msra.mxu1 %v5736_v59  ;;  %7426 = vst [vmem:[#allocation33_spill] sm:$0xff] %v5755_v18  ;;  %7427 = vst [vmem:[#allocation34_spill] sm:$0xff] %v5757_v19  ;;  %v5765_v29 = vpack.c.bf16 %v501_v27, %v494_v24  ;;  %v503_v31 = vld [vmem:[#allocation3 + $0x2f0] sm:$0xff]  ;;  %v493_v32 = vld [vmem:[#allocation3 + $0x2a0] sm:$0xff] }
  0x3e   :  { %3672 = vmatprep.subr.bf16.mxu1 %v5743_v4  ;;  %7428 = vst [vmem:[#allocation35_spill] sm:$0xff] %v5760_v23  ;;  %v500_v33 = vld [vmem:[#allocation3 + $0x2d8] sm:$0xff]  ;;  %v5767_v35 = vpack.c.bf16 %v503_v31, %v496_v28  ;;  %v495_v37 = vld [vmem:[#allocation3 + $0x2b0] sm:$0xff]  ;;  %v502_v39 = vld [vmem:[#allocation3 + $0x2e8] sm:$0xff] }
  0x3f   :  { %3610 = vmatpush1.bf16.msra.mxu0 %v5745_v5  ;;  %7429 = vst [vmem:[#allocation36_spill] sm:$0xff] %v5765_v29  ;;  %v5769_v36 = vpack.c.bf16 %v500_v33, %v493_v32  ;;  %v5772_v40 = vpack.c.bf16 %v502_v39, %v495_v37  ;;  %v508_v41 = vld [vmem:[#allocation3 + $0x318] sm:$0xff]  ;;  %v515_v43 = vld [vmem:[#allocation3 + $0x350] sm:$0xff]  ;;  %v510_v45 = vld [vmem:[#allocation3 + $0x328] sm:$0xff] }
  0x40   :  { %3612 = vmatprep.subr.bf16.mxu0 %v5753_v12  ;;  %7430 = vst [vmem:[#allocation37_spill] sm:$0xff] %v5767_v35  ;;  %v5777_v46 = vpack.c.bf16 %v515_v43, %v508_v41  ;;  %v517_v47 = vld [vmem:[#allocation3 + $0x360] sm:$0xff]  ;;  %v507_v49 = vld [vmem:[#allocation3 + $0x310] sm:$0xff]  ;;  %v514_v50 = vld [vmem:[#allocation3 + $0x348] sm:$0xff] }
  0x41   :  { %3674 = vmatpush1.bf16.msra.mxu1 %v5748_v8  ;;  %7431 = vst [vmem:[#allocation38_spill] sm:$0xff] %v5769_v36  ;;  %7432 = vst [vmem:[#allocation39_spill] sm:$0xff] %v5772_v40  ;;  %v5779_v52 = vpack.c.bf16 %v517_v47, %v510_v45  ;;  %v5781_v53 = vpack.c.bf16 %v514_v50, %v507_v49  ;;  %v509_v56 = vld [vmem:[#allocation3 + $0x320] sm:$0xff]  ;;  %v516_v57 = vld [vmem:[#allocation3 + $0x358] sm:$0xff] }
  0x42   :  { %3676 = vmatprep.subr.bf16.mxu1 %v5755_v18  ;;  %7433 = vst [vmem:[#allocation40_spill] sm:$0xff] %v5777_v46  ;;  %v5784_v60 = vpack.c.bf16 %v516_v57, %v509_v56  ;;  %v522_v61 = vld [vmem:[#allocation3 + $0x388] sm:$0xff]  ;;  %v529_v62 = vld [vmem:[#allocation3 + $0x3c0] sm:$0xff]  ;;  %v524_v1 = vld [vmem:[#allocation3 + $0x398] sm:$0xff] }
  0x43   :  { %3614 = vmatpush1.bf16.msra.mxu0 %v5757_v19  ;;  %7434 = vst [vmem:[#allocation41_spill] sm:$0xff] %v5779_v52  ;;  %7435 = vst [vmem:[#allocation42_spill] sm:$0xff] %v5781_v53  ;;  %v5789_v2 = vpack.c.bf16 %v529_v62, %v522_v61  ;;  %v531_v3 = vld [vmem:[#allocation3 + $0x3d0] sm:$0xff]  ;;  %v521_v6 = vld [vmem:[#allocation3 + $0x380] sm:$0xff] }
  0x44   :  { %3616 = vmatprep.subr.bf16.mxu0 %v5765_v29  ;;  %7436 = vst [vmem:[#allocation43_spill] sm:$0xff] %v5784_v60  ;;  %v528_v7 = vld [vmem:[#allocation3 + $0x3b8] sm:$0xff]  ;;  %v5791_v9 = vpack.c.bf16 %v531_v3, %v524_v1  ;;  %v523_v11 = vld [vmem:[#allocation3 + $0x390] sm:$0xff]  ;;  %v530_v13 = vld [vmem:[#allocation3 + $0x3c8] sm:$0xff] }
  0x45   :  { %3678 = vmatpush1.bf16.msra.mxu1 %v5760_v23  ;;  %7437 = vst [vmem:[#allocation44_spill] sm:$0xff] %v5789_v2  ;;  %v5793_v10 = vpack.c.bf16 %v528_v7, %v521_v6  ;;  %v5796_v14 = vpack.c.bf16 %v530_v13, %v523_v11  ;;  %v536_v15 = vld [vmem:[#allocation3 + $0x3f8] sm:$0xff]  ;;  %v543_v20 = vld [vmem:[#allocation3 + $0x430] sm:$0xff]  ;;  %v538_v22 = vld [vmem:[#allocation3 + $0x408] sm:$0xff] }
  0x46   :  { %3680 = vmatprep.subr.bf16.mxu1 %v5767_v35  ;;  %7438 = vst [vmem:[#allocation45_spill] sm:$0xff] %v5791_v9  ;;  %v5801_v24 = vpack.c.bf16 %v543_v20, %v536_v15  ;;  %v545_v27 = vld [vmem:[#allocation3 + $0x440] sm:$0xff]  ;;  %v535_v28 = vld [vmem:[#allocation3 + $0x3f0] sm:$0xff]  ;;  %v542_v31 = vld [vmem:[#allocation3 + $0x428] sm:$0xff] }
  0x47   :  { %3618 = vmatpush1.bf16.msra.mxu0 %v5769_v36  ;;  %7439 = vst [vmem:[#allocation46_spill] sm:$0xff] %v5793_v10  ;;  %7440 = vst [vmem:[#allocation47_spill] sm:$0xff] %v5796_v14  ;;  %v5803_v32 = vpack.c.bf16 %v545_v27, %v538_v22  ;;  %v5805_v33 = vpack.c.bf16 %v542_v31, %v535_v28  ;;  %v537_v37 = vld [vmem:[#allocation3 + $0x400] sm:$0xff]  ;;  %v544_v39 = vld [vmem:[#allocation3 + $0x438] sm:$0xff] }
  0x48   :  { %3620 = vmatprep.subr.bf16.mxu0 %v5777_v46  ;;  %7441 = vst [vmem:[#allocation48_spill] sm:$0xff] %v5801_v24  ;;  %v550_v41 = vld [vmem:[#allocation3 + $0x468] sm:$0xff]  ;;  %v5808_v43 = vpack.c.bf16 %v544_v39, %v537_v37  ;;  %v557_v45 = vld [vmem:[#allocation3 + $0x4a0] sm:$0xff]  ;;  %v552_v47 = vld [vmem:[#allocation3 + $0x478] sm:$0xff] }
  0x49   :  { %3682 = vmatpush1.bf16.msra.mxu1 %v5772_v40  ;;  %7442 = vst [vmem:[#allocation49_spill] sm:$0xff] %v5803_v32  ;;  %7443 = vst [vmem:[#allocation50_spill] sm:$0xff] %v5805_v33  ;;  %v559_v49 = vld [vmem:[#allocation3 + $0x4b0] sm:$0xff]  ;;  %v5812_v50 = vpack.c.bf16 %v557_v45, %v550_v41  ;;  %v60_v57 = vld [vmem:[%s7054_s0 + $0x10] sm:$0xff] }
  0x4a   :  { %3684 = vmatprep.subr.bf16.mxu1 %v5779_v52  ;;  %7444 = vst [vmem:[#allocation51_spill] sm:$0xff] %v5808_v43  ;;  %v5814_v56 = vpack.c.bf16 %v559_v49, %v552_v47  ;;  %v549_v61 = vld [vmem:[#allocation3 + $0x460] sm:$0xff]  ;;  %v556_v62 = vld [vmem:[#allocation3 + $0x498] sm:$0xff]  ;;  %3212 = vmatmul.mubr.msk.f32.gmra.mrb[4].mxu0 %vm89_vm0, %v60_v57  ;;  %v551_v3 = vld [vmem:[#allocation3 + $0x470] sm:$0xff] }
  0x4b   :  { %3622 = vmatpush1.bf16.msra.mxu0 %v5781_v53  ;;  %7445 = vst [vmem:[#allocation52_spill] sm:$0xff] %v5812_v50  ;;  %v5821_v1 = vpack.c.bf16 %v556_v62, %v549_v61  ;;  %v558_v6 = vld [vmem:[#allocation3 + $0x4a8] sm:$0xff]  ;;  %196 = vmatprep.mubr.f32.mxu0 %v7065_v0  ;;  %v564_v11 = vld [vmem:[#allocation3 + $0x4d8] sm:$0xff]  ;;  %v571_v13 = vld [vmem:[#allocation3 + $0x510] sm:$0xff] }
  0x4c   :  { %3624 = vmatprep.subr.bf16.mxu0 %v5789_v2  ;;  %7446 = vst [vmem:[#allocation53_spill] sm:$0xff] %v5814_v56  ;;  %v5825_v7 = vpack.c.bf16 %v558_v6, %v551_v3  ;;  %3539 = vmatprep.mubr.msk.f32.mxu1 %vm89_vm0, %v60_v57  ;;  %v566_v15 = vld [vmem:[#allocation3 + $0x4e8] sm:$0xff]  ;;  %v5831_v20 = vpack.c.bf16 %v571_v13, %v564_v11  ;;  %v573_v22 = vld [vmem:[#allocation3 + $0x520] sm:$0xff]  ;;  %v563_v27 = vld [vmem:[#allocation3 + $0x4d0] sm:$0xff] }
  0x4d   :  { %3686 = vmatpush1.bf16.msra.mxu1 %v5784_v60  ;;  %7447 = vst [vmem:[#allocation54_spill] sm:$0xff] %v5821_v1  ;;  %v570_v28 = vld [vmem:[#allocation3 + $0x508] sm:$0xff]  ;;  %v5833_v31 = vpack.c.bf16 %v573_v22, %v566_v15  ;;  %v565_v39 = vld [vmem:[#allocation3 + $0x4e0] sm:$0xff]  ;;  %v572_v41 = vld [vmem:[#allocation3 + $0x518] sm:$0xff] }
  0x4e   :  { %3688 = vmatprep.subr.bf16.mxu1 %v5791_v9  ;;  %7448 = vst [vmem:[#allocation55_spill] sm:$0xff] %v5825_v7  ;;  %7449 = vst [vmem:[#allocation56_spill] sm:$0xff] %v5831_v20  ;;  %v5835_v37 = vpack.c.bf16 %v570_v28, %v563_v27  ;;  %v61_v45 = vld [vmem:[%s7054_s0 + $0x18] sm:$0xff]  ;;  %v5841_v47 = vpack.c.bf16 %v572_v41, %v565_v39  ;;  %v585_v57 = vld [vmem:[#allocation3 + $0x580] sm:$0xff] }
  0x4f   :  { %3626 = vmatpush1.bf16.msra.mxu0 %v5793_v10  ;;  %7450 = vst [vmem:[#allocation57_spill] sm:$0xff] %v5833_v31  ;;  %v578_v49 = vld [vmem:[#allocation3 + $0x548] sm:$0xff]  ;;  %v580_v61 = vld [vmem:[#allocation3 + $0x558] sm:$0xff]  ;;  %v587_v3 = vld [vmem:[#allocation3 + $0x590] sm:$0xff]  ;;  %3540 = vmatmul.mubr.msk.f32.gmra.mrb[2].mxu1 %vm89_vm0, %v61_v45 }
  0x50   :  { %3628 = vmatprep.subr.bf16.mxu0 %v5801_v24  ;;  %7451 = vst [vmem:[#allocation58_spill] sm:$0xff] %v5835_v37  ;;  %7452 = vst [vmem:[#allocation59_spill] sm:$0xff] %v5841_v47  ;;  %3213 = vmatmul.mubr.msk.f32.gmra.mrb[6].mxu0 %vm89_vm0, %v61_v45  ;;  %v5847_v62 = vpack.c.bf16 %v585_v57, %v578_v49  ;;  %v577_v6 = vld [vmem:[#allocation3 + $0x540] sm:$0xff]  ;;  %v584_v11 = vld [vmem:[#allocation3 + $0x578] sm:$0xff]  ;;  %v5850_v13 = vpack.c.bf16 %v587_v3, %v580_v61 }
  0x51   :  { %3690 = vmatpush1.bf16.msra.mxu1 %v5796_v14  ;;  %202 = vmatprep.mubr.f32.mxu0 %v7065_v0  ;;  %v5852_v15 = vpack.c.bf16 %v584_v11, %v577_v6  ;;  %v579_v22 = vld [vmem:[#allocation3 + $0x550] sm:$0xff]  ;;  %v586_v27 = vld [vmem:[#allocation3 + $0x588] sm:$0xff]  ;;  %v592_v41 = vld [vmem:[#allocation3 + $0x5b8] sm:$0xff] }
  0x52   :  { %3692 = vmatprep.subr.bf16.mxu1 %v5803_v32  ;;  %7453 = vst [vmem:[#allocation60_spill] sm:$0xff] %v5847_v62  ;;  %7454 = vst [vmem:[#allocation61_spill] sm:$0xff] %v5850_v13  ;;  %v62_v28 = vld [vmem:[%s7054_s0 + $0x20] sm:$0xff]  ;;  %v5859_v39 = vpack.c.bf16 %v586_v27, %v579_v22  ;;  %v594_v57 = vld [vmem:[#allocation3 + $0x5c8] sm:$0xff] }
  0x53   :  { %3630 = vmatpush1.bf16.msra.mxu0 %v5805_v33  ;;  %7455 = vst [vmem:[#allocation62_spill] sm:$0xff] %v5852_v15  ;;  %v599_v49 = vld [vmem:[#allocation3 + $0x5f0] sm:$0xff]  ;;  %v601_v61 = vld [vmem:[#allocation3 + $0x600] sm:$0xff]  ;;  %v598_v6 = vld [vmem:[#allocation3 + $0x5e8] sm:$0xff]  ;;  %3542 = vmatprep.mubr.msk.f32.mxu1 %vm89_vm0, %v62_v28 }
  0x54   :  { %3632 = vmatprep.subr.bf16.mxu0 %v5812_v50  ;;  %7456 = vst [vmem:[#allocation63_spill] sm:$0xff] %v5859_v39  ;;  %3214 = vmatmul.mubr.msk.f32.gmra.mrb[8].mxu0 %vm89_vm0, %v62_v28  ;;  %v5865_v45 = vpack.c.bf16 %v599_v49, %v592_v41  ;;  %v591_v3 = vld [vmem:[#allocation3 + $0x5b0] sm:$0xff]  ;;  %v5868_v11 = vpack.c.bf16 %v601_v61, %v594_v57  ;;  %v593_v27 = vld [vmem:[#allocation3 + $0x5c0] sm:$0xff]  ;;  %v63_v41 = vld [vmem:[%s7054_s0 + $0x28] sm:$0xff] }
  0x55   :  { %3694 = vmatpush1.bf16.msra.mxu1 %v5808_v43  ;;  %208 = vmatprep.mubr.f32.mxu0 %v7065_v0  ;;  %v5870_v22 = vpack.c.bf16 %v598_v6, %v591_v3  ;;  %v606_v57 = vld [vmem:[#allocation3 + $0x628] sm:$0xff]  ;;  %v613_v61 = vld [vmem:[#allocation3 + $0x660] sm:$0xff]  ;;  %v608_v3 = vld [vmem:[#allocation3 + $0x638] sm:$0xff] }
  0x56   :  { %3696 = vmatprep.subr.bf16.mxu1 %v5814_v56  ;;  %7457 = vst [vmem:[#allocation64_spill] sm:$0xff] %v5865_v45  ;;  %7458 = vst [vmem:[#allocation65_spill] sm:$0xff] %v5868_v11  ;;  %v5883_v28 = vpack.c.bf16 %v613_v61, %v606_v57  ;;  %v615_v6 = vld [vmem:[#allocation3 + $0x670] sm:$0xff]  ;;  %v605_v0 = vld [vmem:[#allocation3 + $0x620] sm:$0xff]  ;;  %3543 = vmatmul.mubr.msk.f32.gmra.mrb[4].mxu1 %vm89_vm0, %v63_v41 }
  0x57   :  { %3634 = vmatpush1.bf16.msra.mxu0 %v5821_v1  ;;  %7459 = vst [vmem:[#allocation66_spill] sm:$0xff] %v5870_v22  ;;  %v64_v57 = vld [vmem:[%s7054_s0 + $0x30] sm:$0xff]  ;;  %v628_v43 = vld [vmem:[#allocation3 + $0x6d8] sm:$0xff]  ;;  %v527_v32 = vld [vmem:[#allocation3 + $0x3b0] sm:$0xff] }
  0x58   :  { %3636 = vmatprep.subr.bf16.mxu0 %v5831_v20  ;;  %3215 = vmatmul.mubr.msk.f32.gmra.mrb[10].mxu0 %vm89_vm0, %v63_v41  ;;  %7461 = vst [vmem:[#allocation68_spill] sm:$0xff] %v5883_v28  ;;  %v619_v41 = vld [vmem:[#allocation3 + $0x690] sm:$0xff]  ;;  %v621_v56 = vld [vmem:[#allocation3 + $0x6a0] sm:$0xff]  ;;  %v562_v23 = vld [vmem:[#allocation3 + $0x4c8] sm:$0xff] }
  0x59   :  { %3698 = vmatpush1.bf16.msra.mxu1 %v5825_v7  ;;  %v626_v7 = vld [vmem:[#allocation3 + $0x6c8] sm:$0xff]  ;;  %3545 = vmatprep.mubr.msk.f32.mxu1 %vm89_vm0, %v64_v57  ;;  %v541_v52 = vld [vmem:[#allocation3 + $0x420] sm:$0xff] }
  0x5a   :  { %3700 = vmatprep.subr.bf16.mxu1 %v5833_v31  ;;  %v614_v31 = vld [vmem:[#allocation3 + $0x668] sm:$0xff]  ;;  %v449_v35 = vld [vmem:[#allocation3 + $0x140] sm:$0xff] }
  0x5b   :  { %3638 = vmatpush1.bf16.msra.mxu0 %v5835_v37 }
  0x5c   :  { %3640 = vmatprep.subr.bf16.mxu0 %v5847_v62 }
  0x5d   :  { %3702 = vmatpush1.bf16.msra.mxu1 %v5841_v47  ;;  %v7462_v47 = vmov 0.0  }
  0x5e   :  { %3704 = vmatprep.subr.bf16.mxu1 %v5850_v13  ;;  %v600_v13 = vld [vmem:[#allocation3 + $0x5f8] sm:$0xff]  ;;  %214 = vmatprep.mubr.f32.mxu0 %v7462_v47 }
  0x5f   :  { %3642 = vmatpush1.bf16.msra.mxu0 %v5852_v15  ;;  %v5877_v49 = vpack.c.bf16 %v600_v13, %v593_v27  ;;  %v5886_v13 = vpack.c.bf16 %v615_v6, %v608_v3  ;;  %v620_v3 = vld [vmem:[#allocation3 + $0x698] sm:$0xff]  ;;  %v627_v6 = vld [vmem:[#allocation3 + $0x6d0] sm:$0xff] }
  0x60   :  { %3644 = vmatprep.subr.bf16.mxu0 %v5865_v45  ;;  %3216 = vmatmul.mubr.msk.f32.gmra.mrb[12].mxu0 %vm89_vm0, %v64_v57  ;;  %v534_v57 = vld [vmem:[#allocation3 + $0x3e8] sm:$0xff] }
  0x61   :  { %3706 = vmatpush1.bf16.msra.mxu1 %v5859_v39  ;;  %7460 = vst [vmem:[#allocation67_spill] sm:$0xff] %v5877_v49  ;;  %v612_v39 = vld [vmem:[#allocation3 + $0x658] sm:$0xff]  ;;  %7463 = vst [vmem:[#allocation69_spill] sm:$0xff] %v5886_v13  ;;  %220 = vmatprep.mubr.f32.mxu0 %v7462_v47 }
  0x62   :  { %3708 = vmatprep.subr.bf16.mxu1 %v5868_v11  ;;  %v5889_v27 = vpack.c.bf16 %v612_v39, %v605_v0  ;;  %v607_v11 = vld [vmem:[#allocation3 + $0x630] sm:$0xff]  ;;  %v5901_v0 = vpack.c.bf16 %v627_v6, %v620_v3  ;;  %v629_v39 = vld [vmem:[#allocation3 + $0x6e0] sm:$0xff]  ;;  %v5914_v3 = vpack.c.bf16 %v628_v43, %v621_v56  ;;  %v414_v6 = vld [vmem:[#allocation3 + $0x28] sm:$0xff]  ;;  %v74_v43 = vlaneseq }
  0x63   :  { %3646 = vmatpush1.bf16.msra.mxu0 %v5870_v22  ;;  %v5895_v61 = vpack.c.bf16 %v614_v31, %v607_v11  ;;  %v65_v11 = vld [vmem:[%s7054_s0 + $0x38] sm:$0xff]  ;;  %v555_v22 = vld [vmem:[#allocation3 + $0x490] sm:$0xff] }
  0x64   :  { %7464 = vst [vmem:[#allocation70_spill] sm:$0xff] %v5889_v27  ;;  %3648 = vmatprep.subr.bf16.mxu0 %v5883_v28  ;;  %7466 = vst [vmem:[#allocation72_spill] sm:$0xff] %v5901_v0  ;;  %3546 = vmatmul.mubr.msk.f32.gmra.mrb[6].mxu1 %vm89_vm0, %v65_v11  ;;  %v5928_v56 = vshrl.u32 %v74_v43, 7  ;;  %v442_v28 = vld [vmem:[#allocation3 + $0x108] sm:$0xff] }
  0x65   :  { %3710 = vmatpush1.bf16.msra.mxu1 %v5877_v49  ;;  %7465 = vst [vmem:[#allocation71_spill] sm:$0xff] %v5895_v61  ;;  %v622_v49 = vld [vmem:[#allocation3 + $0x6a8] sm:$0xff]  ;;  %7469 = vst [vmem:[#allocation75_spill] sm:$0xff] %v5914_v3  ;;  %3217 = vmatmul.mubr.msk.f32.gmra.mrb[14].mxu0 %vm89_vm0, %v65_v11 }
  0x66   :  { %3712 = vmatprep.subr.bf16.mxu1 %v5886_v13  ;;  %v5905_v31 = vpack.c.bf16 %v629_v39, %v622_v49  ;;  %v5910_v13 = vpack.c.bf16 %v626_v7, %v619_v41  ;;  %v5922_v7 = vpack.c.bf16 %v534_v57, %v527_v32  ;;  %697 = vmatprep.mubr.f32.mxu0 %v7462_v47  ;;  %v72_v39 = vld [vmem:[%s7056_s2] sm:$0x7] }
  0x67   :  { %3650 = vmatpush1.bf16.msra.mxu0 %v5889_v27  ;;  %768 = vmatprep.mubr.f32.mxu1 %v7462_v47  ;;  %7472 = vst [vmem:[#allocation78_spill] sm:$0xff] %v5928_v56  ;;  %v548_v27 = vld [vmem:[#allocation3 + $0x458] sm:$0xff] }
  0x68   :  { %7467 = vst [vmem:[#allocation73_spill] sm:$0xff] %v5905_v31  ;;  %7468 = vst [vmem:[#allocation74_spill] sm:$0xff] %v5910_v13  ;;  %3652 = vmatprep.subr.bf16.mxu0 %v5901_v0  ;;  %v435_v0 = vld [vmem:[#allocation3 + $0xd0] sm:$0xff] }
  0x69   :  { %3714 = vmatpush1.bf16.msra.mxu1 %v5895_v61  ;;  %v421_v61 = vld [vmem:[#allocation3 + $0x60] sm:$0xff]  ;;  %7471 = vst [vmem:[#allocation77_spill] sm:$0xff] %v5922_v7 }
  0x6a   :  { %3716 = vmatprep.subr.bf16.mxu1 %v5905_v31  ;;  %v5918_v49 = vpack.c.bf16 %v421_v61, %v414_v6  ;;  %v7099_v61 = vsub.s32 0, %v5928_v56  ;;  %v7104_v6 = vsub.s32 1, %v5928_v56 }
  0x6b   :  { %3654 = vmatpush1.bf16.msra.mxu0 %v5910_v13  ;;  %v428_v13 = vld [vmem:[#allocation3 + $0x98] sm:$0xff] }
  0x6c   :  { %7470 = vst [vmem:[#allocation76_spill] sm:$0xff] %v5918_v49  ;;  %3720 = vmatprep.subr.bf16.mxu0 %v5918_v49  ;;  %v5936_v32 = vrot.slane %v72_v39, %v7099_v61  ;;  %v5944_v31 = vrot.slane %v72_v39, %v7104_v6 }
  0x6d   :  { %3718 = vmatpush1.bf16.msra.mxu1 %v5914_v3 }
  0x6e   :  { %3784 = vmatprep.subr.bf16.mxu1 %v5922_v7  ;;  %7473 = vst [vmem:[#allocation79_spill] sm:$0xff] %v5936_v32  ;;  %7475 = vst [vmem:[#allocation81_spill] sm:$0xff] %v5944_v31 }
 0x101   :  { %v180_v41 = vpop.f32.mrb[0].mxu0 }
 0x102   :  { %v181_v11 = vadd.f32 %v180_v41, %v5936_v32  ;;  %v182_v57 = vpop.f32.mrb[1].mxu0  ;;  %v7107_v41 = vsub.s32 2, %v5928_v56  ;;  %v422_v56 = vld [vmem:[#allocation3 + $0x68] sm:$0xff] }
 0x103   :  { %v5940_v49 = vpop.f32.mrb[0].mxu1  ;;  %v183_v14 = vadd.f32 %v182_v57, %v5944_v31  ;;  %v420_v31 = vld [vmem:[#allocation3 + $0x58] sm:$0xff] }
 0x104   :  { %7474 = vst [vmem:[#allocation80_spill] sm:$0xff] %v5940_v49  ;;  %v3227_v43 = vmul.f32 -1.442695, %v181_v11  ;;  %v293_v3 = vpop.f32.mrb[1].mxu1  ;;  %v5950_v32 = vrot.slane %v72_v39, %v7107_v41  ;;  %v5955_v11 = vld [vmem:[%s7058_s4] ss:$0 sm:$0xff] }
 0x105   :  { %v3228_v7 = vmul.f32 -1.442695, %v183_v14  ;;  %7477 = vst [vmem:[#allocation83_spill] sm:$0xff] %v5955_v11  ;;  %v413_v49 = vld [vmem:[#allocation3 + $0x20] sm:$0xff]  ;;  %v415_v41 = vld [vmem:[#allocation3 + $0x30] sm:$0xff] }
 0x106   :  { %5349 = vpow2.f32 %v3227_v43  ;;  %7476 = vst [vmem:[#allocation82_spill] sm:$0xff] %v5950_v32  ;;  %v294_v6 = vadd.f32 %v293_v3, %v5950_v32  ;;  %v5959_v3 = vpack.c.bf16 %v420_v31, %v413_v49  ;;  %v5961_v32 = vpack.c.bf16 %v422_v56, %v415_v41  ;;  %v443_v31 = vld [vmem:[#allocation3 + $0x110] sm:$0xff]  ;;  %v450_v49 = vld [vmem:[#allocation3 + $0x148] sm:$0xff]  ;;  %v456_v56 = vld [vmem:[#allocation3 + $0x178] sm:$0xff] }
 0x107   :  { %5351 = vpow2.f32 %v3228_v7  ;;  %v463_v41 = vld [vmem:[#allocation3 + $0x1b0] sm:$0xff] }
 0x108   :  { %7478 = vst [vmem:[#allocation84_spill] sm:$0xff] %v5959_v3 }
 0x110   :  { %v5350_v61 = vpop.eup %5349 }
 0x111   :  { %v396_v9 = vadd.f32 1.0, %v5350_v61  ;;  %v5352_v43 = vpop.eup %5351 }
 0x112   :  { %v397_v61 = vadd.f32 1.0, %v5352_v43  ;;  %v427_v43 = vld [vmem:[#allocation3 + $0x90] sm:$0xff] }
 0x113   :  { %5353 = vrcp.f32 %v396_v9 }
 0x11d   :  { %v5354_v57 = vpop.eup %5353 }
 0x11e   :  { %v403_v14 = vmul.f32 %v5354_v57, %v5955_v11  ;;  %v436_v11 = vld [vmem:[#allocation3 + $0xd8] sm:$0xff] }
 0x120   :  { %v404_v7 = vadd.f32 %v403_v14, %v294_v6  ;;  %v434_v6 = vld [vmem:[#allocation3 + $0xc8] sm:$0xff]  ;;  %v5965_v14 = vpack.c.bf16 %v435_v0, %v428_v13  ;;  %v448_v13 = vld [vmem:[#allocation3 + $0x138] sm:$0xff]  ;;  %v5981_v0 = vpack.c.bf16 %v562_v23, %v555_v22  ;;  %v455_v23 = vld [vmem:[#allocation3 + $0x170] sm:$0xff] }
 0x121   :  { %v462_v22 = vld [vmem:[#allocation3 + $0x1a8] sm:$0xff] }
 0x122   :  { %5355 = vtanh.f32 %v404_v7  ;;  %7479 = vst [vmem:[#allocation85_spill] sm:$0xff] %v5965_v14  ;;  %v429_v7 = vld [vmem:[#allocation3 + $0xa0] sm:$0xff]  ;;  %7484 = vst [vmem:[#allocation90_spill] sm:$0xff] %v5981_v0 }
 0x123   :  { %5357 = vrcp.f32 %v397_v61  ;;  %v5967_v61 = vpack.c.bf16 %v548_v27, %v541_v52  ;;  %v441_v52 = vld [vmem:[#allocation3 + $0x100] sm:$0xff]  ;;  %v5979_v27 = vpack.c.bf16 %v449_v35, %v442_v28  ;;  %v5989_v35 = vpack.c.bf16 %v450_v49, %v443_v31  ;;  %v476_v49 = vld [vmem:[#allocation3 + $0x218] sm:$0xff] }
 0x124   :  { %v5993_v28 = vpack.c.bf16 %v463_v41, %v456_v56  ;;  %v469_v31 = vld [vmem:[#allocation3 + $0x1e0] sm:$0xff] }
 0x125   :  { %7480 = vst [vmem:[#allocation86_spill] sm:$0xff] %v5967_v61  ;;  %7483 = vst [vmem:[#allocation89_spill] sm:$0xff] %v5979_v27 }
 0x126   :  { %7486 = vst [vmem:[#allocation92_spill] sm:$0xff] %v5989_v35  ;;  %7487 = vst [vmem:[#allocation93_spill] sm:$0xff] %v5993_v28 }
 0x12c   :  { %v5356_v9 = vpop.eup %5355 }
 0x12d   :  { %v406_v39 = vsub.f32 0.0, %v5356_v9  ;;  %v5358_v60 = vpop.eup %5357 }
 0x12f   :  { %v407_v40 = vmul.f32 %v5358_v60, %v406_v39  ;;  %v5975_v60 = vpack.c.bf16 %v436_v11, %v429_v7  ;;  %v576_v39 = vld [vmem:[#allocation3 + $0x538] sm:$0xff]  ;;  %v5987_v11 = vpack.c.bf16 %v448_v13, %v441_v52  ;;  %v5999_v52 = vpack.c.bf16 %v462_v22, %v455_v23 }
 0x130   :  { %v464_v7 = vld [vmem:[#allocation3 + $0x1b8] sm:$0xff]  ;;  %v6011_v23 = vpack.c.bf16 %v476_v49, %v469_v31 }
 0x131   :  { %v5963_v57 = vadd.f32 %v5356_v9, %v407_v40  ;;  %v5973_v40 = vpack.c.bf16 %v434_v6, %v427_v43  ;;  %7482 = vst [vmem:[#allocation88_spill] sm:$0xff] %v5975_v60  ;;  %v569_v9 = vld [vmem:[#allocation3 + $0x500] sm:$0xff]  ;;  %7485 = vst [vmem:[#allocation91_spill] sm:$0xff] %v5987_v11 }
 0x132   :  { %v5995_v43 = vpack.c.bf16 %v576_v39, %v569_v9  ;;  %v457_v6 = vld [vmem:[#allocation3 + $0x180] sm:$0xff]  ;;  %7489 = vst [vmem:[#allocation95_spill] sm:$0xff] %v5999_v52  ;;  %v471_v9 = vld [vmem:[#allocation3 + $0x1f0] sm:$0xff]  ;;  %v478_v39 = vld [vmem:[#allocation3 + $0x228] sm:$0xff] }
 0x133   :  { %698 = vmatmul.mubr.f32.vlgmr.msra.gmra.mrb[16].mxu0 %v5963_v57  ;;  %769 = vmatmul.mubr.f32.vlgmr.msra.gmra.mrb[8].mxu1 %v5963_v57  ;;  %7481 = vst [vmem:[#allocation87_spill] sm:$0xff] %v5973_v40  ;;  %v6001_v13 = vpack.c.bf16 %v464_v7, %v457_v6  ;;  %7493 = vst [vmem:[#allocation99_spill] sm:$0xff] %v6011_v23  ;;  %v6013_v22 = vpack.c.bf16 %v478_v39, %v471_v9  ;;  %v483_v6 = vld [vmem:[#allocation3 + $0x250] sm:$0xff]  ;;  %v490_v7 = vld [vmem:[#allocation3 + $0x288] sm:$0xff] }
 0x134   :  { %3722 = vmatpush1.bf16.msra.mxu0 %v5959_v3  ;;  %3786 = vmatpush3.bf16.msra.mxu1 %v5961_v32  ;;  %7488 = vst [vmem:[#allocation94_spill] sm:$0xff] %v5995_v43  ;;  %v6023_v31 = vpack.c.bf16 %v490_v7, %v483_v6  ;;  %v497_v9 = vld [vmem:[#allocation3 + $0x2c0] sm:$0xff]  ;;  %v504_v39 = vld [vmem:[#allocation3 + $0x2f8] sm:$0xff] }
 0x135   :  { %3724 = vmatprep.subr.bf16.mxu0 %v5965_v14  ;;  %3788 = vmatprep.subr.bf16.mxu1 %v5967_v61  ;;  %v583_v61 = vld [vmem:[#allocation3 + $0x570] sm:$0xff]  ;;  %7490 = vst [vmem:[#allocation96_spill] sm:$0xff] %v6001_v13  ;;  %7494 = vst [vmem:[#allocation100_spill] sm:$0xff] %v6013_v22  ;;  %v6035_v6 = vpack.c.bf16 %v504_v39, %v497_v9 }
 0x136   :  { %910 = vmatprep.mubr.f32.mxu1 %v7462_v47  ;;  %839 = vmatprep.mubr.f32.mxu0 %v7462_v47  ;;  %v470_v47 = vld [vmem:[#allocation3 + $0x1e8] sm:$0xff]  ;;  %7497 = vst [vmem:[#allocation103_spill] sm:$0xff] %v6023_v31 }
 0x137   :  { %7500 = vst [vmem:[#allocation106_spill] sm:$0xff] %v6035_v6 }
 0x138   :  { %3726 = vmatpush1.bf16.msra.mxu0 %v5973_v40  ;;  %3790 = vmatpush3.bf16.msra.mxu1 %v5975_v60  ;;  %v477_v40 = vld [vmem:[#allocation3 + $0x220] sm:$0xff]  ;;  %v590_v60 = vld [vmem:[#allocation3 + $0x5a8] sm:$0xff] }
 0x139   :  { %3728 = vmatprep.subr.bf16.mxu0 %v5979_v27  ;;  %3792 = vmatprep.subr.bf16.mxu1 %v5981_v0  ;;  %v6005_v56 = vpack.c.bf16 %v477_v40, %v470_v47  ;;  %v6007_v41 = vpack.c.bf16 %v590_v60, %v583_v61  ;;  %v484_v0 = vld [vmem:[#allocation3 + $0x258] sm:$0xff]  ;;  %v597_v27 = vld [vmem:[#allocation3 + $0x5e0] sm:$0xff] }
 0x13a   :  { %v485_v40 = vld [vmem:[#allocation3 + $0x260] sm:$0xff]  ;;  %v492_v60 = vld [vmem:[#allocation3 + $0x298] sm:$0xff] }
 0x13b   :  { %7491 = vst [vmem:[#allocation97_spill] sm:$0xff] %v6005_v56  ;;  %7492 = vst [vmem:[#allocation98_spill] sm:$0xff] %v6007_v41  ;;  %v6025_v49 = vpack.c.bf16 %v492_v60, %v485_v40  ;;  %v511_v40 = vld [vmem:[#allocation3 + $0x330] sm:$0xff]  ;;  %v520_v60 = vld [vmem:[#allocation3 + $0x378] sm:$0xff] }
 0x13c   :  { %3730 = vmatpush1.bf16.msra.mxu0 %v5987_v11  ;;  %3794 = vmatpush3.bf16.msra.mxu1 %v5989_v35  ;;  %v491_v11 = vld [vmem:[#allocation3 + $0x290] sm:$0xff]  ;;  %v604_v35 = vld [vmem:[#allocation3 + $0x618] sm:$0xff] }
 0x13d   :  { %3732 = vmatprep.subr.bf16.mxu0 %v5993_v28  ;;  %3796 = vmatprep.subr.bf16.mxu1 %v5995_v43  ;;  %v6017_v47 = vpack.c.bf16 %v491_v11, %v484_v0  ;;  %v6019_v61 = vpack.c.bf16 %v604_v35, %v597_v27  ;;  %v498_v43 = vld [vmem:[#allocation3 + $0x2c8] sm:$0xff]  ;;  %v611_v28 = vld [vmem:[#allocation3 + $0x650] sm:$0xff]  ;;  %7498 = vst [vmem:[#allocation104_spill] sm:$0xff] %v6025_v49 }
 0x13e   :  { %v499_v11 = vld [vmem:[#allocation3 + $0x2d0] sm:$0xff]  ;;  %v506_v35 = vld [vmem:[#allocation3 + $0x308] sm:$0xff] }
 0x13f   :  { %7495 = vst [vmem:[#allocation101_spill] sm:$0xff] %v6017_v47  ;;  %7496 = vst [vmem:[#allocation102_spill] sm:$0xff] %v6019_v61  ;;  %v6037_v7 = vpack.c.bf16 %v506_v35, %v499_v11  ;;  %v547_v11 = vld [vmem:[#allocation3 + $0x450] sm:$0xff] }
 0x140   :  { %3734 = vmatpush1.bf16.msra.mxu0 %v5999_v52  ;;  %3798 = vmatpush3.bf16.msra.mxu1 %v6001_v13  ;;  %v505_v52 = vld [vmem:[#allocation3 + $0x300] sm:$0xff]  ;;  %v618_v13 = vld [vmem:[#allocation3 + $0x688] sm:$0xff] }
 0x141   :  { %3736 = vmatprep.subr.bf16.mxu0 %v6005_v56  ;;  %3800 = vmatprep.subr.bf16.mxu1 %v6007_v41  ;;  %v6029_v27 = vpack.c.bf16 %v505_v52, %v498_v43  ;;  %v6031_v0 = vpack.c.bf16 %v618_v13, %v611_v28  ;;  %v512_v41 = vld [vmem:[#allocation3 + $0x338] sm:$0xff]  ;;  %v625_v56 = vld [vmem:[#allocation3 + $0x6c0] sm:$0xff]  ;;  %7501 = vst [vmem:[#allocation107_spill] sm:$0xff] %v6037_v7  ;;  %v518_v52 = vld [vmem:[#allocation3 + $0x368] sm:$0xff] }
 0x142   :  { %v513_v13 = vld [vmem:[#allocation3 + $0x340] sm:$0xff]  ;;  %v6047_v9 = vpack.c.bf16 %v518_v52, %v511_v40  ;;  %v539_v52 = vld [vmem:[#allocation3 + $0x410] sm:$0xff] }
 0x143   :  { %7499 = vst [vmem:[#allocation105_spill] sm:$0xff] %v6031_v0  ;;  %v6049_v39 = vpack.c.bf16 %v520_v60, %v513_v13  ;;  %v546_v13 = vld [vmem:[#allocation3 + $0x448] sm:$0xff] }
 0x144   :  { %3738 = vmatpush1.bf16.msra.mxu0 %v6011_v23  ;;  %3802 = vmatpush3.bf16.msra.mxu1 %v6013_v22  ;;  %v519_v23 = vld [vmem:[#allocation3 + $0x370] sm:$0xff]  ;;  %v632_v22 = vld [vmem:[#allocation3 + $0x6f8] sm:$0xff]  ;;  %7503 = vst [vmem:[#allocation109_spill] sm:$0xff] %v6047_v9  ;;  %v6065_v60 = vpack.c.bf16 %v546_v13, %v539_v52 }
 0x145   :  { %3740 = vmatprep.subr.bf16.mxu0 %v6017_v47  ;;  %3804 = vmatprep.subr.bf16.mxu1 %v6019_v61  ;;  %v6041_v28 = vpack.c.bf16 %v519_v23, %v512_v41  ;;  %v6043_v43 = vpack.c.bf16 %v632_v22, %v625_v56  ;;  %v526_v61 = vld [vmem:[#allocation3 + $0x3a8] sm:$0xff]  ;;  %7504 = vst [vmem:[#allocation110_spill] sm:$0xff] %v6049_v39  ;;  %v525_v56 = vld [vmem:[#allocation3 + $0x3a0] sm:$0xff]  ;;  %v532_v23 = vld [vmem:[#allocation3 + $0x3d8] sm:$0xff] }
 0x146   :  { %v540_v22 = vld [vmem:[#allocation3 + $0x418] sm:$0xff]  ;;  %v6057_v35 = vpack.c.bf16 %v532_v23, %v525_v56  ;;  %7508 = vst [vmem:[#allocation114_spill] sm:$0xff] %v6065_v60  ;;  %v553_v23 = vld [vmem:[#allocation3 + $0x480] sm:$0xff]  ;;  %v567_v13 = vld [vmem:[#allocation3 + $0x4f0] sm:$0xff] }
 0x147   :  { %7502 = vst [vmem:[#allocation108_spill] sm:$0xff] %v6043_v43  ;;  %v6060_v40 = vpack.c.bf16 %v547_v11, %v540_v22  ;;  %v560_v22 = vld [vmem:[#allocation3 + $0x4b8] sm:$0xff] }
 0x148   :  { %3742 = vmatpush1.bf16.msra.mxu0 %v6023_v31  ;;  %3806 = vmatpush3.bf16.msra.mxu1 %v6025_v49  ;;  %v533_v31 = vld [vmem:[#allocation3 + $0x3e0] sm:$0xff]  ;;  %7506 = vst [vmem:[#allocation112_spill] sm:$0xff] %v6057_v35  ;;  %v568_v11 = vld [vmem:[#allocation3 + $0x4f8] sm:$0xff] }
 0x149   :  { %3744 = vmatprep.subr.bf16.mxu0 %v6029_v27  ;;  %3808 = vmatprep.subr.bf16.mxu1 %v6031_v0  ;;  %v6053_v41 = vpack.c.bf16 %v533_v31, %v526_v61  ;;  %7507 = vst [vmem:[#allocation113_spill] sm:$0xff] %v6060_v40  ;;  %v554_v61 = vld [vmem:[#allocation3 + $0x488] sm:$0xff]  ;;  %v561_v31 = vld [vmem:[#allocation3 + $0x4c0] sm:$0xff] }
 0x14a   :  { %v6069_v56 = vpack.c.bf16 %v561_v31, %v554_v61  ;;  %v582_v61 = vld [vmem:[#allocation3 + $0x568] sm:$0xff]  ;;  %v589_v31 = vld [vmem:[#allocation3 + $0x5a0] sm:$0xff] }
 0x14b   :  { %7505 = vst [vmem:[#allocation111_spill] sm:$0xff] %v6053_v41 }
 0x14c   :  { %3746 = vmatpush1.bf16.msra.mxu0 %v6035_v6  ;;  %3810 = vmatpush3.bf16.msra.mxu1 %v6037_v7  ;;  %7509 = vst [vmem:[#allocation115_spill] sm:$0xff] %v6069_v56 }
 0x14d   :  { %3748 = vmatprep.subr.bf16.mxu0 %v6041_v28  ;;  %3812 = vmatprep.subr.bf16.mxu1 %v6043_v43 }
 0x150   :  { %3750 = vmatpush1.bf16.msra.mxu0 %v6047_v9  ;;  %3814 = vmatpush3.bf16.msra.mxu1 %v6049_v39 }
 0x151   :  { %3752 = vmatprep.subr.bf16.mxu0 %v6053_v41  ;;  %3816 = vmatprep.subr.bf16.mxu1 %v5688_v16  ;;  %v575_v16 = vld [vmem:[#allocation3 + $0x530] sm:$0xff]  ;;  %v6073_v41 = vpack.c.bf16 %v560_v22, %v553_v23  ;;  %v6085_v23 = vpack.c.bf16 %v589_v31, %v582_v61  ;;  %v581_v22 = vld [vmem:[#allocation3 + $0x560] sm:$0xff]  ;;  %v610_v61 = vld [vmem:[#allocation3 + $0x648] sm:$0xff] }
 0x152   :  { %v6077_v52 = vpack.c.bf16 %v575_v16, %v568_v11  ;;  %v596_v16 = vld [vmem:[#allocation3 + $0x5d8] sm:$0xff]  ;;  %v603_v11 = vld [vmem:[#allocation3 + $0x610] sm:$0xff]  ;;  %v617_v31 = vld [vmem:[#allocation3 + $0x680] sm:$0xff] }
 0x153   :  { %911 = vmatmul.mubr.f32.vlgmr.msra.gmra.mrb[10].mxu1 %v5963_v57  ;;  %7510 = vst [vmem:[#allocation116_spill] sm:$0xff] %v6073_v41  ;;  %7513 = vst [vmem:[#allocation119_spill] sm:$0xff] %v6085_v23 }
 0x154   :  { %3754 = vmatpush1.bf16.msra.mxu0 %v6057_v35  ;;  %3818 = vmatpush1.bf16.msra.mxu1 %v5692_v21  ;;  %7511 = vst [vmem:[#allocation117_spill] sm:$0xff] %v6077_v52 }
 0x155   :  { %3756 = vmatprep.subr.bf16.mxu0 %v6060_v40  ;;  %3820 = vmatprep.subr.bf16.mxu1 %v5697_v26  ;;  %v574_v40 = vld [vmem:[#allocation3 + $0x528] sm:$0xff] }
 0x156   :  { %v6081_v26 = vpack.c.bf16 %v574_v40, %v567_v13  ;;  %v6093_v40 = vpack.c.bf16 %v603_v11, %v596_v16  ;;  %v595_v13 = vld [vmem:[#allocation3 + $0x5d0] sm:$0xff]  ;;  %v624_v16 = vld [vmem:[#allocation3 + $0x6b8] sm:$0xff] }
 0x157   :  { %v631_v11 = vld [vmem:[#allocation3 + $0x6f0] sm:$0xff] }
 0x158   :  { %3758 = vmatpush1.bf16.msra.mxu0 %v6065_v60  ;;  %3822 = vmatpush1.bf16.msra.mxu1 %v5704_v34  ;;  %7512 = vst [vmem:[#allocation118_spill] sm:$0xff] %v6081_v26  ;;  %7515 = vst [vmem:[#allocation121_spill] sm:$0xff] %v6093_v40 }
 0x159   :  { %3760 = vmatprep.subr.bf16.mxu0 %v6069_v56  ;;  %3824 = vmatprep.subr.bf16.mxu1 %v5709_v38  ;;  %v588_v56 = vld [vmem:[#allocation3 + $0x598] sm:$0xff] }
 0x15a   :  { %v6089_v38 = vpack.c.bf16 %v588_v56, %v581_v22  ;;  %v6101_v56 = vpack.c.bf16 %v617_v31, %v610_v61  ;;  %v609_v22 = vld [vmem:[#allocation3 + $0x640] sm:$0xff] }
 0x15c   :  { %3762 = vmatpush1.bf16.msra.mxu0 %v6073_v41  ;;  %3826 = vmatpush1.bf16.msra.mxu1 %v5719_v48  ;;  %7514 = vst [vmem:[#allocation120_spill] sm:$0xff] %v6089_v38  ;;  %7517 = vst [vmem:[#allocation123_spill] sm:$0xff] %v6101_v56 }
 0x15d   :  { %3764 = vmatprep.subr.bf16.mxu0 %v6077_v52  ;;  %3828 = vmatprep.subr.bf16.mxu1 %v5723_v51  ;;  %v602_v52 = vld [vmem:[#allocation3 + $0x608] sm:$0xff] }
 0x15e   :  { %v6097_v51 = vpack.c.bf16 %v602_v52, %v595_v13  ;;  %v6109_v52 = vpack.c.bf16 %v631_v11, %v624_v16  ;;  %v623_v13 = vld [vmem:[#allocation3 + $0x6b0] sm:$0xff] }
 0x160   :  { %3766 = vmatpush1.bf16.msra.mxu0 %v6081_v26  ;;  %3830 = vmatpush1.bf16.msra.mxu1 %v5732_v58  ;;  %7516 = vst [vmem:[#allocation122_spill] sm:$0xff] %v6097_v51  ;;  %7519 = vst [vmem:[#allocation125_spill] sm:$0xff] %v6109_v52 }
 0x161   :  { %3768 = vmatprep.subr.bf16.mxu0 %v6085_v23  ;;  %3832 = vmatprep.subr.bf16.mxu1 %v5741_v63  ;;  %v616_v23 = vld [vmem:[#allocation3 + $0x678] sm:$0xff] }
 0x162   :  { %v6105_v63 = vpack.c.bf16 %v616_v23, %v609_v22  ;;  %v6123_v23 = vpop.f32.mrb[2].mxu1 }
 0x163   :  { %7521 = vst [vmem:[#allocation127_spill] sm:$0xff] %v6123_v23  ;;  %v7531_v23 = vld [vmem:[#allocation39_spill] sm:$0xff] }
 0x164   :  { %3770 = vmatpush1.bf16.msra.mxu0 %v6089_v38  ;;  %3834 = vmatpush1.bf16.msra.mxu1 %v5745_v5  ;;  %7518 = vst [vmem:[#allocation124_spill] sm:$0xff] %v6105_v63 }
 0x165   :  { %3772 = vmatprep.subr.bf16.mxu0 %v6093_v40  ;;  %3836 = vmatprep.subr.bf16.mxu1 %v5753_v12  ;;  %v630_v40 = vld [vmem:[#allocation3 + $0x6e8] sm:$0xff] }
 0x166   :  { %v6113_v61 = vpack.c.bf16 %v630_v40, %v623_v13  ;;  %v6127_v40 = vpop.f32.mrb[3].mxu1  ;;  %v7527_v13 = vld [vmem:[#allocation35_spill] sm:$0xff] }
 0x167   :  { %7522 = vst [vmem:[#allocation128_spill] sm:$0xff] %v6127_v40  ;;  %v6135_v31 = vpop.f32.mrb[4].mxu1  ;;  %v7532_v40 = vld [vmem:[#allocation70_spill] sm:$0xff] }
 0x168   :  { %3774 = vmatpush1.bf16.msra.mxu0 %v6097_v51  ;;  %3838 = vmatpush1.bf16.msra.mxu1 %v5757_v19  ;;  %7520 = vst [vmem:[#allocation126_spill] sm:$0xff] %v6113_v61  ;;  %7523 = vst [vmem:[#allocation129_spill] sm:$0xff] %v6135_v31  ;;  %v6139_v22 = vpop.f32.mrb[5].mxu1  ;;  %v7528_v31 = vld [vmem:[#allocation66_spill] sm:$0xff] }
 0x169   :  { %3776 = vmatprep.subr.bf16.mxu0 %v6101_v56  ;;  %3840 = vmatprep.subr.bf16.mxu1 %v5765_v29  ;;  %7524 = vst [vmem:[#allocation130_spill] sm:$0xff] %v6139_v22  ;;  %v6145_v16 = vpop.f32.mrb[6].mxu1  ;;  %v7529_v22 = vld [vmem:[#allocation37_spill] sm:$0xff] }
 0x16a   :  { %7525 = vst [vmem:[#allocation131_spill] sm:$0xff] %v6145_v16  ;;  %v6149_v11 = vpop.f32.mrb[7].mxu1  ;;  %v7530_v16 = vld [vmem:[#allocation68_spill] sm:$0xff] }
 0x16b   :  { %7526 = vst [vmem:[#allocation132_spill] sm:$0xff] %v6149_v11  ;;  %v7533_v11 = vld [vmem:[#allocation41_spill] sm:$0xff] }
 0x16c   :  { %3778 = vmatpush1.bf16.msra.mxu0 %v6105_v63  ;;  %3842 = vmatpush1.bf16.msra.mxu1 %v5769_v36 }
 0x16d   :  { %3780 = vmatprep.subr.bf16.mxu0 %v6109_v52  ;;  %3844 = vmatprep.subr.bf16.mxu1 %v5777_v46 }
 0x170   :  { %3782 = vmatpush1.bf16.msra.mxu0 %v6113_v61  ;;  %3846 = vmatpush1.bf16.msra.mxu1 %v5781_v53 }
 0x171   :  { %3880 = vmatprep.subr.bf16.mxu0 %v5690_v17  ;;  %3848 = vmatprep.subr.bf16.mxu1 %v5789_v2 }
 0x173   :  { %840 = vmatmul.mubr.f32.vlgmr.msra.gmra.mrb[2].mxu0 %v5963_v57 }
 0x174   :  { %3882 = vmatpush1.bf16.msra.mxu0 %v5695_v25  ;;  %3850 = vmatpush1.bf16.msra.mxu1 %v5793_v10 }
 0x175   :  { %3884 = vmatprep.subr.bf16.mxu0 %v5701_v30  ;;  %3852 = vmatprep.subr.bf16.mxu1 %v5801_v24 }
 0x178   :  { %3886 = vmatpush1.bf16.msra.mxu0 %v5712_v42  ;;  %3854 = vmatpush1.bf16.msra.mxu1 %v5805_v33 }
 0x179   :  { %3888 = vmatprep.subr.bf16.mxu0 %v5715_v44  ;;  %3856 = vmatprep.subr.bf16.mxu1 %v5812_v50 }
 0x17c   :  { %3890 = vmatpush1.bf16.msra.mxu0 %v5726_v54  ;;  %3858 = vmatpush1.bf16.msra.mxu1 %v5821_v1 }
 0x17d   :  { %3892 = vmatprep.subr.bf16.mxu0 %v5729_v55  ;;  %3860 = vmatprep.subr.bf16.mxu1 %v5831_v20 }
 0x180   :  { %3894 = vmatpush1.bf16.msra.mxu0 %v5736_v59  ;;  %3862 = vmatpush1.bf16.msra.mxu1 %v5835_v37 }
 0x181   :  { %3896 = vmatprep.subr.bf16.mxu0 %v5743_v4  ;;  %3864 = vmatprep.subr.bf16.mxu1 %v5847_v62 }
 0x184   :  { %3898 = vmatpush1.bf16.msra.mxu0 %v5748_v8  ;;  %3866 = vmatpush1.bf16.msra.mxu1 %v5852_v15  ;;  %v7534_v8 = vld [vmem:[#allocation72_spill] sm:$0xff]  ;;  %v7535_v15 = vld [vmem:[#allocation43_spill] sm:$0xff] }
 0x185   :  { %3900 = vmatprep.subr.bf16.mxu0 %v5755_v18  ;;  %3868 = vmatprep.subr.bf16.mxu1 %v5865_v45  ;;  %v7536_v18 = vld [vmem:[#allocation74_spill] sm:$0xff]  ;;  %v7537_v45 = vld [vmem:[#allocation45_spill] sm:$0xff] }
 0x188   :  { %3902 = vmatpush1.bf16.msra.mxu0 %v7527_v13  ;;  %3870 = vmatpush1.bf16.msra.mxu1 %v7528_v31  ;;  %v7538_v13 = vld [vmem:[#allocation77_spill] sm:$0xff]  ;;  %v7539_v31 = vld [vmem:[#allocation47_spill] sm:$0xff] }
 0x189   :  { %3904 = vmatprep.subr.bf16.mxu0 %v7529_v22  ;;  %3872 = vmatprep.subr.bf16.mxu1 %v7530_v16  ;;  %v7540_v22 = vld [vmem:[#allocation49_spill] sm:$0xff]  ;;  %v7541_v16 = vld [vmem:[#allocation51_spill] sm:$0xff] }
 0x18c   :  { %3906 = vmatpush1.bf16.msra.mxu0 %v7531_v23  ;;  %3874 = vmatpush1.bf16.msra.mxu1 %v7532_v40  ;;  %v7542_v23 = vld [vmem:[#allocation53_spill] sm:$0xff]  ;;  %v7543_v40 = vld [vmem:[#allocation55_spill] sm:$0xff] }
 0x18d   :  { %3908 = vmatprep.subr.bf16.mxu0 %v7533_v11  ;;  %3876 = vmatprep.subr.bf16.mxu1 %v7534_v8  ;;  %v7544_v11 = vld [vmem:[#allocation57_spill] sm:$0xff]  ;;  %v7545_v8 = vld [vmem:[#allocation59_spill] sm:$0xff] }
 0x190   :  { %3910 = vmatpush1.bf16.msra.mxu0 %v7535_v15  ;;  %3878 = vmatpush1.bf16.msra.mxu1 %v7536_v18  ;;  %v7546_v15 = vld [vmem:[#allocation61_spill] sm:$0xff]  ;;  %v7547_v18 = vld [vmem:[#allocation63_spill] sm:$0xff] }
 0x191   :  { %3912 = vmatprep.subr.bf16.mxu0 %v7537_v45  ;;  %4008 = vmatprep.subr.bf16.mxu1 %v7538_v13  ;;  %v7548_v45 = vld [vmem:[#allocation65_spill] sm:$0xff]  ;;  %v7549_v13 = vld [vmem:[#allocation67_spill] sm:$0xff] }
 0x194   :  { %3914 = vmatpush1.bf16.msra.mxu0 %v7539_v31  ;;  %v7550_v31 = vld [vmem:[#allocation69_spill] sm:$0xff] }
 0x195   :  { %3916 = vmatprep.subr.bf16.mxu0 %v7540_v22  ;;  %v7551_v22 = vld [vmem:[#allocation71_spill] sm:$0xff] }
 0x198   :  { %3918 = vmatpush1.bf16.msra.mxu0 %v7541_v16  ;;  %v7552_v16 = vld [vmem:[#allocation73_spill] sm:$0xff] }
 0x199   :  { %3920 = vmatprep.subr.bf16.mxu0 %v7542_v23  ;;  %v7553_v23 = vld [vmem:[#allocation75_spill] sm:$0xff] }
 0x19c   :  { %3922 = vmatpush1.bf16.msra.mxu0 %v7543_v40  ;;  %v7554_v40 = vld [vmem:[#allocation76_spill] sm:$0xff] }
 0x19d   :  { %3924 = vmatprep.subr.bf16.mxu0 %v7544_v11 }
 0x1a0   :  { %3926 = vmatpush1.bf16.msra.mxu0 %v7545_v8  ;;  %v7555_v8 = vld [vmem:[#allocation78_spill] sm:$0xff] }
 0x1a1   :  { %3928 = vmatprep.subr.bf16.mxu0 %v7546_v15  ;;  %v363_v15 = vld [vmem:[%s7059_s5] sm:$0xf] }
 0x1a4   :  { %3930 = vmatpush1.bf16.msra.mxu0 %v7547_v18  ;;  %v7556_v18 = vsub.s32 0, %v7555_v8 }
 0x1a5   :  { %3932 = vmatprep.subr.bf16.mxu0 %v7548_v45 }
 0x1a6   :  { %v6188_v11 = vrot.slane %v363_v15, %v7556_v18  ;;  %v379_v18 = vsub.s32 3, %v7555_v8 }
 0x1a8   :  { %3934 = vmatpush1.bf16.msra.mxu0 %v7549_v13  ;;  %7557 = vst [vmem:[#allocation78_spill] sm:$0xff] %v6188_v11  ;;  %v6197_v55 = vrot.slane %v363_v15, %v379_v18 }
 0x1a9   :  { %3936 = vmatprep.subr.bf16.mxu0 %v7550_v31 }
 0x1aa   :  { %7560 = vst [vmem:[#allocation134_spill] sm:$0xff] %v6197_v55 }
 0x1ac   :  { %3938 = vmatpush1.bf16.msra.mxu0 %v7551_v22 }
 0x1ad   :  { %3940 = vmatprep.subr.bf16.mxu0 %v7552_v16 }
 0x1b0   :  { %3942 = vmatpush1.bf16.msra.mxu0 %v7553_v23  ;;  %v7558_v23 = vsub.s32 1, %v7555_v8 }
 0x1b1   :  { %3944 = vmatprep.subr.bf16.mxu0 %v7554_v40 }
 0x1b2   :  { %v6193_v16 = vrot.slane %v363_v15, %v7558_v23 }
 0x1b4   :  { %7559 = vst [vmem:[#allocation133_spill] sm:$0xff] %v6193_v16 }
 0x206   :  { %v699_v45 = vpop.f32.mrb[16].mxu0  ;;  %v770_v13 = vpop.f32.mrb[8].mxu1 }
 0x207   :  { %v916_v31 = vadd.f32 %v699_v45, %v6188_v11  ;;  %v701_v62 = vpop.f32.mrb[17].mxu0  ;;  %v772_v22 = vpop.f32.mrb[9].mxu1  ;;  %v7561_v45 = vsub.s32 2, %v7555_v8 }
 0x208   :  { %v917_v40 = vadd.f32 %v701_v62, %v6193_v16 }
 0x209   :  { %v3229_v4 = vmul.f32 -1.442695, %v916_v31  ;;  %v6201_v11 = vrot.slane %v363_v15, %v7561_v45  ;;  %v919_v31 = vadd.f32 %v772_v22, %v6197_v55 }
 0x20a   :  { %v3230_v37 = vmul.f32 -1.442695, %v917_v40 }
 0x20b   :  { %5359 = vpow2.f32 %v3229_v4  ;;  %7562 = vst [vmem:[#allocation135_spill] sm:$0xff] %v6201_v11  ;;  %v918_v1 = vadd.f32 %v770_v13, %v6201_v11  ;;  %v7563_v13 = vld [vmem:[#allocation79_spill] sm:$0xff] }
 0x20c   :  { %5361 = vpow2.f32 %v3230_v37 }
 0x215   :  { %v5360_v59 = vpop.eup %5359 }
 0x216   :  { %v926_v20 = vadd.f32 1.0, %v5360_v59  ;;  %v5362_v4 = vpop.eup %5361 }
 0x217   :  { %v927_v40 = vadd.f32 1.0, %v5362_v4 }
 0x218   :  { %5363 = vrcp.f32 %v926_v20 }
 0x222   :  { %v5364_v23 = vpop.eup %5363 }
 0x223   :  { %v932_v62 = vmul.f32 %v5364_v23, %v919_v31 }
 0x225   :  { %v933_v16 = vadd.f32 %v932_v62, %v918_v1 }
 0x226   :  { %v3302_v59 = vpop.f32.mrb[10].mxu1 }
 0x227   :  { %5365 = vtanh.f32 %v933_v16  ;;  %v3303_v20 = vpop.f32.mrb[11].mxu1  ;;  %v7564_v16 = vld [vmem:[#allocation81_spill] sm:$0xff] }
 0x228   :  { %v3304_v37 = vadd.f32 %v3303_v20, %v3302_v59  ;;  %5367 = vrcp.f32 %v927_v40 }
 0x231   :  { %v5366_v18 = vpop.eup %5365 }
 0x232   :  { %v935_v54 = vsub.f32 0.0, %v5366_v18  ;;  %v5368_v50 = vpop.eup %5367 }
 0x234   :  { %v936_v8 = vmul.f32 %v5368_v50, %v935_v54  ;;  %v7565_v50 = vld [vmem:[#allocation83_spill] sm:$0xff] }
 0x235   :  { %v955_v59 = vadd.f32 %v3304_v37, %v7565_v50  ;;  %v7572_v37 = vld [vmem:[#allocation90_spill] sm:$0xff] }
 0x236   :  { %v6205_v15 = vadd.f32 %v5366_v18, %v936_v8  ;;  %v7566_v18 = vld [vmem:[#allocation82_spill] sm:$0xff]  ;;  %v7567_v8 = vld [vmem:[#allocation80_spill] sm:$0xff] }
 0x237   :  { %v299_v11 = vadd.f32 %v7567_v8, %v7566_v18  ;;  %v7578_v8 = vld [vmem:[#allocation96_spill] sm:$0xff] }
 0x238   :  { %1026 = vmatprep.mubr.f32.mxu1 %v6205_v15  ;;  %1097 = vmatprep.mubr.f32.mxu0 %v6205_v15 }
 0x246   :  { %v841_v22 = vpop.f32.mrb[2].mxu0 }
 0x247   :  { %v5311_v45 = vadd.f32 %v841_v22, %v7563_v13  ;;  %v843_v4 = vpop.f32.mrb[3].mxu0 }
 0x248   :  { %v5312_v31 = vadd.f32 %v843_v4, %v7564_v16 }
 0x249   :  { %v3231_v1 = vmul.f32 -1.442695, %v5311_v45 }
 0x24a   :  { %v3232_v23 = vmul.f32 -1.442695, %v5312_v31 }
 0x24b   :  { %5369 = vpow2.f32 %v3231_v1 }
 0x24c   :  { %5371 = vpow2.f32 %v3232_v23  ;;  %v7573_v23 = vld [vmem:[#allocation91_spill] sm:$0xff] }
 0x255   :  { %v5370_v62 = vpop.eup %5369 }
 0x256   :  { %v949_v40 = vadd.f32 1.0, %v5370_v62  ;;  %v5372_v54 = vpop.eup %5371 }
 0x257   :  { %v950_v22 = vadd.f32 1.0, %v5372_v54  ;;  %v7575_v54 = vld [vmem:[#allocation93_spill] sm:$0xff] }
 0x258   :  { %5373 = vrcp.f32 %v949_v40  ;;  %v7574_v40 = vld [vmem:[#allocation92_spill] sm:$0xff] }
 0x262   :  { %v5374_v20 = vpop.eup %5373 }
 0x263   :  { %v956_v55 = vmul.f32 %v5374_v20, %v955_v59  ;;  %v7576_v59 = vld [vmem:[#allocation94_spill] sm:$0xff]  ;;  %v7577_v20 = vld [vmem:[#allocation95_spill] sm:$0xff] }
 0x265   :  { %v957_v44 = vadd.f32 %v956_v55, %v299_v11  ;;  %v7569_v55 = vld [vmem:[#allocation87_spill] sm:$0xff]  ;;  %v7571_v11 = vld [vmem:[#allocation89_spill] sm:$0xff] }
 0x267   :  { %5375 = vtanh.f32 %v957_v44  ;;  %v7568_v44 = vld [vmem:[#allocation86_spill] sm:$0xff] }
 0x268   :  { %5377 = vrcp.f32 %v950_v22  ;;  %v7579_v22 = vld [vmem:[#allocation97_spill] sm:$0xff] }
 0x271   :  { %v5376_v45 = vpop.eup %5375 }
 0x272   :  { %v959_v4 = vsub.f32 %v5963_v57, %v5376_v45  ;;  %v5378_v1 = vpop.eup %5377  ;;  %v7570_v57 = vld [vmem:[#allocation88_spill] sm:$0xff] }
 0x274   :  { %v960_v31 = vmul.f32 %v5378_v1, %v959_v4  ;;  %v7581_v4 = vld [vmem:[#allocation99_spill] sm:$0xff]  ;;  %v7582_v1 = vld [vmem:[#allocation100_spill] sm:$0xff] }
 0x276   :  { %v6215_v62 = vadd.f32 %v5376_v45, %v960_v31  ;;  %v7580_v45 = vld [vmem:[#allocation98_spill] sm:$0xff] }
 0x277   :  { %v7583_v31 = vld [vmem:[#allocation102_spill] sm:$0xff] }
 0x278   :  { %1027 = vmatmul.mubr.f32.vlgmr.msra.gmra.mrb[12].mxu1 %v6215_v62  ;;  %1098 = vmatmul.mubr.f32.vlgmr.msra.gmra.mrb[18].mxu0 %v6215_v62 }
 0x279   :  { %3946 = vmatpush1.bf16.msra.mxu0 %v5959_v3  ;;  %4010 = vmatpush3.bf16.msra.mxu1 %v5961_v32 }
 0x27a   :  { %1168 = vmatprep.mubr.f32.mxu0 %v6205_v15  ;;  %1239 = vmatprep.mubr.f32.mxu1 %v6205_v15 }
 0x27b   :  { %3948 = vmatprep.subr.bf16.mxu0 %v5965_v14  ;;  %4012 = vmatprep.subr.bf16.mxu1 %v7568_v44 }
 0x27d   :  { %3950 = vmatpush1.bf16.msra.mxu0 %v7569_v55  ;;  %4014 = vmatpush3.bf16.msra.mxu1 %v7570_v57 }
 0x27e   :  { %3952 = vmatprep.subr.bf16.mxu0 %v7571_v11  ;;  %4016 = vmatprep.subr.bf16.mxu1 %v7572_v37 }
 0x281   :  { %3954 = vmatpush1.bf16.msra.mxu0 %v7573_v23  ;;  %4018 = vmatpush3.bf16.msra.mxu1 %v7574_v40  ;;  %v7584_v40 = vld [vmem:[#allocation103_spill] sm:$0xff] }
 0x282   :  { %3956 = vmatprep.subr.bf16.mxu0 %v7575_v54  ;;  %4020 = vmatprep.subr.bf16.mxu1 %v7576_v59 }
 0x285   :  { %3958 = vmatpush1.bf16.msra.mxu0 %v7577_v20  ;;  %4022 = vmatpush3.bf16.msra.mxu1 %v7578_v8 }
 0x286   :  { %3960 = vmatprep.subr.bf16.mxu0 %v7579_v22  ;;  %4024 = vmatprep.subr.bf16.mxu1 %v7580_v45 }
 0x289   :  { %3962 = vmatpush1.bf16.msra.mxu0 %v7581_v4  ;;  %4026 = vmatpush3.bf16.msra.mxu1 %v7582_v1 }
 0x28a   :  { %3964 = vmatprep.subr.bf16.mxu0 %v6017_v47  ;;  %4028 = vmatprep.subr.bf16.mxu1 %v7583_v31  ;;  %v7585_v31 = vld [vmem:[#allocation111_spill] sm:$0xff] }
 0x28d   :  { %3966 = vmatpush1.bf16.msra.mxu0 %v7584_v40  ;;  %4030 = vmatpush3.bf16.msra.mxu1 %v6025_v49  ;;  %v7586_v40 = vld [vmem:[#allocation12_spill] sm:$0xff] }
 0x28e   :  { %3968 = vmatprep.subr.bf16.mxu0 %v6029_v27  ;;  %4032 = vmatprep.subr.bf16.mxu1 %v6031_v0 }
 0x291   :  { %3970 = vmatpush1.bf16.msra.mxu0 %v6035_v6  ;;  %4034 = vmatpush3.bf16.msra.mxu1 %v6037_v7  ;;  %v7587_v6 = vld [vmem:[#allocation113_spill] sm:$0xff]  ;;  %v7588_v7 = vld [vmem:[#allocation16_spill] sm:$0xff] }
 0x292   :  { %3972 = vmatprep.subr.bf16.mxu0 %v6041_v28  ;;  %4036 = vmatprep.subr.bf16.mxu1 %v6043_v43 }
 0x295   :  { %3974 = vmatpush1.bf16.msra.mxu0 %v6047_v9  ;;  %4038 = vmatpush3.bf16.msra.mxu1 %v6049_v39  ;;  %v7589_v9 = vld [vmem:[#allocation115_spill] sm:$0xff] }
 0x296   :  { %3976 = vmatprep.subr.bf16.mxu0 %v7585_v31  ;;  %4040 = vmatprep.subr.bf16.mxu1 %v7586_v40  ;;  %v7590_v39 = vld [vmem:[#allocation19_spill] sm:$0xff]  ;;  %v7591_v40 = vld [vmem:[#allocation117_spill] sm:$0xff] }
 0x298   :  { %1240 = vmatmul.mubr.f32.vlgmr.msra.gmra.mrb[14].mxu1 %v6215_v62 }
 0x299   :  { %3978 = vmatpush1.bf16.msra.mxu0 %v6057_v35  ;;  %4042 = vmatpush1.bf16.msra.mxu1 %v5692_v21  ;;  %v7592_v35 = vld [vmem:[#allocation23_spill] sm:$0xff] }
 0x29a   :  { %3980 = vmatprep.subr.bf16.mxu0 %v7587_v6  ;;  %4044 = vmatprep.subr.bf16.mxu1 %v7588_v7  ;;  %v7593_v7 = vld [vmem:[#allocation119_spill] sm:$0xff] }
 0x29d   :  { %3982 = vmatpush1.bf16.msra.mxu0 %v6065_v60  ;;  %4046 = vmatpush1.bf16.msra.mxu1 %v5704_v34  ;;  %v7594_v60 = vld [vmem:[#allocation28_spill] sm:$0xff] }
 0x29e   :  { %3984 = vmatprep.subr.bf16.mxu0 %v7589_v9  ;;  %4048 = vmatprep.subr.bf16.mxu1 %v7590_v39  ;;  %v7595_v39 = vld [vmem:[#allocation121_spill] sm:$0xff] }
 0x2a1   :  { %3986 = vmatpush1.bf16.msra.mxu0 %v6073_v41  ;;  %4050 = vmatpush1.bf16.msra.mxu1 %v5719_v48 }
 0x2a2   :  { %3988 = vmatprep.subr.bf16.mxu0 %v7591_v40  ;;  %4052 = vmatprep.subr.bf16.mxu1 %v7592_v35 }
 0x2a5   :  { %3990 = vmatpush1.bf16.msra.mxu0 %v6081_v26  ;;  %4054 = vmatpush1.bf16.msra.mxu1 %v5732_v58 }
 0x2a6   :  { %3992 = vmatprep.subr.bf16.mxu0 %v7593_v7  ;;  %4056 = vmatprep.subr.bf16.mxu1 %v7594_v60 }
 0x2a9   :  { %3994 = vmatpush1.bf16.msra.mxu0 %v6089_v38  ;;  %4058 = vmatpush1.bf16.msra.mxu1 %v5745_v5 }
 0x2aa   :  { %3996 = vmatprep.subr.bf16.mxu0 %v7595_v39  ;;  %4060 = vmatprep.subr.bf16.mxu1 %v5753_v12 }
 0x2ad   :  { %3998 = vmatpush1.bf16.msra.mxu0 %v6097_v51  ;;  %4062 = vmatpush1.bf16.msra.mxu1 %v5757_v19 }
 0x2ae   :  { %4000 = vmatprep.subr.bf16.mxu0 %v6101_v56  ;;  %4064 = vmatprep.subr.bf16.mxu1 %v5765_v29 }
 0x2b1   :  { %4002 = vmatpush1.bf16.msra.mxu0 %v6105_v63  ;;  %4066 = vmatpush1.bf16.msra.mxu1 %v5769_v36 }
 0x2b2   :  { %4004 = vmatprep.subr.bf16.mxu0 %v6109_v52  ;;  %4068 = vmatprep.subr.bf16.mxu1 %v5777_v46  ;;  %v7600_v46 = vld [vmem:[#allocation25_spill] sm:$0xff]  ;;  %v7638_v52 = vld [vmem:[#allocation78_spill] sm:$0xff] }
 0x2b5   :  { %4006 = vmatpush1.bf16.msra.mxu0 %v6113_v61  ;;  %4070 = vmatpush1.bf16.msra.mxu1 %v5781_v53  ;;  %v7596_v61 = vld [vmem:[#allocation21_spill] sm:$0xff]  ;;  %v7597_v53 = vld [vmem:[#allocation52_spill] sm:$0xff] }
 0x2b6   :  { %4104 = vmatprep.subr.bf16.mxu0 %v5690_v17  ;;  %4072 = vmatprep.subr.bf16.mxu1 %v5789_v2  ;;  %v7598_v17 = vld [vmem:[#allocation24_spill] sm:$0xff]  ;;  %v7599_v2 = vld [vmem:[#allocation54_spill] sm:$0xff] }
 0x2b8   :  { %1169 = vmatmul.mubr.f32.vlgmr.msra.gmra.mrb[4].mxu0 %v6215_v62 }
 0x2b9   :  { %4106 = vmatpush1.bf16.msra.mxu0 %v5695_v25  ;;  %4074 = vmatpush1.bf16.msra.mxu1 %v5793_v10  ;;  %v7601_v25 = vld [vmem:[#allocation56_spill] sm:$0xff]  ;;  %v7602_v10 = vld [vmem:[#allocation27_spill] sm:$0xff] }
 0x2ba   :  { %4108 = vmatprep.subr.bf16.mxu0 %v5701_v30  ;;  %4076 = vmatprep.subr.bf16.mxu1 %v5801_v24  ;;  %v7603_v30 = vld [vmem:[#allocation58_spill] sm:$0xff]  ;;  %v7604_v24 = vld [vmem:[#allocation29_spill] sm:$0xff] }
 0x2bd   :  { %4110 = vmatpush1.bf16.msra.mxu0 %v5712_v42  ;;  %4078 = vmatpush1.bf16.msra.mxu1 %v5805_v33  ;;  %v7605_v42 = vld [vmem:[#allocation60_spill] sm:$0xff]  ;;  %v7606_v33 = vld [vmem:[#allocation31_spill] sm:$0xff] }
 0x2be   :  { %4112 = vmatprep.subr.bf16.mxu0 %v7596_v61  ;;  %4080 = vmatprep.subr.bf16.mxu1 %v7597_v53  ;;  %v7607_v61 = vld [vmem:[#allocation62_spill] sm:$0xff]  ;;  %v7608_v53 = vld [vmem:[#allocation33_spill] sm:$0xff] }
 0x2c1   :  { %4114 = vmatpush1.bf16.msra.mxu0 %v7598_v17  ;;  %4082 = vmatpush1.bf16.msra.mxu1 %v7599_v2  ;;  %v7609_v17 = vld [vmem:[#allocation64_spill] sm:$0xff]  ;;  %v7610_v2 = vld [vmem:[#allocation35_spill] sm:$0xff] }
 0x2c2   :  { %4116 = vmatprep.subr.bf16.mxu0 %v7600_v46  ;;  %4084 = vmatprep.subr.bf16.mxu1 %v7601_v25  ;;  %v7611_v46 = vld [vmem:[#allocation66_spill] sm:$0xff]  ;;  %v7612_v25 = vld [vmem:[#allocation37_spill] sm:$0xff] }
 0x2c5   :  { %4118 = vmatpush1.bf16.msra.mxu0 %v7602_v10  ;;  %4086 = vmatpush1.bf16.msra.mxu1 %v7603_v30  ;;  %v7613_v10 = vld [vmem:[#allocation68_spill] sm:$0xff]  ;;  %v7614_v30 = vld [vmem:[#allocation39_spill] sm:$0xff] }
 0x2c6   :  { %4120 = vmatprep.subr.bf16.mxu0 %v7604_v24  ;;  %4088 = vmatprep.subr.bf16.mxu1 %v7605_v42  ;;  %v7615_v24 = vld [vmem:[#allocation70_spill] sm:$0xff]  ;;  %v7616_v42 = vld [vmem:[#allocation41_spill] sm:$0xff] }
 0x2c9   :  { %4122 = vmatpush1.bf16.msra.mxu0 %v7606_v33  ;;  %4090 = vmatpush1.bf16.msra.mxu1 %v7607_v61  ;;  %v7617_v33 = vld [vmem:[#allocation72_spill] sm:$0xff]  ;;  %v7618_v61 = vld [vmem:[#allocation43_spill] sm:$0xff] }
 0x2ca   :  { %4124 = vmatprep.subr.bf16.mxu0 %v7608_v53  ;;  %4092 = vmatprep.subr.bf16.mxu1 %v7609_v17  ;;  %v7619_v53 = vld [vmem:[#allocation74_spill] sm:$0xff]  ;;  %v7620_v17 = vld [vmem:[#allocation45_spill] sm:$0xff] }
 0x2cd   :  { %4126 = vmatpush1.bf16.msra.mxu0 %v7610_v2  ;;  %4094 = vmatpush1.bf16.msra.mxu1 %v7611_v46  ;;  %v7621_v2 = vld [vmem:[#allocation77_spill] sm:$0xff]  ;;  %v7622_v46 = vld [vmem:[#allocation47_spill] sm:$0xff] }
 0x2ce   :  { %4128 = vmatprep.subr.bf16.mxu0 %v7612_v25  ;;  %4096 = vmatprep.subr.bf16.mxu1 %v7613_v10  ;;  %v7623_v25 = vld [vmem:[#allocation49_spill] sm:$0xff]  ;;  %v7624_v10 = vld [vmem:[#allocation51_spill] sm:$0xff] }
 0x2d1   :  { %4130 = vmatpush1.bf16.msra.mxu0 %v7614_v30  ;;  %4098 = vmatpush1.bf16.msra.mxu1 %v7615_v24  ;;  %v7625_v30 = vld [vmem:[#allocation53_spill] sm:$0xff]  ;;  %v7626_v24 = vld [vmem:[#allocation55_spill] sm:$0xff] }
 0x2d2   :  { %4132 = vmatprep.subr.bf16.mxu0 %v7616_v42  ;;  %4100 = vmatprep.subr.bf16.mxu1 %v7617_v33  ;;  %v7627_v42 = vld [vmem:[#allocation57_spill] sm:$0xff]  ;;  %v7628_v33 = vld [vmem:[#allocation59_spill] sm:$0xff] }
 0x2d5   :  { %4134 = vmatpush1.bf16.msra.mxu0 %v7618_v61  ;;  %4102 = vmatpush1.bf16.msra.mxu1 %v7619_v53  ;;  %v7629_v61 = vld [vmem:[#allocation61_spill] sm:$0xff]  ;;  %v7630_v53 = vld [vmem:[#allocation63_spill] sm:$0xff] }
 0x2d6   :  { %4136 = vmatprep.subr.bf16.mxu0 %v7620_v17  ;;  %4232 = vmatprep.subr.bf16.mxu1 %v7621_v2  ;;  %v7631_v17 = vld [vmem:[#allocation65_spill] sm:$0xff]  ;;  %v7632_v2 = vld [vmem:[#allocation67_spill] sm:$0xff] }
 0x2d9   :  { %4138 = vmatpush1.bf16.msra.mxu0 %v7622_v46  ;;  %v7633_v46 = vld [vmem:[#allocation69_spill] sm:$0xff] }
 0x2da   :  { %4140 = vmatprep.subr.bf16.mxu0 %v7623_v25  ;;  %v7634_v25 = vld [vmem:[#allocation71_spill] sm:$0xff] }
 0x2dd   :  { %4142 = vmatpush1.bf16.msra.mxu0 %v7624_v10  ;;  %v7635_v10 = vld [vmem:[#allocation73_spill] sm:$0xff] }
 0x2de   :  { %4144 = vmatprep.subr.bf16.mxu0 %v7625_v30  ;;  %v7636_v30 = vld [vmem:[#allocation75_spill] sm:$0xff] }
 0x2e1   :  { %4146 = vmatpush1.bf16.msra.mxu0 %v7626_v24  ;;  %v7637_v24 = vld [vmem:[#allocation76_spill] sm:$0xff] }
 0x2e2   :  { %4148 = vmatprep.subr.bf16.mxu0 %v7627_v42 }
 0x2e5   :  { %4150 = vmatpush1.bf16.msra.mxu0 %v7628_v33 }
 0x2e6   :  { %4152 = vmatprep.subr.bf16.mxu0 %v7629_v61 }
 0x2e9   :  { %4154 = vmatpush1.bf16.msra.mxu0 %v7630_v53 }
 0x2ea   :  { %4156 = vmatprep.subr.bf16.mxu0 %v7631_v17  ;;  %v7639_v17 = vld [vmem:[#allocation133_spill] sm:$0xff] }
 0x2ed   :  { %4158 = vmatpush1.bf16.msra.mxu0 %v7632_v2 }
 0x2ee   :  { %4160 = vmatprep.subr.bf16.mxu0 %v7633_v46 }
 0x2f1   :  { %4162 = vmatpush1.bf16.msra.mxu0 %v7634_v25  ;;  %v7640_v25 = vld [vmem:[#allocation134_spill] sm:$0xff] }
 0x2f2   :  { %4164 = vmatprep.subr.bf16.mxu0 %v7635_v10 }
 0x2f5   :  { %4166 = vmatpush1.bf16.msra.mxu0 %v7636_v30 }
 0x2f6   :  { %4168 = vmatprep.subr.bf16.mxu0 %v7637_v24  ;;  %v7641_v24 = vld [vmem:[#allocation135_spill] sm:$0xff] }
 0x34b   :  { %v1028_v42 = vpop.f32.mrb[12].mxu1  ;;  %v1099_v33 = vpop.f32.mrb[18].mxu0 }
 0x34c   :  { %v1245_v61 = vadd.f32 %v1028_v42, %v7638_v52  ;;  %v1030_v36 = vpop.f32.mrb[13].mxu1  ;;  %v1101_v53 = vpop.f32.mrb[19].mxu0  ;;  %v1247_v51 = vadd.f32 %v1099_v33, %v7641_v24 }
 0x34d   :  { %v1246_v2 = vadd.f32 %v1030_v36, %v7639_v17  ;;  %v1248_v30 = vadd.f32 %v1101_v53, %v7640_v25 }
 0x34e   :  { %v3233_v63 = vmul.f32 -1.442695, %v1245_v61 }
 0x34f   :  { %v3234_v29 = vmul.f32 -1.442695, %v1246_v2 }
 0x350   :  { %5379 = vpow2.f32 %v3233_v63 }
 0x351   :  { %5381 = vpow2.f32 %v3234_v29 }
 0x35a   :  { %v5380_v46 = vpop.eup %5379 }
 0x35b   :  { %v1255_v56 = vadd.f32 1.0, %v5380_v46  ;;  %v5382_v10 = vpop.eup %5381 }
 0x35c   :  { %v1256_v39 = vadd.f32 1.0, %v5382_v10 }
 0x35d   :  { %5383 = vrcp.f32 %v1255_v56 }
 0x367   :  { %v5384_v19 = vpop.eup %5383 }
 0x368   :  { %v1261_v12 = vmul.f32 %v5384_v19, %v1248_v30 }
 0x36a   :  { %v1262_v42 = vadd.f32 %v1261_v12, %v1247_v51 }
 0x36b   :  { %v3337_v52 = vpop.f32.mrb[14].mxu1 }
 0x36c   :  { %5385 = vtanh.f32 %v1262_v42  ;;  %v3338_v61 = vpop.f32.mrb[15].mxu1 }
 0x36d   :  { %v3339_v63 = vadd.f32 %v3338_v61, %v3337_v52  ;;  %5387 = vrcp.f32 %v1256_v39  ;;  %v7642_v61 = vld [vmem:[#allocation128_spill] sm:$0xff] }
 0x376   :  { %v5386_v36 = vpop.eup %5385 }
 0x377   :  { %v1264_v2 = vsub.f32 %v6205_v15, %v5386_v36  ;;  %v5388_v46 = vpop.eup %5387  ;;  %v1284_v15 = vadd.f32 %v3339_v63, %v7565_v50  ;;  %v7643_v50 = vld [vmem:[#allocation92_spill] sm:$0xff]  ;;  %v7645_v63 = vld [vmem:[#allocation103_spill] sm:$0xff] }
 0x379   :  { %v1265_v29 = vmul.f32 %v5388_v46, %v1264_v2 }
 0x37b   :  { %v6340_v56 = vadd.f32 %v5386_v36, %v1265_v29  ;;  %v304_v36 = vadd.f32 %v7642_v61, %v7566_v18  ;;  %v7652_v61 = vld [vmem:[#allocation16_spill] sm:$0xff] }
 0x37d   :  { %1355 = vmatprep.mubr.f32.mxu1 %v6340_v56  ;;  %1426 = vmatprep.mubr.f32.mxu0 %v6340_v56 }
 0x38b   :  { %v1170_v53 = vpop.f32.mrb[4].mxu0 }
 0x38c   :  { %v5313_v30 = vadd.f32 %v1170_v53, %v7563_v13  ;;  %v1172_v51 = vpop.f32.mrb[5].mxu0 }
 0x38d   :  { %v5314_v19 = vadd.f32 %v1172_v51, %v7564_v16 }
 0x38e   :  { %v3235_v12 = vmul.f32 -1.442695, %v5313_v30 }
 0x38f   :  { %v3236_v10 = vmul.f32 -1.442695, %v5314_v19 }
 0x390   :  { %5389 = vpow2.f32 %v3235_v12 }
 0x391   :  { %5391 = vpow2.f32 %v3236_v10  ;;  %v7646_v10 = vld [vmem:[#allocation106_spill] sm:$0xff] }
 0x39a   :  { %v5390_v33 = vpop.eup %5389 }
 0x39b   :  { %v1278_v39 = vadd.f32 1.0, %v5390_v33  ;;  %v5392_v52 = vpop.eup %5391  ;;  %v7647_v33 = vld [vmem:[#allocation107_spill] sm:$0xff] }
 0x39c   :  { %v1279_v29 = vadd.f32 1.0, %v5392_v52  ;;  %v7649_v52 = vld [vmem:[#allocation110_spill] sm:$0xff] }
 0x39d   :  { %5393 = vrcp.f32 %v1278_v39  ;;  %v7648_v39 = vld [vmem:[#allocation109_spill] sm:$0xff] }
 0x3a7   :  { %v5394_v42 = vpop.eup %5393 }
 0x3a8   :  { %v1285_v2 = vmul.f32 %v5394_v42, %v1284_v15  ;;  %v7650_v15 = vld [vmem:[#allocation12_spill] sm:$0xff] }
 0x3a9   :  { %v7651_v42 = vld [vmem:[#allocation112_spill] sm:$0xff] }
 0x3aa   :  { %v1286_v46 = vadd.f32 %v1285_v2, %v304_v36  ;;  %v7653_v36 = vld [vmem:[#allocation114_spill] sm:$0xff]  ;;  %v7654_v2 = vld [vmem:[#allocation19_spill] sm:$0xff] }
 0x3ac   :  { %5395 = vtanh.f32 %v1286_v46  ;;  %v7655_v46 = vld [vmem:[#allocation121_spill] sm:$0xff] }
 0x3ad   :  { %5397 = vrcp.f32 %v1279_v29  ;;  %v7656_v29 = vld [vmem:[#allocation32_spill] sm:$0xff] }
 0x3b6   :  { %v5396_v53 = vpop.eup %5395 }
 0x3b7   :  { %v1288_v30 = vsub.f32 %v6215_v62, %v5396_v53  ;;  %v5398_v51 = vpop.eup %5397  ;;  %v7644_v62 = vld [vmem:[#allocation102_spill] sm:$0xff] }
 0x3b9   :  { %v1289_v12 = vmul.f32 %v5398_v51, %v1288_v30  ;;  %v7658_v30 = vld [vmem:[#allocation34_spill] sm:$0xff]  ;;  %v7659_v51 = vld [vmem:[#allocation123_spill] sm:$0xff] }
 0x3bb   :  { %v6350_v19 = vadd.f32 %v5396_v53, %v1289_v12  ;;  %v7657_v53 = vld [vmem:[#allocation122_spill] sm:$0xff]  ;;  %v7660_v12 = vld [vmem:[#allocation36_spill] sm:$0xff] }
 0x3bd   :  { %1356 = vmatmul.mubr.f32.vlgmr.msra.gmra.mrb[16].mxu1 %v6350_v19  ;;  %1427 = vmatmul.mubr.f32.vlgmr.msra.gmra.mrb[20].mxu0 %v6350_v19 }
 0x3be   :  { %4170 = vmatpush1.bf16.msra.mxu0 %v5959_v3  ;;  %4234 = vmatpush3.bf16.msra.mxu1 %v5961_v32 }
 0x3bf   :  { %1497 = vmatprep.mubr.f32.mxu0 %v6340_v56  ;;  %1568 = vmatprep.mubr.f32.mxu1 %v6340_v56 }
 0x3c0   :  { %4172 = vmatprep.subr.bf16.mxu0 %v5965_v14  ;;  %4236 = vmatprep.subr.bf16.mxu1 %v7568_v44 }
 0x3c2   :  { %4174 = vmatpush1.bf16.msra.mxu0 %v7569_v55  ;;  %4238 = vmatpush3.bf16.msra.mxu1 %v7570_v57  ;;  %v7673_v57 = vld [vmem:[#allocation54_spill] sm:$0xff] }
 0x3c3   :  { %4176 = vmatprep.subr.bf16.mxu0 %v7571_v11  ;;  %4240 = vmatprep.subr.bf16.mxu1 %v7572_v37  ;;  %v7672_v37 = vld [vmem:[#allocation52_spill] sm:$0xff] }
 0x3c6   :  { %4178 = vmatpush1.bf16.msra.mxu0 %v7573_v23  ;;  %4242 = vmatpush3.bf16.msra.mxu1 %v7643_v50  ;;  %v7671_v50 = vld [vmem:[#allocation50_spill] sm:$0xff] }
 0x3c7   :  { %4180 = vmatprep.subr.bf16.mxu0 %v7575_v54  ;;  %4244 = vmatprep.subr.bf16.mxu1 %v7576_v59  ;;  %v7670_v59 = vld [vmem:[#allocation48_spill] sm:$0xff] }
 0x3ca   :  { %4182 = vmatpush1.bf16.msra.mxu0 %v7577_v20  ;;  %4246 = vmatpush3.bf16.msra.mxu1 %v7578_v8  ;;  %v7669_v8 = vld [vmem:[#allocation46_spill] sm:$0xff] }
 0x3cb   :  { %4184 = vmatprep.subr.bf16.mxu0 %v7579_v22  ;;  %4248 = vmatprep.subr.bf16.mxu1 %v7580_v45  ;;  %v7668_v45 = vld [vmem:[#allocation44_spill] sm:$0xff] }
 0x3ce   :  { %4186 = vmatpush1.bf16.msra.mxu0 %v7581_v4  ;;  %4250 = vmatpush3.bf16.msra.mxu1 %v7582_v1  ;;  %v7667_v1 = vld [vmem:[#allocation76_spill] sm:$0xff] }
 0x3cf   :  { %4188 = vmatprep.subr.bf16.mxu0 %v6017_v47  ;;  %4252 = vmatprep.subr.bf16.mxu1 %v7644_v62  ;;  %v7666_v62 = vld [vmem:[#allocation42_spill] sm:$0xff] }
 0x3d2   :  { %4190 = vmatpush1.bf16.msra.mxu0 %v7645_v63  ;;  %4254 = vmatpush3.bf16.msra.mxu1 %v6025_v49  ;;  %v7665_v49 = vld [vmem:[#allocation126_spill] sm:$0xff] }
 0x3d3   :  { %4192 = vmatprep.subr.bf16.mxu0 %v6029_v27  ;;  %4256 = vmatprep.subr.bf16.mxu1 %v6031_v0  ;;  %v7664_v0 = vld [vmem:[#allocation40_spill] sm:$0xff] }
 0x3d6   :  { %4194 = vmatpush1.bf16.msra.mxu0 %v7646_v10  ;;  %4258 = vmatpush3.bf16.msra.mxu1 %v7647_v33  ;;  %v7663_v33 = vld [vmem:[#allocation125_spill] sm:$0xff] }
 0x3d7   :  { %4196 = vmatprep.subr.bf16.mxu0 %v6041_v28  ;;  %4260 = vmatprep.subr.bf16.mxu1 %v6043_v43  ;;  %v7662_v43 = vld [vmem:[#allocation38_spill] sm:$0xff] }
 0x3da   :  { %4198 = vmatpush1.bf16.msra.mxu0 %v7648_v39  ;;  %4262 = vmatpush3.bf16.msra.mxu1 %v7649_v52  ;;  %v7661_v52 = vld [vmem:[#allocation124_spill] sm:$0xff] }
 0x3db   :  { %4200 = vmatprep.subr.bf16.mxu0 %v7585_v31  ;;  %4264 = vmatprep.subr.bf16.mxu1 %v7650_v15 }
 0x3dd   :  { %1569 = vmatmul.mubr.f32.vlgmr.msra.gmra.mrb[18].mxu1 %v6350_v19 }
 0x3de   :  { %4202 = vmatpush1.bf16.msra.mxu0 %v7651_v42  ;;  %4266 = vmatpush1.bf16.msra.mxu1 %v5692_v21 }
 0x3df   :  { %4204 = vmatprep.subr.bf16.mxu0 %v7587_v6  ;;  %4268 = vmatprep.subr.bf16.mxu1 %v7652_v61 }
 0x3e2   :  { %4206 = vmatpush1.bf16.msra.mxu0 %v7653_v36  ;;  %4270 = vmatpush1.bf16.msra.mxu1 %v5704_v34 }
 0x3e3   :  { %4208 = vmatprep.subr.bf16.mxu0 %v7589_v9  ;;  %4272 = vmatprep.subr.bf16.mxu1 %v7654_v2 }
 0x3e6   :  { %4210 = vmatpush1.bf16.msra.mxu0 %v6073_v41  ;;  %4274 = vmatpush1.bf16.msra.mxu1 %v5719_v48 }
 0x3e7   :  { %4212 = vmatprep.subr.bf16.mxu0 %v7591_v40  ;;  %4276 = vmatprep.subr.bf16.mxu1 %v7592_v35 }
 0x3ea   :  { %4214 = vmatpush1.bf16.msra.mxu0 %v6081_v26  ;;  %4278 = vmatpush1.bf16.msra.mxu1 %v5732_v58 }
 0x3eb   :  { %4216 = vmatprep.subr.bf16.mxu0 %v7593_v7  ;;  %4280 = vmatprep.subr.bf16.mxu1 %v7594_v60 }
 0x3ee   :  { %4218 = vmatpush1.bf16.msra.mxu0 %v6089_v38  ;;  %4282 = vmatpush1.bf16.msra.mxu1 %v5745_v5 }
 0x3ef   :  { %4220 = vmatprep.subr.bf16.mxu0 %v7655_v46  ;;  %4284 = vmatprep.subr.bf16.mxu1 %v7656_v29 }
 0x3f2   :  { %4222 = vmatpush1.bf16.msra.mxu0 %v7657_v53  ;;  %4286 = vmatpush1.bf16.msra.mxu1 %v7658_v30 }
 0x3f3   :  { %4224 = vmatprep.subr.bf16.mxu0 %v7659_v51  ;;  %4288 = vmatprep.subr.bf16.mxu1 %v7660_v12 }
 0x3f6   :  { %4226 = vmatpush1.bf16.msra.mxu0 %v7661_v52  ;;  %4290 = vmatpush1.bf16.msra.mxu1 %v7662_v43 }
 0x3f7   :  { %4228 = vmatprep.subr.bf16.mxu0 %v7663_v33  ;;  %4292 = vmatprep.subr.bf16.mxu1 %v7664_v0 }
 0x3fa   :  { %4230 = vmatpush1.bf16.msra.mxu0 %v7665_v49  ;;  %4294 = vmatpush1.bf16.msra.mxu1 %v7666_v62 }
 0x3fb   :  { %4392 = vmatprep.subr.bf16.mxu0 %v7667_v1  ;;  %4296 = vmatprep.subr.bf16.mxu1 %v7668_v45 }
 0x3fd   :  { %1498 = vmatmul.mubr.f32.vlgmr.msra.gmra.mrb[6].mxu0 %v6350_v19 }
 0x3fe   :  { %4394 = vmatpush1.bf16.msra.mxu0 %v5959_v3  ;;  %4298 = vmatpush1.bf16.msra.mxu1 %v7669_v8  ;;  %v7674_v3 = vld [vmem:[#allocation56_spill] sm:$0xff] }
 0x3ff   :  { %4396 = vmatprep.subr.bf16.mxu0 %v5965_v14  ;;  %4300 = vmatprep.subr.bf16.mxu1 %v7670_v59  ;;  %v7675_v14 = vld [vmem:[#allocation58_spill] sm:$0xff] }
 0x402   :  { %4398 = vmatpush1.bf16.msra.mxu0 %v7569_v55  ;;  %4302 = vmatpush1.bf16.msra.mxu1 %v7671_v50  ;;  %v7676_v55 = vld [vmem:[#allocation60_spill] sm:$0xff] }
 0x403   :  { %4400 = vmatprep.subr.bf16.mxu0 %v7571_v11  ;;  %4304 = vmatprep.subr.bf16.mxu1 %v7672_v37  ;;  %v7677_v11 = vld [vmem:[#allocation62_spill] sm:$0xff] }
 0x406   :  { %4402 = vmatpush1.bf16.msra.mxu0 %v7573_v23  ;;  %4306 = vmatpush1.bf16.msra.mxu1 %v7673_v57  ;;  %v7678_v23 = vld [vmem:[#allocation64_spill] sm:$0xff] }
 0x407   :  { %4404 = vmatprep.subr.bf16.mxu0 %v7575_v54  ;;  %4308 = vmatprep.subr.bf16.mxu1 %v7674_v3  ;;  %v7679_v54 = vld [vmem:[#allocation66_spill] sm:$0xff] }
 0x40a   :  { %4406 = vmatpush1.bf16.msra.mxu0 %v7577_v20  ;;  %4310 = vmatpush1.bf16.msra.mxu1 %v7675_v14  ;;  %v7680_v20 = vld [vmem:[#allocation68_spill] sm:$0xff] }
 0x40b   :  { %4408 = vmatprep.subr.bf16.mxu0 %v7579_v22  ;;  %4312 = vmatprep.subr.bf16.mxu1 %v7676_v55  ;;  %v7681_v22 = vld [vmem:[#allocation70_spill] sm:$0xff] }
 0x40e   :  { %4410 = vmatpush1.bf16.msra.mxu0 %v7581_v4  ;;  %4314 = vmatpush1.bf16.msra.mxu1 %v7677_v11  ;;  %v7682_v4 = vld [vmem:[#allocation72_spill] sm:$0xff] }
 0x40f   :  { %4412 = vmatprep.subr.bf16.mxu0 %v6017_v47  ;;  %4316 = vmatprep.subr.bf16.mxu1 %v7678_v23  ;;  %v7683_v47 = vld [vmem:[#allocation74_spill] sm:$0xff] }
 0x412   :  { %4414 = vmatpush1.bf16.msra.mxu0 %v7645_v63  ;;  %4318 = vmatpush1.bf16.msra.mxu1 %v7679_v54  ;;  %v7684_v63 = vld [vmem:[#allocation13_spill] sm:$0xff] }
 0x413   :  { %4416 = vmatprep.subr.bf16.mxu0 %v6029_v27  ;;  %4320 = vmatprep.subr.bf16.mxu1 %v7680_v20 }
 0x416   :  { %4418 = vmatpush1.bf16.msra.mxu0 %v7646_v10  ;;  %4322 = vmatpush1.bf16.msra.mxu1 %v7681_v22 }
 0x417   :  { %4420 = vmatprep.subr.bf16.mxu0 %v6041_v28  ;;  %4324 = vmatprep.subr.bf16.mxu1 %v7682_v4 }
 0x41a   :  { %4422 = vmatpush1.bf16.msra.mxu0 %v7648_v39  ;;  %4326 = vmatpush1.bf16.msra.mxu1 %v7683_v47 }
 0x41b   :  { %4424 = vmatprep.subr.bf16.mxu0 %v7585_v31  ;;  %4328 = vmatprep.subr.bf16.mxu1 %v7684_v63 }
 0x41e   :  { %4426 = vmatpush1.bf16.msra.mxu0 %v7651_v42 }
 0x41f   :  { %4428 = vmatprep.subr.bf16.mxu0 %v7587_v6 }
 0x422   :  { %4430 = vmatpush1.bf16.msra.mxu0 %v7653_v36 }
 0x423   :  { %4432 = vmatprep.subr.bf16.mxu0 %v7589_v9 }
 0x426   :  { %4434 = vmatpush1.bf16.msra.mxu0 %v6073_v41  ;;  %v7685_v41 = vld [vmem:[#allocation78_spill] sm:$0xff] }
 0x427   :  { %4436 = vmatprep.subr.bf16.mxu0 %v7591_v40 }
 0x42a   :  { %4438 = vmatpush1.bf16.msra.mxu0 %v6081_v26 }
 0x42b   :  { %4440 = vmatprep.subr.bf16.mxu0 %v7593_v7 }
 0x42e   :  { %4442 = vmatpush1.bf16.msra.mxu0 %v6089_v38 }
 0x42f   :  { %4444 = vmatprep.subr.bf16.mxu0 %v7655_v46 }
 0x432   :  { %4446 = vmatpush1.bf16.msra.mxu0 %v7657_v53 }
 0x433   :  { %4448 = vmatprep.subr.bf16.mxu0 %v7659_v51 }
 0x436   :  { %4450 = vmatpush1.bf16.msra.mxu0 %v7661_v52 }
 0x437   :  { %4452 = vmatprep.subr.bf16.mxu0 %v7663_v33 }
 0x43a   :  { %4454 = vmatpush1.bf16.msra.mxu0 %v7665_v49 }
 0x43b   :  { %4488 = vmatprep.subr.bf16.mxu0 %v7650_v15 }
 0x490   :  { %v1357_v40 = vpop.f32.mrb[16].mxu1  ;;  %v1428_v26 = vpop.f32.mrb[20].mxu0 }
 0x491   :  { %v1574_v7 = vadd.f32 %v1357_v40, %v7685_v41  ;;  %v1359_v9 = vpop.f32.mrb[17].mxu1  ;;  %v1430_v38 = vpop.f32.mrb[21].mxu0  ;;  %v1576_v42 = vadd.f32 %v1428_v26, %v7641_v24 }
 0x492   :  { %v1575_v53 = vadd.f32 %v1359_v9, %v7639_v17  ;;  %v1577_v49 = vadd.f32 %v1430_v38, %v7640_v25 }
 0x493   :  { %v3237_v36 = vmul.f32 -1.442695, %v1574_v7 }
 0x494   :  { %v3238_v46 = vmul.f32 -1.442695, %v1575_v53 }
 0x495   :  { %5399 = vpow2.f32 %v3237_v36 }
 0x496   :  { %5401 = vpow2.f32 %v3238_v46 }
 0x49f   :  { %v5400_v51 = vpop.eup %5399 }
 0x4a0   :  { %v1584_v6 = vadd.f32 1.0, %v5400_v51  ;;  %v5402_v33 = vpop.eup %5401 }
 0x4a1   :  { %v1585_v31 = vadd.f32 1.0, %v5402_v33 }
 0x4a2   :  { %5403 = vrcp.f32 %v1584_v6 }
 0x4ac   :  { %v5404_v52 = vpop.eup %5403 }
 0x4ad   :  { %v1590_v15 = vmul.f32 %v5404_v52, %v1577_v49 }
 0x4af   :  { %v1591_v40 = vadd.f32 %v1590_v15, %v1576_v42  ;;  %v6484_v42 = vld [vmem:[%s7058_s4] ss:$0 sm:$0xff] }
 0x4b0   :  { %v3372_v39 = vpop.f32.mrb[18].mxu1 }
 0x4b1   :  { %5405 = vtanh.f32 %v1591_v40  ;;  %v3373_v7 = vpop.f32.mrb[19].mxu1 }
 0x4b2   :  { %v3374_v36 = vadd.f32 %v3373_v7, %v3372_v39  ;;  %5407 = vrcp.f32 %v1585_v31 }
 0x4b4   :  { %v1613_v40 = vadd.f32 %v6484_v42, %v3374_v36  ;;  %v7687_v36 = vld [vmem:[#allocation15_spill] sm:$0xff] }
 0x4bb   :  { %v5406_v9 = vpop.eup %5405 }
 0x4bc   :  { %v1593_v53 = vsub.f32 %v6340_v56, %v5406_v9  ;;  %v5408_v51 = vpop.eup %5407 }
 0x4be   :  { %v1594_v46 = vmul.f32 %v5408_v51, %v1593_v53 }
 0x4c0   :  { %v6475_v6 = vadd.f32 %v5406_v9, %v1594_v46  ;;  %v7686_v9 = vld [vmem:[#allocation127_spill] sm:$0xff] }
 0x4c1   :  { %v309_v53 = vadd.f32 %v7686_v9, %v7566_v18  ;;  %v7694_v9 = vld [vmem:[#allocation29_spill] sm:$0xff] }
 0x4c2   :  { %1684 = vmatprep.mubr.f32.mxu1 %v6475_v6  ;;  %1826 = vmatprep.mubr.f32.mxu0 %v6475_v6 }
 0x4d0   :  { %v1499_v26 = vpop.f32.mrb[6].mxu0 }
 0x4d1   :  { %v5315_v38 = vadd.f32 %v1499_v26, %v7563_v13  ;;  %v1501_v49 = vpop.f32.mrb[7].mxu0 }
 0x4d2   :  { %v5316_v39 = vadd.f32 %v1501_v49, %v7564_v16 }
 0x4d3   :  { %v3239_v33 = vmul.f32 -1.442695, %v5315_v38 }
 0x4d4   :  { %v3240_v31 = vmul.f32 -1.442695, %v5316_v39 }
 0x4d5   :  { %5409 = vpow2.f32 %v3239_v33 }
 0x4d6   :  { %5411 = vpow2.f32 %v3240_v31 }
 0x4df   :  { %v5410_v52 = vpop.eup %5409 }
 0x4e0   :  { %v1607_v15 = vadd.f32 1.0, %v5410_v52  ;;  %v5412_v56 = vpop.eup %5411  ;;  %v7688_v52 = vld [vmem:[#allocation17_spill] sm:$0xff] }
 0x4e1   :  { %v1608_v26 = vadd.f32 1.0, %v5412_v56  ;;  %v7691_v56 = vld [vmem:[#allocation24_spill] sm:$0xff] }
 0x4e2   :  { %5413 = vrcp.f32 %v1607_v15  ;;  %v7689_v15 = vld [vmem:[#allocation20_spill] sm:$0xff] }
 0x4ec   :  { %v5414_v7 = vpop.eup %5413 }
 0x4ed   :  { %v1614_v51 = vmul.f32 %v5414_v7, %v1613_v40  ;;  %v7692_v40 = vld [vmem:[#allocation25_spill] sm:$0xff]  ;;  %v7693_v7 = vld [vmem:[#allocation27_spill] sm:$0xff] }
 0x4ef   :  { %v1615_v46 = vadd.f32 %v1614_v51, %v309_v53  ;;  %v7695_v53 = vld [vmem:[#allocation31_spill] sm:$0xff]  ;;  %v7696_v51 = vld [vmem:[#allocation33_spill] sm:$0xff] }
 0x4f1   :  { %5415 = vtanh.f32 %v1615_v46  ;;  %v7697_v46 = vld [vmem:[#allocation35_spill] sm:$0xff] }
 0x4f2   :  { %5417 = vrcp.f32 %v1608_v26  ;;  %v7698_v26 = vld [vmem:[#allocation37_spill] sm:$0xff] }
 0x4fb   :  { %v5416_v38 = vpop.eup %5415 }
 0x4fc   :  { %v1617_v49 = vsub.f32 %v6350_v19, %v5416_v38  ;;  %v5418_v33 = vpop.eup %5417  ;;  %v7690_v19 = vld [vmem:[#allocation21_spill] sm:$0xff] }
 0x4fe   :  { %v1618_v39 = vmul.f32 %v5418_v33, %v1617_v49  ;;  %v7700_v49 = vld [vmem:[#allocation41_spill] sm:$0xff]  ;;  %v7701_v33 = vld [vmem:[#allocation43_spill] sm:$0xff] }
 0x500   :  { %v6490_v31 = vadd.f32 %v5416_v38, %v1618_v39  ;;  %v7699_v38 = vld [vmem:[#allocation39_spill] sm:$0xff]  ;;  %v7702_v39 = vld [vmem:[#allocation45_spill] sm:$0xff] }
 0x502   :  { %1685 = vmatmul.mubr.f32.vlgmr.msra.gmra.mrb[20].mxu1 %v6490_v31  ;;  %1827 = vmatmul.mubr.f32.vlgmr.msra.gmra.mrb[8].mxu0 %v6490_v31 }
 0x503   :  { %4330 = vmatpush1.bf16.msra.mxu1 %v7687_v36  ;;  %1755 = vmatprep.mubr.f32.mxu1 %v6475_v6 }
 0x504   :  { %4332 = vmatprep.subr.bf16.mxu1 %v7688_v52  ;;  %4490 = vmatpush1.bf16.msra.mxu0 %v5692_v21 }
 0x505   :  { %4492 = vmatprep.subr.bf16.mxu0 %v7652_v61 }
 0x507   :  { %4334 = vmatpush1.bf16.msra.mxu1 %v7689_v15 }
 0x508   :  { %4336 = vmatprep.subr.bf16.mxu1 %v7690_v19  ;;  %4494 = vmatpush1.bf16.msra.mxu0 %v5704_v34 }
 0x509   :  { %4496 = vmatprep.subr.bf16.mxu0 %v7654_v2  ;;  %v7731_v2 = vld [vmem:[#allocation110_spill] sm:$0xff] }
 0x50b   :  { %4338 = vmatpush1.bf16.msra.mxu1 %v7691_v56 }
 0x50c   :  { %4340 = vmatprep.subr.bf16.mxu1 %v7692_v40  ;;  %4498 = vmatpush1.bf16.msra.mxu0 %v5719_v48  ;;  %v7730_v48 = vld [vmem:[#allocation108_spill] sm:$0xff] }
 0x50d   :  { %4500 = vmatprep.subr.bf16.mxu0 %v7592_v35  ;;  %v7729_v35 = vld [vmem:[#allocation107_spill] sm:$0xff] }
 0x50f   :  { %4342 = vmatpush1.bf16.msra.mxu1 %v7693_v7 }
 0x510   :  { %4344 = vmatprep.subr.bf16.mxu1 %v7694_v9  ;;  %4502 = vmatpush1.bf16.msra.mxu0 %v5732_v58  ;;  %v7728_v58 = vld [vmem:[#allocation105_spill] sm:$0xff] }
 0x511   :  { %4504 = vmatprep.subr.bf16.mxu0 %v7594_v60  ;;  %v7727_v60 = vld [vmem:[#allocation104_spill] sm:$0xff] }
 0x513   :  { %4346 = vmatpush1.bf16.msra.mxu1 %v7695_v53 }
 0x514   :  { %4348 = vmatprep.subr.bf16.mxu1 %v7696_v51  ;;  %4506 = vmatpush1.bf16.msra.mxu0 %v5745_v5  ;;  %v7726_v5 = vld [vmem:[#allocation102_spill] sm:$0xff] }
 0x515   :  { %4508 = vmatprep.subr.bf16.mxu0 %v7656_v29  ;;  %v7703_v29 = vld [vmem:[#allocation47_spill] sm:$0xff] }
 0x517   :  { %4350 = vmatpush1.bf16.msra.mxu1 %v7697_v46 }
 0x518   :  { %4352 = vmatprep.subr.bf16.mxu1 %v7698_v26  ;;  %4510 = vmatpush1.bf16.msra.mxu0 %v7658_v30  ;;  %v7704_v30 = vld [vmem:[#allocation49_spill] sm:$0xff] }
 0x519   :  { %4512 = vmatprep.subr.bf16.mxu0 %v7660_v12  ;;  %v7705_v12 = vld [vmem:[#allocation51_spill] sm:$0xff] }
 0x51b   :  { %4354 = vmatpush1.bf16.msra.mxu1 %v7699_v38 }
 0x51c   :  { %4356 = vmatprep.subr.bf16.mxu1 %v7700_v49  ;;  %4514 = vmatpush1.bf16.msra.mxu0 %v7662_v43  ;;  %v7706_v43 = vld [vmem:[#allocation53_spill] sm:$0xff] }
 0x51d   :  { %4516 = vmatprep.subr.bf16.mxu0 %v7664_v0  ;;  %v7707_v0 = vld [vmem:[#allocation55_spill] sm:$0xff] }
 0x51f   :  { %4358 = vmatpush1.bf16.msra.mxu1 %v7701_v33 }
 0x520   :  { %4360 = vmatprep.subr.bf16.mxu1 %v7702_v39  ;;  %4518 = vmatpush1.bf16.msra.mxu0 %v7666_v62  ;;  %v7708_v62 = vld [vmem:[#allocation57_spill] sm:$0xff] }
 0x521   :  { %4520 = vmatprep.subr.bf16.mxu0 %v7668_v45  ;;  %v7709_v45 = vld [vmem:[#allocation59_spill] sm:$0xff] }
 0x523   :  { %4362 = vmatpush1.bf16.msra.mxu1 %v7703_v29 }
 0x524   :  { %4364 = vmatprep.subr.bf16.mxu1 %v7704_v30  ;;  %4522 = vmatpush1.bf16.msra.mxu0 %v7669_v8  ;;  %v7710_v8 = vld [vmem:[#allocation61_spill] sm:$0xff] }
 0x525   :  { %4524 = vmatprep.subr.bf16.mxu0 %v7670_v59  ;;  %v7711_v59 = vld [vmem:[#allocation63_spill] sm:$0xff] }
 0x527   :  { %4366 = vmatpush1.bf16.msra.mxu1 %v7705_v12 }
 0x528   :  { %4368 = vmatprep.subr.bf16.mxu1 %v7706_v43  ;;  %4526 = vmatpush1.bf16.msra.mxu0 %v7671_v50  ;;  %v7712_v50 = vld [vmem:[#allocation65_spill] sm:$0xff] }
 0x529   :  { %4528 = vmatprep.subr.bf16.mxu0 %v7672_v37  ;;  %v7713_v37 = vld [vmem:[#allocation67_spill] sm:$0xff] }
 0x52b   :  { %4370 = vmatpush1.bf16.msra.mxu1 %v7707_v0 }
 0x52c   :  { %4372 = vmatprep.subr.bf16.mxu1 %v7708_v62  ;;  %4530 = vmatpush1.bf16.msra.mxu0 %v7673_v57  ;;  %v7714_v57 = vld [vmem:[#allocation69_spill] sm:$0xff] }
 0x52d   :  { %4532 = vmatprep.subr.bf16.mxu0 %v7674_v3  ;;  %v7715_v3 = vld [vmem:[#allocation71_spill] sm:$0xff] }
 0x52f   :  { %4374 = vmatpush1.bf16.msra.mxu1 %v7709_v45 }
 0x530   :  { %4376 = vmatprep.subr.bf16.mxu1 %v7710_v8  ;;  %4534 = vmatpush1.bf16.msra.mxu0 %v7675_v14  ;;  %v7716_v14 = vld [vmem:[#allocation73_spill] sm:$0xff] }
 0x531   :  { %4536 = vmatprep.subr.bf16.mxu0 %v7676_v55  ;;  %v7717_v55 = vld [vmem:[#allocation75_spill] sm:$0xff] }
 0x533   :  { %4378 = vmatpush1.bf16.msra.mxu1 %v7711_v59 }
 0x534   :  { %4380 = vmatprep.subr.bf16.mxu1 %v7712_v50  ;;  %4538 = vmatpush1.bf16.msra.mxu0 %v7677_v11  ;;  %v7718_v11 = vld [vmem:[#allocation77_spill] sm:$0xff] }
 0x535   :  { %4540 = vmatprep.subr.bf16.mxu0 %v7678_v23  ;;  %v7723_v23 = vld [vmem:[#allocation96_spill] sm:$0xff] }
 0x537   :  { %4382 = vmatpush1.bf16.msra.mxu1 %v7713_v37 }
 0x538   :  { %4384 = vmatprep.subr.bf16.mxu1 %v7714_v57  ;;  %4542 = vmatpush1.bf16.msra.mxu0 %v7679_v54  ;;  %v7722_v54 = vld [vmem:[#allocation94_spill] sm:$0xff] }
 0x539   :  { %4544 = vmatprep.subr.bf16.mxu0 %v7680_v20  ;;  %v7719_v20 = vld [vmem:[#allocation88_spill] sm:$0xff] }
 0x53b   :  { %4386 = vmatpush1.bf16.msra.mxu1 %v7715_v3 }
 0x53c   :  { %4388 = vmatprep.subr.bf16.mxu1 %v7716_v14  ;;  %4546 = vmatpush1.bf16.msra.mxu0 %v7681_v22  ;;  %v7720_v22 = vld [vmem:[#allocation90_spill] sm:$0xff] }
 0x53d   :  { %4548 = vmatprep.subr.bf16.mxu0 %v7682_v4  ;;  %v7721_v4 = vld [vmem:[#allocation92_spill] sm:$0xff] }
 0x53f   :  { %4390 = vmatpush1.bf16.msra.mxu1 %v7717_v55 }
 0x540   :  { %4456 = vmatprep.subr.bf16.mxu1 %v7718_v11  ;;  %4550 = vmatpush1.bf16.msra.mxu0 %v7683_v47  ;;  %v7724_v47 = vld [vmem:[#allocation98_spill] sm:$0xff] }
 0x541   :  { %4616 = vmatprep.subr.bf16.mxu0 %v7667_v1  ;;  %v7725_v1 = vld [vmem:[#allocation100_spill] sm:$0xff] }
 0x542   :  { %1756 = vmatmul.mubr.f32.vlgmr.msra.gmra.mrb[22].mxu1 %v6490_v31 }
 0x543   :  { %4458 = vmatpush3.bf16.msra.mxu1 %v5961_v32  ;;  %1897 = vmatprep.mubr.f32.mxu1 %v6475_v6 }
 0x544   :  { %4460 = vmatprep.subr.bf16.mxu1 %v7568_v44 }
 0x547   :  { %4462 = vmatpush3.bf16.msra.mxu1 %v7719_v20 }
 0x548   :  { %4464 = vmatprep.subr.bf16.mxu1 %v7720_v22 }
 0x54b   :  { %4466 = vmatpush3.bf16.msra.mxu1 %v7721_v4 }
 0x54c   :  { %4468 = vmatprep.subr.bf16.mxu1 %v7722_v54 }
 0x54f   :  { %4470 = vmatpush3.bf16.msra.mxu1 %v7723_v23 }
 0x550   :  { %4472 = vmatprep.subr.bf16.mxu1 %v7724_v47 }
 0x553   :  { %4474 = vmatpush3.bf16.msra.mxu1 %v7725_v1 }
 0x554   :  { %4476 = vmatprep.subr.bf16.mxu1 %v7726_v5 }
 0x557   :  { %4478 = vmatpush3.bf16.msra.mxu1 %v7727_v60 }
 0x558   :  { %4480 = vmatprep.subr.bf16.mxu1 %v7728_v58 }
 0x55b   :  { %4482 = vmatpush3.bf16.msra.mxu1 %v7729_v35 }
 0x55c   :  { %4484 = vmatprep.subr.bf16.mxu1 %v7730_v48 }
 0x55f   :  { %4486 = vmatpush3.bf16.msra.mxu1 %v7731_v2 }
 0x560   :  { %4552 = vmatprep.subr.bf16.mxu1 %v7684_v63 }
 0x562   :  { %1898 = vmatmul.mubr.f32.vlgmr.msra.gmra.mrb[24].mxu1 %v6490_v31 }
 0x563   :  { %4554 = vmatpush1.bf16.msra.mxu1 %v7687_v36 }
 0x564   :  { %4556 = vmatprep.subr.bf16.mxu1 %v7688_v52 }
 0x567   :  { %4558 = vmatpush1.bf16.msra.mxu1 %v7689_v15 }
 0x568   :  { %4560 = vmatprep.subr.bf16.mxu1 %v7690_v19 }
 0x56b   :  { %4562 = vmatpush1.bf16.msra.mxu1 %v7691_v56 }
 0x56c   :  { %4564 = vmatprep.subr.bf16.mxu1 %v7692_v40 }
 0x56f   :  { %4566 = vmatpush1.bf16.msra.mxu1 %v7693_v7 }
 0x570   :  { %4568 = vmatprep.subr.bf16.mxu1 %v7694_v9 }
 0x573   :  { %4570 = vmatpush1.bf16.msra.mxu1 %v7695_v53 }
 0x574   :  { %4572 = vmatprep.subr.bf16.mxu1 %v7696_v51 }
 0x577   :  { %4574 = vmatpush1.bf16.msra.mxu1 %v7697_v46 }
 0x578   :  { %4576 = vmatprep.subr.bf16.mxu1 %v7698_v26 }
 0x57b   :  { %4578 = vmatpush1.bf16.msra.mxu1 %v7699_v38 }
 0x57c   :  { %4580 = vmatprep.subr.bf16.mxu1 %v7700_v49 }
 0x57f   :  { %4582 = vmatpush1.bf16.msra.mxu1 %v7701_v33 }
 0x580   :  { %4584 = vmatprep.subr.bf16.mxu1 %v7702_v39 }
 0x583   :  { %4586 = vmatpush1.bf16.msra.mxu1 %v7703_v29 }
 0x584   :  { %4588 = vmatprep.subr.bf16.mxu1 %v7704_v30 }
 0x587   :  { %4590 = vmatpush1.bf16.msra.mxu1 %v7705_v12 }
 0x588   :  { %4592 = vmatprep.subr.bf16.mxu1 %v7706_v43 }
 0x58b   :  { %4594 = vmatpush1.bf16.msra.mxu1 %v7707_v0 }
 0x58c   :  { %4596 = vmatprep.subr.bf16.mxu1 %v7708_v62 }
 0x58f   :  { %4598 = vmatpush1.bf16.msra.mxu1 %v7709_v45 }
 0x590   :  { %4600 = vmatprep.subr.bf16.mxu1 %v7710_v8 }
 0x593   :  { %4602 = vmatpush1.bf16.msra.mxu1 %v7711_v59 }
 0x594   :  { %4604 = vmatprep.subr.bf16.mxu1 %v7712_v50 }
 0x597   :  { %4606 = vmatpush1.bf16.msra.mxu1 %v7713_v37 }
 0x598   :  { %4608 = vmatprep.subr.bf16.mxu1 %v7714_v57 }
 0x59b   :  { %4610 = vmatpush1.bf16.msra.mxu1 %v7715_v3 }
 0x59c   :  { %4612 = vmatprep.subr.bf16.mxu1 %v7716_v14 }
 0x59f   :  { %4614 = vmatpush1.bf16.msra.mxu1 %v7717_v55 }
 0x5a0   :  { %4680 = vmatprep.subr.bf16.mxu1 %v7718_v11 }
 0x5d5   :  { %v1686_v62 = vpop.f32.mrb[20].mxu1  ;;  %v1828_v45 = vpop.f32.mrb[8].mxu0 }
 0x5d6   :  { %v1688_v0 = vpop.f32.mrb[21].mxu1  ;;  %v1830_v8 = vpop.f32.mrb[9].mxu0  ;;  %v1903_v59 = vadd.f32 %v1686_v62, %v7685_v41  ;;  %v5317_v55 = vadd.f32 %v1828_v45, %v7563_v13 }
 0x5d7   :  { %v1904_v37 = vadd.f32 %v1688_v0, %v7639_v17 }
 0x5d8   :  { %v3241_v43 = vmul.f32 -1.442695, %v1903_v59  ;;  %v3243_v59 = vmul.f32 -1.442695, %v5317_v55 }
 0x5d9   :  { %v3242_v57 = vmul.f32 -1.442695, %v1904_v37 }
 0x5da   :  { %5419 = vpow2.f32 %v3241_v43 }
 0x5db   :  { %5421 = vpow2.f32 %v3242_v57  ;;  %v5318_v57 = vadd.f32 %v1830_v8, %v7564_v16 }
 0x5dd   :  { %v3244_v13 = vmul.f32 -1.442695, %v5318_v57 }
 0x5e4   :  { %v5420_v50 = vpop.eup %5419 }
 0x5e5   :  { %v1913_v12 = vadd.f32 1.0, %v5420_v50  ;;  %v5422_v30 = vpop.eup %5421 }
 0x5e6   :  { %v1914_v43 = vadd.f32 1.0, %v5422_v30  ;;  %v7732_v30 = vld [vmem:[#allocation130_spill] sm:$0xff] }
 0x5e7   :  { %5423 = vrcp.f32 %v1913_v12 }
 0x5f1   :  { %v5424_v11 = vpop.eup %5423 }
 0x615   :  { %v1757_v14 = vpop.f32.mrb[22].mxu1 }
 0x616   :  { %v1759_v3 = vpop.f32.mrb[23].mxu1  ;;  %v1905_v39 = vadd.f32 %v1757_v14, %v7641_v24 }
 0x617   :  { %v1906_v29 = vadd.f32 %v1759_v3, %v7640_v25 }
 0x619   :  { %v1919_v62 = vmul.f32 %v5424_v11, %v1906_v29 }
 0x61b   :  { %v1920_v41 = vadd.f32 %v1919_v62, %v1905_v39 }
 0x61d   :  { %5425 = vtanh.f32 %v1920_v41 }
 0x61e   :  { %5427 = vpow2.f32 %v3243_v59 }
 0x61f   :  { %5429 = vrcp.f32 %v1914_v43 }
 0x620   :  { %5431 = vpow2.f32 %v3244_v13 }
 0x627   :  { %v5426_v0 = vpop.eup %5425 }
 0x628   :  { %v5428_v37 = vpop.eup %5427  ;;  %v1922_v45 = vsub.f32 %v6475_v6, %v5426_v0  ;;  %v314_v6 = vadd.f32 %v7732_v30, %v7566_v18  ;;  %v7744_v30 = vld [vmem:[#allocation109_spill] sm:$0xff] }
 0x629   :  { %v5430_v50 = vpop.eup %5429  ;;  %v1936_v3 = vadd.f32 1.0, %v5428_v37 }
 0x62a   :  { %v1923_v12 = vmul.f32 %v5430_v50, %v1922_v45  ;;  %v5432_v11 = vpop.eup %5431  ;;  %v7733_v45 = vld [vmem:[#allocation84_spill] sm:$0xff]  ;;  %v7734_v50 = vld [vmem:[#allocation85_spill] sm:$0xff] }
 0x62b   :  { %5433 = vrcp.f32 %v1936_v3  ;;  %v1937_v62 = vadd.f32 1.0, %v5432_v11  ;;  %v7737_v3 = vld [vmem:[#allocation91_spill] sm:$0xff] }
 0x62c   :  { %v6617_v25 = vadd.f32 %v5426_v0, %v1923_v12  ;;  %v7736_v12 = vld [vmem:[#allocation89_spill] sm:$0xff]  ;;  %v7741_v11 = vld [vmem:[#allocation99_spill] sm:$0xff] }
 0x62e   :  { %2013 = vmatprep.mubr.f32.mxu0 %v6617_v25  ;;  %2084 = vmatprep.mubr.f32.mxu1 %v6617_v25 }
 0x635   :  { %v3407_v14 = vpop.f32.mrb[24].mxu1  ;;  %v5434_v29 = vpop.eup %5433 }
 0x636   :  { %v3408_v41 = vpop.f32.mrb[25].mxu1 }
 0x637   :  { %v3409_v55 = vadd.f32 %v3408_v41, %v3407_v14  ;;  %v7738_v14 = vld [vmem:[#allocation93_spill] sm:$0xff]  ;;  %v7739_v41 = vld [vmem:[#allocation95_spill] sm:$0xff] }
 0x639   :  { %v1942_v8 = vadd.f32 %v6484_v42, %v3409_v55  ;;  %v7740_v55 = vld [vmem:[#allocation97_spill] sm:$0xff] }
 0x63b   :  { %v1943_v39 = vmul.f32 %v5434_v29, %v1942_v8  ;;  %v7742_v8 = vld [vmem:[#allocation101_spill] sm:$0xff]  ;;  %v7743_v29 = vld [vmem:[#allocation103_spill] sm:$0xff] }
 0x63d   :  { %v1944_v59 = vadd.f32 %v1943_v39, %v314_v6  ;;  %v7745_v6 = vld [vmem:[#allocation111_spill] sm:$0xff]  ;;  %v7746_v39 = vld [vmem:[#allocation12_spill] sm:$0xff] }
 0x63f   :  { %5435 = vtanh.f32 %v1944_v59  ;;  %v7748_v59 = vld [vmem:[#allocation113_spill] sm:$0xff] }
 0x640   :  { %5437 = vrcp.f32 %v1937_v62  ;;  %v7747_v62 = vld [vmem:[#allocation112_spill] sm:$0xff] }
 0x649   :  { %v5436_v43 = vpop.eup %5435 }
 0x64a   :  { %v1946_v0 = vsub.f32 %v6490_v31, %v5436_v43  ;;  %v5438_v13 = vpop.eup %5437  ;;  %v7735_v31 = vld [vmem:[#allocation87_spill] sm:$0xff] }
 0x64c   :  { %v1947_v57 = vmul.f32 %v5438_v13, %v1946_v0  ;;  %v7750_v0 = vld [vmem:[#allocation115_spill] sm:$0xff] }
 0x64d   :  { %v7751_v13 = vld [vmem:[#allocation19_spill] sm:$0xff] }
 0x64e   :  { %v6625_v37 = vadd.f32 %v5436_v43, %v1947_v57  ;;  %v7749_v43 = vld [vmem:[#allocation114_spill] sm:$0xff]  ;;  %v7752_v57 = vld [vmem:[#allocation116_spill] sm:$0xff] }
 0x650   :  { %2014 = vmatmul.mubr.f32.vlgmr.msra.gmra.mrb[22].mxu0 %v6625_v37  ;;  %2085 = vmatmul.mubr.f32.vlgmr.msra.gmra.mrb[26].mxu1 %v6625_v37 }
 0x651   :  { %4618 = vmatpush1.bf16.msra.mxu0 %v7733_v45  ;;  %4682 = vmatpush3.bf16.msra.mxu1 %v5961_v32 }
 0x652   :  { %2155 = vmatprep.mubr.f32.mxu0 %v6617_v25  ;;  %2226 = vmatprep.mubr.f32.mxu1 %v6617_v25 }
 0x653   :  { %4620 = vmatprep.subr.bf16.mxu0 %v7734_v50  ;;  %4684 = vmatprep.subr.bf16.mxu1 %v7568_v44 }
 0x655   :  { %4622 = vmatpush1.bf16.msra.mxu0 %v7735_v31  ;;  %4686 = vmatpush3.bf16.msra.mxu1 %v7719_v20 }
 0x656   :  { %4624 = vmatprep.subr.bf16.mxu0 %v7736_v12  ;;  %4688 = vmatprep.subr.bf16.mxu1 %v7720_v22 }
 0x659   :  { %4626 = vmatpush1.bf16.msra.mxu0 %v7737_v3  ;;  %4690 = vmatpush3.bf16.msra.mxu1 %v7721_v4 }
 0x65a   :  { %4628 = vmatprep.subr.bf16.mxu0 %v7738_v14  ;;  %4692 = vmatprep.subr.bf16.mxu1 %v7722_v54 }
 0x65d   :  { %4630 = vmatpush1.bf16.msra.mxu0 %v7739_v41  ;;  %4694 = vmatpush3.bf16.msra.mxu1 %v7723_v23 }
 0x65e   :  { %4632 = vmatprep.subr.bf16.mxu0 %v7740_v55  ;;  %4696 = vmatprep.subr.bf16.mxu1 %v7724_v47 }
 0x661   :  { %4634 = vmatpush1.bf16.msra.mxu0 %v7741_v11  ;;  %4698 = vmatpush3.bf16.msra.mxu1 %v7725_v1 }
 0x662   :  { %4636 = vmatprep.subr.bf16.mxu0 %v7742_v8  ;;  %4700 = vmatprep.subr.bf16.mxu1 %v7726_v5 }
 0x665   :  { %4638 = vmatpush1.bf16.msra.mxu0 %v7743_v29  ;;  %4702 = vmatpush3.bf16.msra.mxu1 %v7727_v60 }
 0x666   :  { %4640 = vmatprep.subr.bf16.mxu0 %v6029_v27  ;;  %4704 = vmatprep.subr.bf16.mxu1 %v7728_v58 }
 0x669   :  { %4642 = vmatpush1.bf16.msra.mxu0 %v7646_v10  ;;  %4706 = vmatpush3.bf16.msra.mxu1 %v7729_v35 }
 0x66a   :  { %4644 = vmatprep.subr.bf16.mxu0 %v6041_v28  ;;  %4708 = vmatprep.subr.bf16.mxu1 %v7730_v48 }
 0x66d   :  { %4646 = vmatpush1.bf16.msra.mxu0 %v7744_v30  ;;  %4710 = vmatpush3.bf16.msra.mxu1 %v7731_v2 }
 0x66e   :  { %4648 = vmatprep.subr.bf16.mxu0 %v7745_v6  ;;  %4712 = vmatprep.subr.bf16.mxu1 %v7746_v39  ;;  %v7753_v39 = vld [vmem:[#allocation22_spill] sm:$0xff]  ;;  %v7754_v6 = vld [vmem:[#allocation117_spill] sm:$0xff] }
 0x670   :  { %2227 = vmatmul.mubr.f32.vlgmr.msra.gmra.mrb[28].mxu1 %v6625_v37 }
 0x671   :  { %4650 = vmatpush1.bf16.msra.mxu0 %v7747_v62  ;;  %4714 = vmatpush1.bf16.msra.mxu1 %v5692_v21  ;;  %v7755_v62 = vld [vmem:[#allocation23_spill] sm:$0xff]  ;;  %v7756_v21 = vld [vmem:[#allocation118_spill] sm:$0xff] }
 0x672   :  { %4652 = vmatprep.subr.bf16.mxu0 %v7748_v59  ;;  %4716 = vmatprep.subr.bf16.mxu1 %v7652_v61  ;;  %v7757_v59 = vld [vmem:[#allocation26_spill] sm:$0xff]  ;;  %v7758_v61 = vld [vmem:[#allocation119_spill] sm:$0xff] }
 0x675   :  { %4654 = vmatpush1.bf16.msra.mxu0 %v7749_v43  ;;  %4718 = vmatpush1.bf16.msra.mxu1 %v5704_v34  ;;  %v7759_v43 = vld [vmem:[#allocation28_spill] sm:$0xff] }
 0x676   :  { %4656 = vmatprep.subr.bf16.mxu0 %v7750_v0  ;;  %4720 = vmatprep.subr.bf16.mxu1 %v7751_v13  ;;  %v7760_v34 = vld [vmem:[#allocation120_spill] sm:$0xff]  ;;  %v7761_v0 = vld [vmem:[#allocation30_spill] sm:$0xff]  ;;  %v7762_v13 = vld [vmem:[#allocation121_spill] sm:$0xff] }
 0x679   :  { %4658 = vmatpush1.bf16.msra.mxu0 %v7752_v57  ;;  %4722 = vmatpush1.bf16.msra.mxu1 %v7753_v39  ;;  %v7763_v57 = vld [vmem:[#allocation32_spill] sm:$0xff]  ;;  %v7764_v39 = vld [vmem:[#allocation122_spill] sm:$0xff] }
 0x67a   :  { %4660 = vmatprep.subr.bf16.mxu0 %v7754_v6  ;;  %4724 = vmatprep.subr.bf16.mxu1 %v7755_v62  ;;  %v7765_v6 = vld [vmem:[#allocation34_spill] sm:$0xff]  ;;  %v7766_v62 = vld [vmem:[#allocation123_spill] sm:$0xff] }
 0x67d   :  { %4662 = vmatpush1.bf16.msra.mxu0 %v7756_v21  ;;  %4726 = vmatpush1.bf16.msra.mxu1 %v7757_v59  ;;  %v7767_v21 = vld [vmem:[#allocation36_spill] sm:$0xff] }
 0x67e   :  { %4664 = vmatprep.subr.bf16.mxu0 %v7758_v61  ;;  %4728 = vmatprep.subr.bf16.mxu1 %v7759_v43  ;;  %v7768_v59 = vld [vmem:[#allocation124_spill] sm:$0xff]  ;;  %v7769_v61 = vld [vmem:[#allocation38_spill] sm:$0xff]  ;;  %v7770_v43 = vld [vmem:[#allocation125_spill] sm:$0xff] }
 0x681   :  { %4666 = vmatpush1.bf16.msra.mxu0 %v7760_v34  ;;  %4730 = vmatpush1.bf16.msra.mxu1 %v7761_v0  ;;  %v7771_v34 = vld [vmem:[#allocation40_spill] sm:$0xff]  ;;  %v7772_v0 = vld [vmem:[#allocation126_spill] sm:$0xff] }
 0x682   :  { %4668 = vmatprep.subr.bf16.mxu0 %v7762_v13  ;;  %4732 = vmatprep.subr.bf16.mxu1 %v7763_v57  ;;  %v7773_v13 = vld [vmem:[#allocation42_spill] sm:$0xff] }
 0x685   :  { %4670 = vmatpush1.bf16.msra.mxu0 %v7764_v39  ;;  %4734 = vmatpush1.bf16.msra.mxu1 %v7765_v6  ;;  %v7774_v39 = vld [vmem:[#allocation44_spill] sm:$0xff] }
 0x686   :  { %4672 = vmatprep.subr.bf16.mxu0 %v7766_v62  ;;  %4736 = vmatprep.subr.bf16.mxu1 %v7767_v21  ;;  %v7775_v21 = vld [vmem:[#allocation46_spill] sm:$0xff] }
 0x689   :  { %4674 = vmatpush1.bf16.msra.mxu0 %v7768_v59  ;;  %4738 = vmatpush1.bf16.msra.mxu1 %v7769_v61  ;;  %v7776_v61 = vld [vmem:[#allocation48_spill] sm:$0xff] }
 0x68a   :  { %4676 = vmatprep.subr.bf16.mxu0 %v7770_v43  ;;  %4740 = vmatprep.subr.bf16.mxu1 %v7771_v34  ;;  %v7777_v34 = vld [vmem:[#allocation50_spill] sm:$0xff] }
 0x68d   :  { %4678 = vmatpush1.bf16.msra.mxu0 %v7772_v0  ;;  %4742 = vmatpush1.bf16.msra.mxu1 %v7773_v13  ;;  %v7778_v13 = vld [vmem:[#allocation52_spill] sm:$0xff] }
 0x68e   :  { %4776 = vmatprep.subr.bf16.mxu0 %v7684_v63  ;;  %4744 = vmatprep.subr.bf16.mxu1 %v7774_v39  ;;  %v7779_v39 = vld [vmem:[#allocation54_spill] sm:$0xff] }
 0x690   :  { %2156 = vmatmul.mubr.f32.vlgmr.msra.gmra.mrb[10].mxu0 %v6625_v37 }
 0x691   :  { %4778 = vmatpush1.bf16.msra.mxu0 %v7687_v36  ;;  %4746 = vmatpush1.bf16.msra.mxu1 %v7775_v21  ;;  %v7780_v36 = vld [vmem:[#allocation56_spill] sm:$0xff] }
 0x692   :  { %4780 = vmatprep.subr.bf16.mxu0 %v7688_v52  ;;  %4748 = vmatprep.subr.bf16.mxu1 %v7776_v61  ;;  %v7781_v52 = vld [vmem:[#allocation58_spill] sm:$0xff] }
 0x695   :  { %4782 = vmatpush1.bf16.msra.mxu0 %v7689_v15  ;;  %4750 = vmatpush1.bf16.msra.mxu1 %v7777_v34  ;;  %v7782_v15 = vld [vmem:[#allocation60_spill] sm:$0xff] }
 0x696   :  { %4784 = vmatprep.subr.bf16.mxu0 %v7690_v19  ;;  %4752 = vmatprep.subr.bf16.mxu1 %v7778_v13  ;;  %v7783_v19 = vld [vmem:[#allocation62_spill] sm:$0xff] }
 0x699   :  { %4786 = vmatpush1.bf16.msra.mxu0 %v7691_v56  ;;  %4754 = vmatpush1.bf16.msra.mxu1 %v7779_v39  ;;  %v7784_v56 = vld [vmem:[#allocation64_spill] sm:$0xff] }
 0x69a   :  { %4788 = vmatprep.subr.bf16.mxu0 %v7692_v40  ;;  %4756 = vmatprep.subr.bf16.mxu1 %v7780_v36  ;;  %v7785_v40 = vld [vmem:[#allocation66_spill] sm:$0xff] }
 0x69d   :  { %4790 = vmatpush1.bf16.msra.mxu0 %v7693_v7  ;;  %4758 = vmatpush1.bf16.msra.mxu1 %v7781_v52  ;;  %v7786_v7 = vld [vmem:[#allocation68_spill] sm:$0xff] }
 0x69e   :  { %4792 = vmatprep.subr.bf16.mxu0 %v7694_v9  ;;  %4760 = vmatprep.subr.bf16.mxu1 %v7782_v15  ;;  %v7787_v9 = vld [vmem:[#allocation70_spill] sm:$0xff] }
 0x6a1   :  { %4794 = vmatpush1.bf16.msra.mxu0 %v7695_v53  ;;  %4762 = vmatpush1.bf16.msra.mxu1 %v7783_v19  ;;  %v7788_v53 = vld [vmem:[#allocation72_spill] sm:$0xff]  ;;  %v7808_v19 = vld [vmem:[#allocation78_spill] sm:$0xff] }
 0x6a2   :  { %4796 = vmatprep.subr.bf16.mxu0 %v7696_v51  ;;  %4764 = vmatprep.subr.bf16.mxu1 %v7784_v56  ;;  %v7789_v51 = vld [vmem:[#allocation74_spill] sm:$0xff]  ;;  %v7790_v56 = vld [vmem:[#allocation45_spill] sm:$0xff] }
 0x6a5   :  { %4798 = vmatpush1.bf16.msra.mxu0 %v7697_v46  ;;  %4766 = vmatpush1.bf16.msra.mxu1 %v7785_v40  ;;  %v7791_v46 = vld [vmem:[#allocation77_spill] sm:$0xff]  ;;  %v7792_v40 = vld [vmem:[#allocation47_spill] sm:$0xff] }
 0x6a6   :  { %4800 = vmatprep.subr.bf16.mxu0 %v7698_v26  ;;  %4768 = vmatprep.subr.bf16.mxu1 %v7786_v7  ;;  %v7793_v26 = vld [vmem:[#allocation49_spill] sm:$0xff]  ;;  %v7794_v7 = vld [vmem:[#allocation51_spill] sm:$0xff] }
 0x6a9   :  { %4802 = vmatpush1.bf16.msra.mxu0 %v7699_v38  ;;  %4770 = vmatpush1.bf16.msra.mxu1 %v7787_v9  ;;  %v7795_v38 = vld [vmem:[#allocation53_spill] sm:$0xff]  ;;  %v7796_v9 = vld [vmem:[#allocation55_spill] sm:$0xff] }
 0x6aa   :  { %4804 = vmatprep.subr.bf16.mxu0 %v7700_v49  ;;  %4772 = vmatprep.subr.bf16.mxu1 %v7788_v53  ;;  %v7797_v49 = vld [vmem:[#allocation57_spill] sm:$0xff]  ;;  %v7798_v53 = vld [vmem:[#allocation59_spill] sm:$0xff] }
 0x6ad   :  { %4806 = vmatpush1.bf16.msra.mxu0 %v7701_v33  ;;  %4774 = vmatpush1.bf16.msra.mxu1 %v7789_v51  ;;  %v7799_v33 = vld [vmem:[#allocation61_spill] sm:$0xff]  ;;  %v7800_v51 = vld [vmem:[#allocation63_spill] sm:$0xff] }
 0x6ae   :  { %4808 = vmatprep.subr.bf16.mxu0 %v7790_v56  ;;  %4904 = vmatprep.subr.bf16.mxu1 %v7791_v46  ;;  %v7801_v56 = vld [vmem:[#allocation65_spill] sm:$0xff]  ;;  %v7802_v46 = vld [vmem:[#allocation67_spill] sm:$0xff] }
 0x6b1   :  { %4810 = vmatpush1.bf16.msra.mxu0 %v7792_v40  ;;  %v7803_v40 = vld [vmem:[#allocation69_spill] sm:$0xff] }
 0x6b2   :  { %4812 = vmatprep.subr.bf16.mxu0 %v7793_v26  ;;  %v7804_v26 = vld [vmem:[#allocation71_spill] sm:$0xff] }
 0x6b5   :  { %4814 = vmatpush1.bf16.msra.mxu0 %v7794_v7  ;;  %v7805_v7 = vld [vmem:[#allocation73_spill] sm:$0xff] }
 0x6b6   :  { %4816 = vmatprep.subr.bf16.mxu0 %v7795_v38  ;;  %v7806_v38 = vld [vmem:[#allocation75_spill] sm:$0xff] }
 0x6b9   :  { %4818 = vmatpush1.bf16.msra.mxu0 %v7796_v9  ;;  %v7807_v9 = vld [vmem:[#allocation76_spill] sm:$0xff] }
 0x6ba   :  { %4820 = vmatprep.subr.bf16.mxu0 %v7797_v49 }
 0x6bd   :  { %4822 = vmatpush1.bf16.msra.mxu0 %v7798_v53 }
 0x6be   :  { %4824 = vmatprep.subr.bf16.mxu0 %v7799_v33 }
 0x6c1   :  { %4826 = vmatpush1.bf16.msra.mxu0 %v7800_v51 }
 0x6c2   :  { %4828 = vmatprep.subr.bf16.mxu0 %v7801_v56 }
 0x6c5   :  { %4830 = vmatpush1.bf16.msra.mxu0 %v7802_v46 }
 0x6c6   :  { %4832 = vmatprep.subr.bf16.mxu0 %v7803_v40 }
 0x6c9   :  { %4834 = vmatpush1.bf16.msra.mxu0 %v7804_v26  ;;  %v7809_v26 = vld [vmem:[#allocation134_spill] sm:$0xff] }
 0x6ca   :  { %4836 = vmatprep.subr.bf16.mxu0 %v7805_v7 }
 0x6cd   :  { %4838 = vmatpush1.bf16.msra.mxu0 %v7806_v38 }
 0x6ce   :  { %4840 = vmatprep.subr.bf16.mxu0 %v7807_v9 }
 0x723   :  { %v2015_v49 = vpop.f32.mrb[22].mxu0  ;;  %v2086_v53 = vpop.f32.mrb[26].mxu1 }
 0x724   :  { %v2232_v33 = vadd.f32 %v2015_v49, %v7808_v19  ;;  %v2017_v15 = vpop.f32.mrb[23].mxu0  ;;  %v2088_v51 = vpop.f32.mrb[27].mxu1  ;;  %v2234_v9 = vadd.f32 %v2086_v53, %v7641_v24 }
 0x725   :  { %v2233_v46 = vadd.f32 %v2017_v15, %v7639_v17  ;;  %v2235_v38 = vadd.f32 %v2088_v51, %v7809_v26  ;;  %v7810_v51 = vld [vmem:[#allocation79_spill] sm:$0xff] }
 0x726   :  { %v3245_v52 = vmul.f32 -1.442695, %v2232_v33 }
 0x727   :  { %v3246_v56 = vmul.f32 -1.442695, %v2233_v46 }
 0x728   :  { %5439 = vpow2.f32 %v3245_v52 }
 0x729   :  { %5441 = vpow2.f32 %v3246_v56 }
 0x732   :  { %v5440_v40 = vpop.eup %5439 }
 0x733   :  { %v2242_v36 = vadd.f32 1.0, %v5440_v40  ;;  %v5442_v7 = vpop.eup %5441 }
 0x734   :  { %v2243_v34 = vadd.f32 1.0, %v5442_v7 }
 0x735   :  { %5443 = vrcp.f32 %v2242_v36 }
 0x73f   :  { %v5444_v39 = vpop.eup %5443 }
 0x740   :  { %v2248_v13 = vmul.f32 %v5444_v39, %v2235_v38 }
 0x742   :  { %v2249_v49 = vadd.f32 %v2248_v13, %v2234_v9 }
 0x743   :  { %v3442_v19 = vpop.f32.mrb[28].mxu1 }
 0x744   :  { %5445 = vtanh.f32 %v2249_v49  ;;  %v3443_v33 = vpop.f32.mrb[29].mxu1 }
 0x745   :  { %v3444_v52 = vadd.f32 %v3443_v33, %v3442_v19  ;;  %5447 = vrcp.f32 %v2243_v34 }
 0x747   :  { %v2271_v49 = vadd.f32 %v6484_v42, %v3444_v52  ;;  %v7812_v42 = vld [vmem:[#allocation111_spill] sm:$0xff]  ;;  %v7814_v52 = vld [vmem:[#allocation112_spill] sm:$0xff] }
 0x74e   :  { %v5446_v15 = vpop.eup %5445 }
 0x74f   :  { %v2251_v46 = vsub.f32 %v6617_v25, %v5446_v15  ;;  %v5448_v40 = vpop.eup %5447 }
 0x751   :  { %v2252_v56 = vmul.f32 %v5448_v40, %v2251_v46 }
 0x753   :  { %v6750_v36 = vadd.f32 %v5446_v15, %v2252_v56  ;;  %v7811_v15 = vld [vmem:[#allocation129_spill] sm:$0xff] }
 0x754   :  { %v319_v46 = vadd.f32 %v7811_v15, %v7566_v18  ;;  %v7820_v15 = vld [vmem:[#allocation115_spill] sm:$0xff] }
 0x755   :  { %2342 = vmatprep.mubr.f32.mxu1 %v6750_v36  ;;  %2413 = vmatprep.mubr.f32.mxu0 %v6750_v36 }
 0x763   :  { %v2157_v53 = vpop.f32.mrb[10].mxu0 }
 0x764   :  { %v5319_v7 = vadd.f32 %v2157_v53, %v7810_v51  ;;  %v2159_v9 = vpop.f32.mrb[11].mxu0 }
 0x765   :  { %v5320_v19 = vadd.f32 %v2159_v9, %v7564_v16 }
 0x766   :  { %v3247_v38 = vmul.f32 -1.442695, %v5319_v7 }
 0x767   :  { %v3248_v34 = vmul.f32 -1.442695, %v5320_v19 }
 0x768   :  { %5449 = vpow2.f32 %v3247_v38 }
 0x769   :  { %5451 = vpow2.f32 %v3248_v34  ;;  %v7815_v34 = vld [vmem:[#allocation14_spill] sm:$0xff] }
 0x772   :  { %v5450_v39 = vpop.eup %5449 }
 0x773   :  { %v2265_v13 = vadd.f32 1.0, %v5450_v39  ;;  %v5452_v25 = vpop.eup %5451 }
 0x774   :  { %v2266_v53 = vadd.f32 1.0, %v5452_v25  ;;  %v7817_v25 = vld [vmem:[#allocation16_spill] sm:$0xff] }
 0x775   :  { %5453 = vrcp.f32 %v2265_v13  ;;  %v7816_v13 = vld [vmem:[#allocation113_spill] sm:$0xff] }
 0x77f   :  { %v5454_v33 = vpop.eup %5453 }
 0x780   :  { %v2272_v40 = vmul.f32 %v5454_v33, %v2271_v49  ;;  %v7818_v49 = vld [vmem:[#allocation114_spill] sm:$0xff] }
 0x781   :  { %v7819_v33 = vld [vmem:[#allocation18_spill] sm:$0xff] }
 0x782   :  { %v2273_v56 = vadd.f32 %v2272_v40, %v319_v46  ;;  %v7821_v46 = vld [vmem:[#allocation19_spill] sm:$0xff]  ;;  %v7822_v40 = vld [vmem:[#allocation116_spill] sm:$0xff] }
 0x784   :  { %5455 = vtanh.f32 %v2273_v56  ;;  %v7823_v56 = vld [vmem:[#allocation22_spill] sm:$0xff] }
 0x785   :  { %5457 = vrcp.f32 %v2266_v53  ;;  %v7824_v53 = vld [vmem:[#allocation117_spill] sm:$0xff] }
 0x78e   :  { %v5456_v7 = vpop.eup %5455 }
 0x78f   :  { %v2275_v9 = vsub.f32 %v6625_v37, %v5456_v7  ;;  %v5458_v38 = vpop.eup %5457  ;;  %v7813_v37 = vld [vmem:[#allocation12_spill] sm:$0xff] }
 0x791   :  { %v2276_v19 = vmul.f32 %v5458_v38, %v2275_v9  ;;  %v7826_v9 = vld [vmem:[#allocation118_spill] sm:$0xff] }
 0x792   :  { %v7827_v38 = vld [vmem:[#allocation26_spill] sm:$0xff] }
 0x793   :  { %v6760_v39 = vadd.f32 %v5456_v7, %v2276_v19  ;;  %v7825_v7 = vld [vmem:[#allocation23_spill] sm:$0xff] }
 0x794   :  { %v7828_v19 = vld [vmem:[#allocation119_spill] sm:$0xff] }
 0x795   :  { %2343 = vmatmul.mubr.f32.vlgmr.msra.gmra.mrb[30].mxu1 %v6760_v39  ;;  %2414 = vmatmul.mubr.f32.vlgmr.msra.gmra.mrb[24].mxu0 %v6760_v39 }
 0x796   :  { %4842 = vmatpush1.bf16.msra.mxu0 %v7733_v45  ;;  %4906 = vmatpush3.bf16.msra.mxu1 %v5961_v32 }
 0x797   :  { %2484 = vmatprep.mubr.f32.mxu0 %v6750_v36  ;;  %2555 = vmatprep.mubr.f32.mxu1 %v6750_v36 }
 0x798   :  { %4844 = vmatprep.subr.bf16.mxu0 %v7734_v50  ;;  %4908 = vmatprep.subr.bf16.mxu1 %v7568_v44 }
 0x79a   :  { %4846 = vmatpush1.bf16.msra.mxu0 %v7735_v31  ;;  %4910 = vmatpush3.bf16.msra.mxu1 %v7719_v20 }
 0x79b   :  { %4848 = vmatprep.subr.bf16.mxu0 %v7736_v12  ;;  %4912 = vmatprep.subr.bf16.mxu1 %v7720_v22 }
 0x79e   :  { %4850 = vmatpush1.bf16.msra.mxu0 %v7737_v3  ;;  %4914 = vmatpush3.bf16.msra.mxu1 %v7721_v4 }
 0x79f   :  { %4852 = vmatprep.subr.bf16.mxu0 %v7738_v14  ;;  %4916 = vmatprep.subr.bf16.mxu1 %v7722_v54 }
 0x7a2   :  { %4854 = vmatpush1.bf16.msra.mxu0 %v7739_v41  ;;  %4918 = vmatpush3.bf16.msra.mxu1 %v7723_v23 }
 0x7a3   :  { %4856 = vmatprep.subr.bf16.mxu0 %v7740_v55  ;;  %4920 = vmatprep.subr.bf16.mxu1 %v7724_v47 }
 0x7a6   :  { %4858 = vmatpush1.bf16.msra.mxu0 %v7741_v11  ;;  %4922 = vmatpush3.bf16.msra.mxu1 %v7725_v1 }
 0x7a7   :  { %4860 = vmatprep.subr.bf16.mxu0 %v7742_v8  ;;  %4924 = vmatprep.subr.bf16.mxu1 %v7726_v5 }
 0x7aa   :  { %4862 = vmatpush1.bf16.msra.mxu0 %v7743_v29  ;;  %4926 = vmatpush3.bf16.msra.mxu1 %v7727_v60 }
 0x7ab   :  { %4864 = vmatprep.subr.bf16.mxu0 %v6029_v27  ;;  %4928 = vmatprep.subr.bf16.mxu1 %v7728_v58 }
 0x7ae   :  { %4866 = vmatpush1.bf16.msra.mxu0 %v7646_v10  ;;  %4930 = vmatpush3.bf16.msra.mxu1 %v7729_v35 }
 0x7af   :  { %4868 = vmatprep.subr.bf16.mxu0 %v6041_v28  ;;  %4932 = vmatprep.subr.bf16.mxu1 %v7730_v48 }
 0x7b2   :  { %4870 = vmatpush1.bf16.msra.mxu0 %v7744_v30  ;;  %4934 = vmatpush3.bf16.msra.mxu1 %v7731_v2 }
 0x7b3   :  { %4872 = vmatprep.subr.bf16.mxu0 %v7812_v42  ;;  %4936 = vmatprep.subr.bf16.mxu1 %v7813_v37 }
 0x7b5   :  { %2556 = vmatmul.mubr.f32.vlgmr.msra.gmra.mrb[32].mxu1 %v6760_v39 }
 0x7b6   :  { %4874 = vmatpush1.bf16.msra.mxu0 %v7814_v52  ;;  %4938 = vmatpush1.bf16.msra.mxu1 %v7815_v34 }
 0x7b7   :  { %4876 = vmatprep.subr.bf16.mxu0 %v7816_v13  ;;  %4940 = vmatprep.subr.bf16.mxu1 %v7817_v25 }
 0x7ba   :  { %4878 = vmatpush1.bf16.msra.mxu0 %v7818_v49  ;;  %4942 = vmatpush1.bf16.msra.mxu1 %v7819_v33  ;;  %v7829_v49 = vld [vmem:[#allocation28_spill] sm:$0xff] }
 0x7bb   :  { %4880 = vmatprep.subr.bf16.mxu0 %v7820_v15  ;;  %4944 = vmatprep.subr.bf16.mxu1 %v7821_v46  ;;  %v7830_v33 = vld [vmem:[#allocation120_spill] sm:$0xff]  ;;  %v7831_v15 = vld [vmem:[#allocation30_spill] sm:$0xff]  ;;  %v7832_v46 = vld [vmem:[#allocation121_spill] sm:$0xff] }
 0x7be   :  { %4882 = vmatpush1.bf16.msra.mxu0 %v7822_v40  ;;  %4946 = vmatpush1.bf16.msra.mxu1 %v7823_v56  ;;  %v7833_v56 = vld [vmem:[#allocation122_spill] sm:$0xff] }
 0x7bf   :  { %4884 = vmatprep.subr.bf16.mxu0 %v7824_v53  ;;  %4948 = vmatprep.subr.bf16.mxu1 %v7825_v7 }
 0x7c2   :  { %4886 = vmatpush1.bf16.msra.mxu0 %v7826_v9  ;;  %4950 = vmatpush1.bf16.msra.mxu1 %v7827_v38  ;;  %v7834_v9 = vld [vmem:[#allocation36_spill] sm:$0xff] }
 0x7c3   :  { %4888 = vmatprep.subr.bf16.mxu0 %v7828_v19  ;;  %4952 = vmatprep.subr.bf16.mxu1 %v7829_v49  ;;  %v7835_v19 = vld [vmem:[#allocation38_spill] sm:$0xff] }
 0x7c6   :  { %4890 = vmatpush1.bf16.msra.mxu0 %v7830_v33  ;;  %4954 = vmatpush1.bf16.msra.mxu1 %v7831_v15  ;;  %v7836_v33 = vld [vmem:[#allocation40_spill] sm:$0xff] }
 0x7c7   :  { %4892 = vmatprep.subr.bf16.mxu0 %v7832_v46  ;;  %4956 = vmatprep.subr.bf16.mxu1 %v7763_v57  ;;  %v7837_v46 = vld [vmem:[#allocation42_spill] sm:$0xff] }
 0x7ca   :  { %4894 = vmatpush1.bf16.msra.mxu0 %v7833_v56  ;;  %4958 = vmatpush1.bf16.msra.mxu1 %v7765_v6  ;;  %v7838_v56 = vld [vmem:[#allocation44_spill] sm:$0xff] }
 0x7cb   :  { %4896 = vmatprep.subr.bf16.mxu0 %v7766_v62  ;;  %4960 = vmatprep.subr.bf16.mxu1 %v7834_v9  ;;  %v7839_v62 = vld [vmem:[#allocation15_spill] sm:$0xff]  ;;  %v7885_v9 = vld [vmem:[#allocation78_spill] sm:$0xff] }
 0x7ce   :  { %4898 = vmatpush1.bf16.msra.mxu0 %v7768_v59  ;;  %4962 = vmatpush1.bf16.msra.mxu1 %v7835_v19  ;;  %v7840_v59 = vld [vmem:[#allocation17_spill] sm:$0xff] }
 0x7cf   :  { %4900 = vmatprep.subr.bf16.mxu0 %v7770_v43  ;;  %4964 = vmatprep.subr.bf16.mxu1 %v7836_v33  ;;  %v7841_v43 = vld [vmem:[#allocation20_spill] sm:$0xff]  ;;  %v7842_v33 = vld [vmem:[#allocation50_spill] sm:$0xff]  ;;  %v7847_v19 = vld [vmem:[#allocation25_spill] sm:$0xff] }
 0x7d2   :  { %4902 = vmatpush1.bf16.msra.mxu0 %v7772_v0  ;;  %4966 = vmatpush1.bf16.msra.mxu1 %v7837_v46  ;;  %v7843_v0 = vld [vmem:[#allocation21_spill] sm:$0xff]  ;;  %v7844_v46 = vld [vmem:[#allocation52_spill] sm:$0xff] }
 0x7d3   :  { %5000 = vmatprep.subr.bf16.mxu0 %v7684_v63  ;;  %4968 = vmatprep.subr.bf16.mxu1 %v7838_v56  ;;  %v7845_v63 = vld [vmem:[#allocation24_spill] sm:$0xff]  ;;  %v7846_v56 = vld [vmem:[#allocation54_spill] sm:$0xff] }
 0x7d5   :  { %2485 = vmatmul.mubr.f32.vlgmr.msra.gmra.mrb[12].mxu0 %v6760_v39 }
 0x7d6   :  { %5002 = vmatpush1.bf16.msra.mxu0 %v7839_v62  ;;  %4970 = vmatpush1.bf16.msra.mxu1 %v7775_v21  ;;  %v7848_v62 = vld [vmem:[#allocation56_spill] sm:$0xff]  ;;  %v7849_v21 = vld [vmem:[#allocation27_spill] sm:$0xff] }
 0x7d7   :  { %5004 = vmatprep.subr.bf16.mxu0 %v7840_v59  ;;  %4972 = vmatprep.subr.bf16.mxu1 %v7776_v61  ;;  %v7850_v59 = vld [vmem:[#allocation58_spill] sm:$0xff]  ;;  %v7851_v61 = vld [vmem:[#allocation29_spill] sm:$0xff] }
 0x7da   :  { %5006 = vmatpush1.bf16.msra.mxu0 %v7841_v43  ;;  %4974 = vmatpush1.bf16.msra.mxu1 %v7842_v33  ;;  %v7852_v43 = vld [vmem:[#allocation60_spill] sm:$0xff]  ;;  %v7853_v33 = vld [vmem:[#allocation31_spill] sm:$0xff] }
 0x7db   :  { %5008 = vmatprep.subr.bf16.mxu0 %v7843_v0  ;;  %4976 = vmatprep.subr.bf16.mxu1 %v7844_v46  ;;  %v7854_v0 = vld [vmem:[#allocation62_spill] sm:$0xff]  ;;  %v7855_v46 = vld [vmem:[#allocation33_spill] sm:$0xff] }
 0x7de   :  { %5010 = vmatpush1.bf16.msra.mxu0 %v7845_v63  ;;  %4978 = vmatpush1.bf16.msra.mxu1 %v7846_v56  ;;  %v7856_v63 = vld [vmem:[#allocation64_spill] sm:$0xff]  ;;  %v7857_v56 = vld [vmem:[#allocation35_spill] sm:$0xff] }
 0x7df   :  { %5012 = vmatprep.subr.bf16.mxu0 %v7847_v19  ;;  %4980 = vmatprep.subr.bf16.mxu1 %v7848_v62  ;;  %v7858_v19 = vld [vmem:[#allocation66_spill] sm:$0xff]  ;;  %v7859_v62 = vld [vmem:[#allocation37_spill] sm:$0xff] }
 0x7e2   :  { %5014 = vmatpush1.bf16.msra.mxu0 %v7849_v21  ;;  %4982 = vmatpush1.bf16.msra.mxu1 %v7850_v59  ;;  %v7860_v21 = vld [vmem:[#allocation68_spill] sm:$0xff]  ;;  %v7861_v59 = vld [vmem:[#allocation39_spill] sm:$0xff] }
 0x7e3   :  { %5016 = vmatprep.subr.bf16.mxu0 %v7851_v61  ;;  %4984 = vmatprep.subr.bf16.mxu1 %v7852_v43  ;;  %v7862_v61 = vld [vmem:[#allocation70_spill] sm:$0xff]  ;;  %v7863_v43 = vld [vmem:[#allocation41_spill] sm:$0xff] }
 0x7e6   :  { %5018 = vmatpush1.bf16.msra.mxu0 %v7853_v33  ;;  %4986 = vmatpush1.bf16.msra.mxu1 %v7854_v0  ;;  %v7864_v33 = vld [vmem:[#allocation72_spill] sm:$0xff]  ;;  %v7865_v0 = vld [vmem:[#allocation43_spill] sm:$0xff] }
 0x7e7   :  { %5020 = vmatprep.subr.bf16.mxu0 %v7855_v46  ;;  %4988 = vmatprep.subr.bf16.mxu1 %v7856_v63  ;;  %v7866_v46 = vld [vmem:[#allocation74_spill] sm:$0xff]  ;;  %v7867_v63 = vld [vmem:[#allocation45_spill] sm:$0xff] }
 0x7ea   :  { %5022 = vmatpush1.bf16.msra.mxu0 %v7857_v56  ;;  %4990 = vmatpush1.bf16.msra.mxu1 %v7858_v19  ;;  %v7868_v56 = vld [vmem:[#allocation77_spill] sm:$0xff]  ;;  %v7869_v19 = vld [vmem:[#allocation47_spill] sm:$0xff] }
 0x7eb   :  { %5024 = vmatprep.subr.bf16.mxu0 %v7859_v62  ;;  %4992 = vmatprep.subr.bf16.mxu1 %v7860_v21  ;;  %v7870_v62 = vld [vmem:[#allocation49_spill] sm:$0xff]  ;;  %v7871_v21 = vld [vmem:[#allocation51_spill] sm:$0xff] }
 0x7ee   :  { %5026 = vmatpush1.bf16.msra.mxu0 %v7861_v59  ;;  %4994 = vmatpush1.bf16.msra.mxu1 %v7862_v61  ;;  %v7872_v59 = vld [vmem:[#allocation53_spill] sm:$0xff]  ;;  %v7873_v61 = vld [vmem:[#allocation55_spill] sm:$0xff] }
 0x7ef   :  { %5028 = vmatprep.subr.bf16.mxu0 %v7863_v43  ;;  %4996 = vmatprep.subr.bf16.mxu1 %v7864_v33  ;;  %v7874_v43 = vld [vmem:[#allocation57_spill] sm:$0xff]  ;;  %v7875_v33 = vld [vmem:[#allocation59_spill] sm:$0xff] }
 0x7f2   :  { %5030 = vmatpush1.bf16.msra.mxu0 %v7865_v0  ;;  %4998 = vmatpush1.bf16.msra.mxu1 %v7866_v46  ;;  %v7876_v0 = vld [vmem:[#allocation61_spill] sm:$0xff]  ;;  %v7877_v46 = vld [vmem:[#allocation63_spill] sm:$0xff] }
 0x7f3   :  { %5032 = vmatprep.subr.bf16.mxu0 %v7867_v63  ;;  %5128 = vmatprep.subr.bf16.mxu1 %v7868_v56  ;;  %v7878_v63 = vld [vmem:[#allocation65_spill] sm:$0xff]  ;;  %v7879_v56 = vld [vmem:[#allocation67_spill] sm:$0xff] }
 0x7f6   :  { %5034 = vmatpush1.bf16.msra.mxu0 %v7869_v19  ;;  %v7880_v19 = vld [vmem:[#allocation69_spill] sm:$0xff] }
 0x7f7   :  { %5036 = vmatprep.subr.bf16.mxu0 %v7870_v62  ;;  %v7881_v62 = vld [vmem:[#allocation71_spill] sm:$0xff] }
 0x7fa   :  { %5038 = vmatpush1.bf16.msra.mxu0 %v7871_v21  ;;  %v7882_v21 = vld [vmem:[#allocation73_spill] sm:$0xff] }
 0x7fb   :  { %5040 = vmatprep.subr.bf16.mxu0 %v7872_v59  ;;  %v7883_v59 = vld [vmem:[#allocation75_spill] sm:$0xff] }
 0x7fe   :  { %5042 = vmatpush1.bf16.msra.mxu0 %v7873_v61  ;;  %v7884_v61 = vld [vmem:[#allocation76_spill] sm:$0xff] }
 0x7ff   :  { %5044 = vmatprep.subr.bf16.mxu0 %v7874_v43 }
 0x802   :  { %5046 = vmatpush1.bf16.msra.mxu0 %v7875_v33 }
 0x803   :  { %5048 = vmatprep.subr.bf16.mxu0 %v7876_v0 }
 0x806   :  { %5050 = vmatpush1.bf16.msra.mxu0 %v7877_v46 }
 0x807   :  { %5052 = vmatprep.subr.bf16.mxu0 %v7878_v63 }
 0x80a   :  { %5054 = vmatpush1.bf16.msra.mxu0 %v7879_v56 }
 0x80b   :  { %5056 = vmatprep.subr.bf16.mxu0 %v7880_v19 }
 0x80e   :  { %5058 = vmatpush1.bf16.msra.mxu0 %v7881_v62 }
 0x80f   :  { %5060 = vmatprep.subr.bf16.mxu0 %v7882_v21 }
 0x812   :  { %5062 = vmatpush1.bf16.msra.mxu0 %v7883_v59 }
 0x813   :  { %5064 = vmatprep.subr.bf16.mxu0 %v7884_v61 }
 0x868   :  { %v2344_v43 = vpop.f32.mrb[30].mxu1  ;;  %v2415_v33 = vpop.f32.mrb[24].mxu0 }
 0x869   :  { %v2561_v0 = vadd.f32 %v2344_v43, %v7885_v9  ;;  %v2346_v6 = vpop.f32.mrb[31].mxu1  ;;  %v2417_v46 = vpop.f32.mrb[25].mxu0  ;;  %v2563_v61 = vadd.f32 %v2415_v33, %v7641_v24 }
 0x86a   :  { %v2562_v56 = vadd.f32 %v2346_v6, %v7639_v17  ;;  %v2564_v59 = vadd.f32 %v2417_v46, %v7809_v26 }
 0x86b   :  { %v3249_v57 = vmul.f32 -1.442695, %v2561_v0 }
 0x86c   :  { %v3250_v63 = vmul.f32 -1.442695, %v2562_v56 }
 0x86d   :  { %5459 = vpow2.f32 %v3249_v57 }
 0x86e   :  { %5461 = vpow2.f32 %v3250_v63 }
 0x877   :  { %v5460_v19 = vpop.eup %5459 }
 0x878   :  { %v2571_v15 = vadd.f32 1.0, %v5460_v19  ;;  %v5462_v21 = vpop.eup %5461 }
 0x879   :  { %v2572_v38 = vadd.f32 1.0, %v5462_v21 }
 0x87a   :  { %5463 = vrcp.f32 %v2571_v15 }
 0x884   :  { %v5464_v62 = vpop.eup %5463 }
 0x885   :  { %v2577_v49 = vmul.f32 %v5464_v62, %v2564_v59 }
 0x887   :  { %v2578_v43 = vadd.f32 %v2577_v49, %v2563_v61  ;;  %v6894_v61 = vld [vmem:[%s7058_s4] ss:$0 sm:$0xff] }
 0x888   :  { %v3477_v9 = vpop.f32.mrb[32].mxu1 }
 0x889   :  { %5465 = vtanh.f32 %v2578_v43  ;;  %v3478_v0 = vpop.f32.mrb[33].mxu1 }
 0x88a   :  { %v3479_v57 = vadd.f32 %v3478_v0, %v3477_v9  ;;  %5467 = vrcp.f32 %v2572_v38 }
 0x88c   :  { %v2600_v43 = vadd.f32 %v6894_v61, %v3479_v57 }
 0x893   :  { %v5466_v6 = vpop.eup %5465 }
 0x894   :  { %v2580_v56 = vsub.f32 %v6750_v36, %v5466_v6  ;;  %v5468_v19 = vpop.eup %5467 }
 0x896   :  { %v2581_v63 = vmul.f32 %v5468_v19, %v2580_v56 }
 0x898   :  { %v6885_v15 = vadd.f32 %v5466_v6, %v2581_v63  ;;  %v7886_v6 = vld [vmem:[#allocation132_spill] sm:$0xff] }
 0x899   :  { %v324_v56 = vadd.f32 %v7886_v6, %v7566_v18 }
 0x89a   :  { %2671 = vmatprep.mubr.f32.mxu1 %v6885_v15  ;;  %2742 = vmatprep.mubr.f32.mxu0 %v6885_v15 }
 0x8a8   :  { %v2486_v33 = vpop.f32.mrb[12].mxu0 }
 0x8a9   :  { %v5321_v21 = vadd.f32 %v2486_v33, %v7810_v51  ;;  %v2488_v62 = vpop.f32.mrb[13].mxu0 }
 0x8aa   :  { %v5322_v49 = vadd.f32 %v2488_v62, %v7564_v16 }
 0x8ab   :  { %v3251_v59 = vmul.f32 -1.442695, %v5321_v21 }
 0x8ac   :  { %v3252_v46 = vmul.f32 -1.442695, %v5322_v49 }
 0x8ad   :  { %5469 = vpow2.f32 %v3251_v59 }
 0x8ae   :  { %5471 = vpow2.f32 %v3252_v46 }
 0x8b7   :  { %v5470_v9 = vpop.eup %5469 }
 0x8b8   :  { %v2594_v38 = vadd.f32 1.0, %v5470_v9  ;;  %v5472_v36 = vpop.eup %5471 }
 0x8b9   :  { %v2595_v33 = vadd.f32 1.0, %v5472_v36 }
 0x8ba   :  { %5473 = vrcp.f32 %v2594_v38  ;;  %v7927_v38 = vld [vmem:[#allocation78_spill] sm:$0xff] }
 0x8c4   :  { %v5474_v0 = vpop.eup %5473 }
 0x8c5   :  { %v2601_v19 = vmul.f32 %v5474_v0, %v2600_v43 }
 0x8c7   :  { %v2602_v63 = vadd.f32 %v2601_v19, %v324_v56 }
 0x8c9   :  { %5475 = vtanh.f32 %v2602_v63 }
 0x8ca   :  { %5477 = vrcp.f32 %v2595_v33 }
 0x8d3   :  { %v5476_v21 = vpop.eup %5475 }
 0x8d4   :  { %v2604_v62 = vsub.f32 %v6760_v39, %v5476_v21  ;;  %v5478_v59 = vpop.eup %5477  ;;  %v7917_v39 = vld [vmem:[#allocation58_spill] sm:$0xff] }
 0x8d6   :  { %v2605_v49 = vmul.f32 %v5478_v59, %v2604_v62 }
 0x8d8   :  { %v6900_v46 = vadd.f32 %v5476_v21, %v2605_v49 }
 0x8da   :  { %2672 = vmatmul.mubr.f32.vlgmr.msra.gmra.mrb[34].mxu1 %v6900_v46  ;;  %2743 = vmatmul.mubr.f32.vlgmr.msra.gmra.mrb[26].mxu0 %v6900_v46 }
 0x8db   :  { %5066 = vmatpush1.bf16.msra.mxu0 %v7733_v45  ;;  %5130 = vmatpush3.bf16.msra.mxu1 %v5961_v32  ;;  %v7890_v32 = vld [vmem:[#allocation19_spill] sm:$0xff]  ;;  %v7905_v45 = vld [vmem:[#allocation38_spill] sm:$0xff] }
 0x8dc   :  { %2813 = vmatprep.mubr.f32.mxu0 %v6885_v15  ;;  %2884 = vmatprep.mubr.f32.mxu1 %v6885_v15 }
 0x8dd   :  { %5068 = vmatprep.subr.bf16.mxu0 %v7734_v50  ;;  %5132 = vmatprep.subr.bf16.mxu1 %v7568_v44  ;;  %v7896_v44 = vld [vmem:[#allocation120_spill] sm:$0xff]  ;;  %v7906_v50 = vld [vmem:[#allocation125_spill] sm:$0xff] }
 0x8df   :  { %5070 = vmatpush1.bf16.msra.mxu0 %v7735_v31  ;;  %5134 = vmatpush3.bf16.msra.mxu1 %v7719_v20  ;;  %v7899_v20 = vld [vmem:[#allocation32_spill] sm:$0xff] }
 0x8e0   :  { %5072 = vmatprep.subr.bf16.mxu0 %v7736_v12  ;;  %5136 = vmatprep.subr.bf16.mxu1 %v7720_v22  ;;  %v7900_v22 = vld [vmem:[#allocation122_spill] sm:$0xff]  ;;  %v7907_v31 = vld [vmem:[#allocation40_spill] sm:$0xff] }
 0x8e1   :  { %v7908_v12 = vld [vmem:[#allocation126_spill] sm:$0xff] }
 0x8e3   :  { %5074 = vmatpush1.bf16.msra.mxu0 %v7737_v3  ;;  %5138 = vmatpush3.bf16.msra.mxu1 %v7721_v4  ;;  %v7901_v4 = vld [vmem:[#allocation34_spill] sm:$0xff] }
 0x8e4   :  { %5076 = vmatprep.subr.bf16.mxu0 %v7738_v14  ;;  %5140 = vmatprep.subr.bf16.mxu1 %v7722_v54  ;;  %v7898_v54 = vld [vmem:[#allocation121_spill] sm:$0xff]  ;;  %v7909_v3 = vld [vmem:[#allocation42_spill] sm:$0xff]  ;;  %v7910_v14 = vld [vmem:[#allocation44_spill] sm:$0xff] }
 0x8e7   :  { %5078 = vmatpush1.bf16.msra.mxu0 %v7739_v41  ;;  %5142 = vmatpush3.bf16.msra.mxu1 %v7723_v23  ;;  %v7897_v23 = vld [vmem:[#allocation30_spill] sm:$0xff] }
 0x8e8   :  { %5080 = vmatprep.subr.bf16.mxu0 %v7740_v55  ;;  %5144 = vmatprep.subr.bf16.mxu1 %v7724_v47  ;;  %v7891_v47 = vld [vmem:[#allocation22_spill] sm:$0xff]  ;;  %v7912_v55 = vld [vmem:[#allocation48_spill] sm:$0xff] }
 0x8e9   :  { %v7911_v41 = vld [vmem:[#allocation46_spill] sm:$0xff] }
 0x8eb   :  { %5082 = vmatpush1.bf16.msra.mxu0 %v7741_v11  ;;  %5146 = vmatpush3.bf16.msra.mxu1 %v7725_v1  ;;  %v7902_v1 = vld [vmem:[#allocation123_spill] sm:$0xff]  ;;  %v7913_v11 = vld [vmem:[#allocation50_spill] sm:$0xff] }
 0x8ec   :  { %5084 = vmatprep.subr.bf16.mxu0 %v7742_v8  ;;  %5148 = vmatprep.subr.bf16.mxu1 %v7726_v5  ;;  %v7889_v5 = vld [vmem:[#allocation115_spill] sm:$0xff]  ;;  %v7914_v8 = vld [vmem:[#allocation52_spill] sm:$0xff] }
 0x8ef   :  { %5086 = vmatpush1.bf16.msra.mxu0 %v7743_v29  ;;  %5150 = vmatpush3.bf16.msra.mxu1 %v7727_v60  ;;  %v7895_v60 = vld [vmem:[#allocation28_spill] sm:$0xff]  ;;  %v7915_v29 = vld [vmem:[#allocation54_spill] sm:$0xff] }
 0x8f0   :  { %5088 = vmatprep.subr.bf16.mxu0 %v6029_v27  ;;  %5152 = vmatprep.subr.bf16.mxu1 %v7728_v58  ;;  %v7887_v58 = vld [vmem:[#allocation114_spill] sm:$0xff] }
 0x8f1   :  { %v7892_v27 = vld [vmem:[#allocation118_spill] sm:$0xff] }
 0x8f3   :  { %5090 = vmatpush1.bf16.msra.mxu0 %v7646_v10  ;;  %5154 = vmatpush3.bf16.msra.mxu1 %v7729_v35  ;;  %v7894_v35 = vld [vmem:[#allocation119_spill] sm:$0xff]  ;;  %v7903_v10 = vld [vmem:[#allocation36_spill] sm:$0xff] }
 0x8f4   :  { %5092 = vmatprep.subr.bf16.mxu0 %v6041_v28  ;;  %5156 = vmatprep.subr.bf16.mxu1 %v7730_v48  ;;  %v7888_v48 = vld [vmem:[#allocation18_spill] sm:$0xff] }
 0x8f5   :  { %v7893_v28 = vld [vmem:[#allocation26_spill] sm:$0xff] }
 0x8f7   :  { %5094 = vmatpush1.bf16.msra.mxu0 %v7744_v30  ;;  %5158 = vmatpush3.bf16.msra.mxu1 %v7731_v2  ;;  %v7904_v2 = vld [vmem:[#allocation124_spill] sm:$0xff] }
 0x8f8   :  { %5096 = vmatprep.subr.bf16.mxu0 %v7812_v42  ;;  %5160 = vmatprep.subr.bf16.mxu1 %v7813_v37  ;;  %v7916_v30 = vld [vmem:[#allocation56_spill] sm:$0xff]  ;;  %v7919_v37 = vld [vmem:[#allocation62_spill] sm:$0xff] }
 0x8f9   :  { %v7918_v42 = vld [vmem:[#allocation60_spill] sm:$0xff] }
 0x8fa   :  { %2885 = vmatmul.mubr.f32.vlgmr.msra.gmra.mrb[36].mxu1 %v6900_v46 }
 0x8fb   :  { %5098 = vmatpush1.bf16.msra.mxu0 %v7814_v52  ;;  %5162 = vmatpush1.bf16.msra.mxu1 %v7815_v34  ;;  %v7920_v52 = vld [vmem:[#allocation64_spill] sm:$0xff]  ;;  %v7921_v34 = vld [vmem:[#allocation66_spill] sm:$0xff] }
 0x8fc   :  { %5100 = vmatprep.subr.bf16.mxu0 %v7816_v13  ;;  %5164 = vmatprep.subr.bf16.mxu1 %v7817_v25  ;;  %v7922_v13 = vld [vmem:[#allocation68_spill] sm:$0xff]  ;;  %v7923_v25 = vld [vmem:[#allocation70_spill] sm:$0xff] }
 0x8ff   :  { %5102 = vmatpush1.bf16.msra.mxu0 %v7887_v58  ;;  %5166 = vmatpush1.bf16.msra.mxu1 %v7888_v48 }
 0x900   :  { %5104 = vmatprep.subr.bf16.mxu0 %v7889_v5  ;;  %5168 = vmatprep.subr.bf16.mxu1 %v7890_v32 }
 0x903   :  { %5106 = vmatpush1.bf16.msra.mxu0 %v7822_v40  ;;  %5170 = vmatpush1.bf16.msra.mxu1 %v7891_v47  ;;  %v7924_v40 = vld [vmem:[#allocation72_spill] sm:$0xff] }
 0x904   :  { %5108 = vmatprep.subr.bf16.mxu0 %v7824_v53  ;;  %5172 = vmatprep.subr.bf16.mxu1 %v7825_v7  ;;  %v7925_v53 = vld [vmem:[#allocation74_spill] sm:$0xff]  ;;  %v7926_v7 = vld [vmem:[#allocation13_spill] sm:$0xff] }
 0x907   :  { %5110 = vmatpush1.bf16.msra.mxu0 %v7892_v27  ;;  %5174 = vmatpush1.bf16.msra.mxu1 %v7893_v28 }
 0x908   :  { %5112 = vmatprep.subr.bf16.mxu0 %v7894_v35  ;;  %5176 = vmatprep.subr.bf16.mxu1 %v7895_v60 }
 0x90b   :  { %5114 = vmatpush1.bf16.msra.mxu0 %v7896_v44  ;;  %5178 = vmatpush1.bf16.msra.mxu1 %v7897_v23 }
 0x90c   :  { %5116 = vmatprep.subr.bf16.mxu0 %v7898_v54  ;;  %5180 = vmatprep.subr.bf16.mxu1 %v7899_v20 }
 0x90f   :  { %5118 = vmatpush1.bf16.msra.mxu0 %v7900_v22  ;;  %5182 = vmatpush1.bf16.msra.mxu1 %v7901_v4 }
 0x910   :  { %5120 = vmatprep.subr.bf16.mxu0 %v7902_v1  ;;  %5184 = vmatprep.subr.bf16.mxu1 %v7903_v10 }
 0x913   :  { %5122 = vmatpush1.bf16.msra.mxu0 %v7904_v2  ;;  %5186 = vmatpush1.bf16.msra.mxu1 %v7905_v45 }
 0x914   :  { %5124 = vmatprep.subr.bf16.mxu0 %v7906_v50  ;;  %5188 = vmatprep.subr.bf16.mxu1 %v7907_v31 }
 0x917   :  { %5126 = vmatpush1.bf16.msra.mxu0 %v7908_v12  ;;  %5190 = vmatpush1.bf16.msra.mxu1 %v7909_v3  ;;  %v7928_v12 = vld [vmem:[#allocation131_spill] sm:$0xff] }
 0x918   :  { %5192 = vmatprep.subr.bf16.mxu1 %v7910_v14  ;;  %v329_v3 = vadd.f32 %v7928_v12, %v7566_v18  ;;  %v7932_v18 = vld [vmem:[#allocation21_spill] sm:$0xff]  ;;  %v7960_v12 = vmov 0.0  }
 0x91a   :  { %2814 = vmatmul.mubr.f32.vlgmr.msra.gmra.mrb[14].mxu0 %v6900_v46 }
 0x91b   :  { %5194 = vmatpush1.bf16.msra.mxu1 %v7911_v41  ;;  %3580 = vmatprep.mubr.msk.f32.mxu0 %vm5591_vm1, %v7960_v12 }
 0x91c   :  { %5196 = vmatprep.subr.bf16.mxu1 %v7912_v55 }
 0x91f   :  { %5198 = vmatpush1.bf16.msra.mxu1 %v7913_v11 }
 0x920   :  { %5200 = vmatprep.subr.bf16.mxu1 %v7914_v8 }
 0x923   :  { %5202 = vmatpush1.bf16.msra.mxu1 %v7915_v29 }
 0x924   :  { %5204 = vmatprep.subr.bf16.mxu1 %v7916_v30  ;;  %v7929_v30 = vld [vmem:[#allocation15_spill] sm:$0xff] }
 0x927   :  { %5206 = vmatpush1.bf16.msra.mxu1 %v7917_v39  ;;  %v7931_v39 = vld [vmem:[#allocation20_spill] sm:$0xff] }
 0x928   :  { %5208 = vmatprep.subr.bf16.mxu1 %v7918_v42  ;;  %v7933_v42 = vld [vmem:[#allocation24_spill] sm:$0xff] }
 0x92b   :  { %5210 = vmatpush1.bf16.msra.mxu1 %v7919_v37  ;;  %v7934_v37 = vld [vmem:[#allocation25_spill] sm:$0xff] }
 0x92c   :  { %5212 = vmatprep.subr.bf16.mxu1 %v7920_v52  ;;  %v7935_v52 = vld [vmem:[#allocation27_spill] sm:$0xff] }
 0x92f   :  { %5214 = vmatpush1.bf16.msra.mxu1 %v7921_v34  ;;  %v7937_v34 = vld [vmem:[#allocation31_spill] sm:$0xff] }
 0x930   :  { %5216 = vmatprep.subr.bf16.mxu1 %v7922_v13  ;;  %v7938_v13 = vld [vmem:[#allocation33_spill] sm:$0xff] }
 0x933   :  { %5218 = vmatpush1.bf16.msra.mxu1 %v7923_v25  ;;  %v7939_v25 = vld [vmem:[#allocation35_spill] sm:$0xff] }
 0x934   :  { %5220 = vmatprep.subr.bf16.mxu1 %v7924_v40  ;;  %v7940_v40 = vld [vmem:[#allocation37_spill] sm:$0xff] }
 0x937   :  { %5222 = vmatpush1.bf16.msra.mxu1 %v7925_v53  ;;  %v7941_v53 = vld [vmem:[#allocation39_spill] sm:$0xff] }
 0x938   :  { %5224 = vmatprep.subr.bf16.mxu1 %v7926_v7  ;;  %v7942_v7 = vld [vmem:[#allocation41_spill] sm:$0xff] }
 0x9ad   :  { %v2673_v57 = vpop.f32.mrb[34].mxu1  ;;  %v2744_v9 = vpop.f32.mrb[26].mxu0 }
 0x9ae   :  { %v2890_v36 = vadd.f32 %v2673_v57, %v7927_v38  ;;  %v2675_v43 = vpop.f32.mrb[35].mxu1  ;;  %v2746_v0 = vpop.f32.mrb[27].mxu0  ;;  %v2892_v49 = vadd.f32 %v2744_v9, %v7641_v24  ;;  %v7943_v57 = vld [vmem:[#allocation43_spill] sm:$0xff]  ;;  %v7944_v9 = vld [vmem:[#allocation45_spill] sm:$0xff] }
 0x9af   :  { %v2891_v56 = vadd.f32 %v2675_v43, %v7639_v17  ;;  %v2893_v62 = vadd.f32 %v2746_v0, %v7809_v26  ;;  %v7946_v43 = vld [vmem:[#allocation49_spill] sm:$0xff]  ;;  %v7947_v0 = vld [vmem:[#allocation51_spill] sm:$0xff] }
 0x9b0   :  { %v3253_v6 = vmul.f32 -1.442695, %v2890_v36  ;;  %v7945_v36 = vld [vmem:[#allocation47_spill] sm:$0xff] }
 0x9b1   :  { %v3254_v19 = vmul.f32 -1.442695, %v2891_v56  ;;  %v7949_v56 = vld [vmem:[#allocation55_spill] sm:$0xff] }
 0x9b2   :  { %5479 = vpow2.f32 %v3253_v6  ;;  %v7948_v6 = vld [vmem:[#allocation53_spill] sm:$0xff] }
 0x9b3   :  { %5481 = vpow2.f32 %v3254_v19  ;;  %v7950_v19 = vld [vmem:[#allocation57_spill] sm:$0xff] }
 0x9bc   :  { %v5480_v63 = vpop.eup %5479 }
 0x9bd   :  { %v2900_v33 = vadd.f32 1.0, %v5480_v63  ;;  %v5482_v21 = vpop.eup %5481  ;;  %v7951_v63 = vld [vmem:[#allocation59_spill] sm:$0xff] }
 0x9be   :  { %v2901_v48 = vadd.f32 1.0, %v5482_v21  ;;  %v7953_v21 = vld [vmem:[#allocation63_spill] sm:$0xff] }
 0x9bf   :  { %5483 = vrcp.f32 %v2900_v33  ;;  %v7952_v33 = vld [vmem:[#allocation61_spill] sm:$0xff] }
 0x9c9   :  { %v5484_v59 = vpop.eup %5483 }
 0x9ca   :  { %v2906_v58 = vmul.f32 %v5484_v59, %v2893_v62  ;;  %v7954_v62 = vld [vmem:[#allocation65_spill] sm:$0xff]  ;;  %v7955_v59 = vld [vmem:[#allocation67_spill] sm:$0xff] }
 0x9cc   :  { %v2907_v5 = vadd.f32 %v2906_v58, %v2892_v49  ;;  %v7956_v49 = vld [vmem:[#allocation69_spill] sm:$0xff]  ;;  %v7957_v58 = vld [vmem:[#allocation71_spill] sm:$0xff] }
 0x9cd   :  { %v3512_v32 = vpop.f32.mrb[36].mxu1 }
 0x9ce   :  { %5485 = vtanh.f32 %v2907_v5  ;;  %v3513_v47 = vpop.f32.mrb[37].mxu1  ;;  %v7959_v5 = vld [vmem:[#allocation75_spill] sm:$0xff] }
 0x9cf   :  { %v3514_v27 = vadd.f32 %v3513_v47, %v3512_v32  ;;  %5487 = vrcp.f32 %v2901_v48  ;;  %v7958_v48 = vld [vmem:[#allocation73_spill] sm:$0xff]  ;;  %v3100_v32 = vld [vmem:[#allocation6] sm:$0xff]  ;;  %v3101_v47 = vld [vmem:[#allocation6 + $0x8] sm:$0xff] }
 0x9d1   :  { %v2929_v50 = vadd.f32 %v6894_v61, %v3514_v27  ;;  %v7930_v61 = vld [vmem:[#allocation17_spill] sm:$0xff] }
 0x9d2   :  { %v3102_v27 = vld [vmem:[#allocation6 + $0x10] sm:$0xff] }
 0x9d8   :  { %v5486_v28 = vpop.eup %5485 }
 0x9d9   :  { %v2909_v35 = vsub.f32 %v6885_v15, %v5486_v28  ;;  %v5488_v60 = vpop.eup %5487 }
 0x9db   :  { %v2910_v44 = vmul.f32 %v5488_v60, %v2909_v35  ;;  %v5288_v35 = vpack.c.bf16 %v3101_v47, %v3100_v32  ;;  %v3103_v60 = vld [vmem:[#allocation6 + $0x18] sm:$0xff] }
 0x9dd   :  { %v6992_v23 = vadd.f32 %v5486_v28, %v2910_v44  ;;  %v5590_v28 = vmov 0.0|0.0   ;;  %v5291_v44 = vpack.c.bf16 %v3103_v60, %v3102_v27 }
 0x9de   :  { %5287 = vmatprep.subr.bf16.mxu0 %v5590_v28 }
 0x9df   :  { %3000 = vmatprep.mubr.f32.mxu1 %v6992_v23  ;;  %5289 = vmatpush3.bf16.msra.mxu0 %v5288_v35 }
 0x9e0   :  { %5290 = vmatprep.subr.bf16.mxu0 %v5590_v28 }
 0x9e3   :  { %5292 = vmatpush3.bf16.msra.mxu0 %v5291_v44 }
 0x9e4   :  { %5293 = vmatprep.subr.bf16.mxu0 %v5590_v28 }
 0x9ed   :  { %v2815_v54 = vpop.f32.mrb[14].mxu0 }
 0x9ee   :  { %v5323_v20 = vadd.f32 %v2815_v54, %v7810_v51  ;;  %v2817_v22 = vpop.f32.mrb[15].mxu0  ;;  %v3104_v54 = vld [vmem:[#allocation6 + $0x20] sm:$0xff] }
 0x9ef   :  { %v5324_v1 = vadd.f32 %v2817_v22, %v7564_v16 }
 0x9f0   :  { %v3255_v4 = vmul.f32 -1.442695, %v5323_v20  ;;  %v3105_v20 = vld [vmem:[#allocation6 + $0x28] sm:$0xff] }
 0x9f1   :  { %v3256_v10 = vmul.f32 -1.442695, %v5324_v1  ;;  %v5294_v22 = vpack.c.bf16 %v3105_v20, %v3104_v54  ;;  %v3107_v1 = vld [vmem:[#allocation6 + $0x38] sm:$0xff] }
 0x9f2   :  { %5489 = vpow2.f32 %v3255_v4  ;;  %v3106_v4 = vld [vmem:[#allocation6 + $0x30] sm:$0xff] }
 0x9f3   :  { %5491 = vpow2.f32 %v3256_v10  ;;  %5295 = vmatpush3.bf16.msra.mxu0 %v5294_v22  ;;  %v5297_v10 = vpack.c.bf16 %v3107_v1, %v3106_v4 }
 0x9f4   :  { %5296 = vmatprep.subr.bf16.mxu0 %v5590_v28 }
 0x9f7   :  { %5298 = vmatpush3.bf16.msra.mxu0 %v5297_v10 }
 0x9f8   :  { %5299 = vmatprep.subr.bf16.mxu0 %v5590_v28 }
 0x9fc   :  { %v5490_v2 = vpop.eup %5489 }
 0x9fd   :  { %v2923_v45 = vadd.f32 1.0, %v5490_v2  ;;  %v5492_v15 = vpop.eup %5491  ;;  %v3108_v2 = vld [vmem:[#allocation6 + $0x40] sm:$0xff] }
 0x9fe   :  { %v2924_v51 = vadd.f32 1.0, %v5492_v15 }
 0x9ff   :  { %5493 = vrcp.f32 %v2923_v45  ;;  %v3109_v45 = vld [vmem:[#allocation6 + $0x48] sm:$0xff] }
 0xa00   :  { %v5300_v15 = vpack.c.bf16 %v3109_v45, %v3108_v2 }
 0xa02   :  { %5301 = vmatpush3.bf16.msra.mxu0 %v5300_v15 }
 0xa03   :  { %5302 = vmatprep.subr.bf16.mxu0 %v5590_v28 }
 0xa09   :  { %v5494_v31 = vpop.eup %5493 }
 0xa0a   :  { %v2930_v14 = vmul.f32 %v5494_v31, %v2929_v50  ;;  %v3110_v50 = vld [vmem:[#allocation6 + $0x50] sm:$0xff]  ;;  %v3111_v31 = vld [vmem:[#allocation6 + $0x58] sm:$0xff] }
 0xa0c   :  { %v2931_v41 = vadd.f32 %v2930_v14, %v329_v3  ;;  %v5303_v3 = vpack.c.bf16 %v3111_v31, %v3110_v50  ;;  %v3112_v14 = vld [vmem:[#allocation6 + $0x60] sm:$0xff] }
 0xa0e   :  { %5495 = vtanh.f32 %v2931_v41  ;;  %v3113_v41 = vld [vmem:[#allocation6 + $0x68] sm:$0xff]  ;;  %5304 = vmatpush3.bf16.msra.mxu0 %v5303_v3 }
 0xa0f   :  { %5497 = vrcp.f32 %v2924_v51  ;;  %v5306_v51 = vpack.c.bf16 %v3113_v41, %v3112_v14  ;;  %5305 = vmatprep.subr.bf16.mxu0 %v5590_v28 }
 0xa12   :  { %5307 = vmatpush3.bf16.msra.mxu0 %v5306_v51 }
 0xa13   :  { %5308 = vmatprep.subr.bf16.mxu0 %v5590_v28 }
 0xa18   :  { %v5496_v55 = vpop.eup %5495 }
 0xa19   :  { %v2933_v16 = vsub.f32 %v6900_v46, %v5496_v55  ;;  %v5498_v11 = vpop.eup %5497  ;;  %v7936_v46 = vld [vmem:[#allocation29_spill] sm:$0xff] }
 0xa1b   :  { %v2934_v8 = vmul.f32 %v5498_v11, %v2933_v16  ;;  %v3115_v16 = vld [vmem:[#allocation6 + $0x78] sm:$0xff] }
 0xa1d   :  { %v2935_v29 = vadd.f32 %v5496_v55, %v2934_v8  ;;  %v3114_v55 = vld [vmem:[#allocation6 + $0x70] sm:$0xff] }
 0xa1e   :  { %v5309_v11 = vpack.c.bf16 %v3115_v16, %v3114_v55 }
 0xa1f   :  { %3001 = vmatmul.mubr.f32.vlgmr.msra.gmra.mrb[38].mxu1 %v2935_v29 }
 0xa20   :  { %5226 = vmatpush1.bf16.msra.mxu1 %v7929_v30  ;;  %3071 = vmatprep.mubr.f32.mxu1 %v6992_v23 }
 0xa21   :  { %5228 = vmatprep.subr.bf16.mxu1 %v7930_v61  ;;  %5310 = vmatpush3.bf16.msra.mxu0 %v5309_v11 }
 0xa24   :  { %5230 = vmatpush1.bf16.msra.mxu1 %v7931_v39 }
 0xa25   :  { %5232 = vmatprep.subr.bf16.mxu1 %v7932_v18 }
 0xa28   :  { %5234 = vmatpush1.bf16.msra.mxu1 %v7933_v42 }
 0xa29   :  { %5236 = vmatprep.subr.bf16.mxu1 %v7934_v37 }
 0xa2c   :  { %5238 = vmatpush1.bf16.msra.mxu1 %v7935_v52 }
 0xa2d   :  { %5240 = vmatprep.subr.bf16.mxu1 %v7936_v46 }
 0xa30   :  { %5242 = vmatpush1.bf16.msra.mxu1 %v7937_v34 }
 0xa31   :  { %5244 = vmatprep.subr.bf16.mxu1 %v7938_v13 }
 0xa34   :  { %5246 = vmatpush1.bf16.msra.mxu1 %v7939_v25 }
 0xa35   :  { %5248 = vmatprep.subr.bf16.mxu1 %v7940_v40 }
 0xa38   :  { %5250 = vmatpush1.bf16.msra.mxu1 %v7941_v53 }
 0xa39   :  { %5252 = vmatprep.subr.bf16.mxu1 %v7942_v7 }
 0xa3c   :  { %5254 = vmatpush1.bf16.msra.mxu1 %v7943_v57 }
 0xa3d   :  { %5256 = vmatprep.subr.bf16.mxu1 %v7944_v9 }
 0xa40   :  { %5258 = vmatpush1.bf16.msra.mxu1 %v7945_v36 }
 0xa41   :  { %5260 = vmatprep.subr.bf16.mxu1 %v7946_v43 }
 0xa44   :  { %5262 = vmatpush1.bf16.msra.mxu1 %v7947_v0  ;;  %v3259_v0 = vld [vmem:[%s7061_s7] ss:$0 sm:$0xff] }
 0xa45   :  { %5264 = vmatprep.subr.bf16.mxu1 %v7948_v6 }
 0xa48   :  { %5266 = vmatpush1.bf16.msra.mxu1 %v7949_v56 }
 0xa49   :  { %5268 = vmatprep.subr.bf16.mxu1 %v7950_v19 }
 0xa4c   :  { %5270 = vmatpush1.bf16.msra.mxu1 %v7951_v63 }
 0xa4d   :  { %5272 = vmatprep.subr.bf16.mxu1 %v7952_v33 }
 0xa50   :  { %5274 = vmatpush1.bf16.msra.mxu1 %v7953_v21 }
 0xa51   :  { %5276 = vmatprep.subr.bf16.mxu1 %v7954_v62 }
 0xa54   :  { %5278 = vmatpush1.bf16.msra.mxu1 %v7955_v59 }
 0xa55   :  { %5280 = vmatprep.subr.bf16.mxu1 %v7956_v49 }
 0xa58   :  { %5282 = vmatpush1.bf16.msra.mxu1 %v7957_v58 }
 0xa59   :  { %5284 = vmatprep.subr.bf16.mxu1 %v7958_v48 }
 0xa5c   :  { %5286 = vmatpush1.bf16.msra.mxu1 %v7959_v5 }
 0xa5f   :  { %3072 = vmatmul.mubr.f32.vlgmr.msra.gmra.mrb[40].mxu1 %v2935_v29 }
 0xaf2   :  { %v3002_v8 = vpop.f32.mrb[38].mxu1 }
 0xaf3   :  { %v3004_v29 = vpop.f32.mrb[39].mxu1  ;;  %v3078_v30 = vadd.f32 %v3002_v8, %v7927_v38 }
 0xaf4   :  { %v3079_v39 = vadd.f32 %v3004_v29, %v7639_v17 }
 0xaf5   :  { %v3257_v61 = vmul.f32 -1.442695, %v3078_v30 }
 0xaf6   :  { %v3258_v42 = vmul.f32 -1.442695, %v3079_v39 }
 0xaf7   :  { %5499 = vpow2.f32 %v3257_v61 }
 0xaf8   :  { %5501 = vpow2.f32 %v3258_v42 }
 0xb01   :  { %v5500_v18 = vpop.eup %5499 }
 0xb02   :  { %v3088_v37 = vadd.f32 1.0, %v5500_v18  ;;  %v5502_v34 = vpop.eup %5501 }
 0xb03   :  { %v3089_v7 = vadd.f32 1.0, %v5502_v34 }
 0xb04   :  { %5503 = vrcp.f32 %v3088_v37 }
 0xb0e   :  { %v5504_v25 = vpop.eup %5503 }
 0xb32   :  { %v3073_v52 = vpop.f32.mrb[40].mxu1 }
 0xb33   :  { %v3075_v46 = vpop.f32.mrb[41].mxu1  ;;  %v3080_v40 = vadd.f32 %v3073_v52, %v7641_v24 }
 0xb34   :  { %v3081_v13 = vadd.f32 %v3075_v46, %v7809_v26 }
 0xb36   :  { %v3094_v53 = vmul.f32 %v5504_v25, %v3081_v13 }
 0xb38   :  { %v3095_v38 = vadd.f32 %v3094_v53, %v3080_v40 }
 0xb3a   :  { %5505 = vtanh.f32 %v3095_v38 }
 0xb3b   :  { %5507 = vrcp.f32 %v3089_v7 }
 0xb44   :  { %v5506_v57 = vpop.eup %5505 }
 0xb45   :  { %v3097_v17 = vsub.f32 %v6992_v23, %v5506_v57  ;;  %v5508_v9 = vpop.eup %5507 }
 0xb47   :  { %v3098_v36 = vmul.f32 %v5508_v9, %v3097_v17 }
 0xb49   :  { %v3099_v43 = vadd.f32 %v5506_v57, %v3098_v36 }
 0xb4b   :  { %3581 = vmatmul.mubr.f32.vlgmr.msra.gmra.mrb[28].mxu0 %v3099_v43 }
 0xc1e   :  { %v3189_v26 = vpop.f32.mrb[28].mxu0 }
 0xc1f   :  { %v3190_v24 = vadd.f32 %v3259_v0, %v3189_v26  ;;  %v3582_v6 = vpop.f32.mrb[29].mxu0 }
 0xc21   :  { %3193 = vst [vmem:[#allocation8] sm:$0xff] %v3190_v24 }
 0xc22   :  { %5566 = shalt.err (!%p5563_p6)
}
 0xc23   :  { %s5567_s1 = scalar_lea.hbm %s7062_s8, 128 }
 0xc24   :  { %p5568_p7 = scmp.ne.s32.totalorder %s7062_s8, %s5567_s1  ;;  %p5571_p8 = scmp.lt.u32.totalorder %s5567_s1, %s7062_s8 }
 0xc26   :  { %p5573_p9 = pnand %p5571_p8, %p5568_p7 }
 0xc28   :  { %5576 = shalt.err (!%p5573_p9)
}
 0xc29   :  { %3203 = dma.vmem_to_hbm [thread:$0]  %s3201_s21, 128, %s7062_s8, [#allocation5]  }
 0xc2a   :  { %5581 = dma.done.wait [#allocation5], 128  }
 0xc2b   :  { %5582 = vsyncadd [#allocation5], 4294967168 }
 0xc2c   :  { %3207 = vsyncpa [#allocation4], 1 }
 0xc2d   :  { %3208 = vsyncpa [#allocation7], 1 }
 0xc2e   :  { %3209 = vsyncpa [#allocation5], 1 }

</bundles_post_ra>
